<compile_context>
chip_gen: v6e
topology: v6e:2x2x1
jax: 0.10.0
libtpu: 0.0.40
codegen_flags: <defaults>
</compile_context>

<pallas_src>
import numpy as np
import jax
import jax.numpy as jnp
from jax import lax
from jax.experimental import pallas as pl
from jax.experimental.pallas import tpu as pltpu


# ----------------------------------------------------------------------------
# Kernel factory: one grid step per batch element, everything fused, flat
# lane-dense spatial layout (last dim = H*W).
# ----------------------------------------------------------------------------
def _make_kernel(H, W, Hh, Wh, use_gather):
    HW = H * W
    PW = (H + 2) * W + 2          # [0 | top pad row | H*W map | bottom pad row | 0]
    Qh = Hh * Wh
    f32 = jnp.float32

    # flow -> source-pixel-coordinate scales (align_corners=True grid_sample)
    sx_h = (Wh - 1) / (2.0 * W)
    sy_h = (Hh - 1) / (2.0 * H)
    sx_l = (W - 1) / (2.0 * W)
    sy_l = (H - 1) / (2.0 * H)

    def kernel(low_pv_ref, hfe_ref, w5_ref, kup_ref, coords_ref, out_ref,
               slab_ref, gsrc_ref):
        C = hfe_ref.shape[1]
        low_pv = low_pv_ref[0]              # (C, PW)  host-padded flat low feature
        hfe = hfe_ref[0]                    # (C, Qh)  flat h feature
        coords = coords_ref[...]            # (8, HW)  per-pixel constants

        # ---- bilinear upsample (align_corners=True) of the RAW h_feature with
        #      the conv's zero border fused in (zero rows/cols of the kron
        #      matrix).  The 1x1 down convs are folded into w5 on the host.
        pv_h = jnp.dot(hfe, kup_ref[...], preferred_element_type=f32)   # (C, PW)

        # ---- im2col: 9 lane-shifted taps per branch into one (18*C, HW) slab.
        #      A tap at (kh, kw) is just the flat padded map shifted by
        #      kh*W + kw lanes; the left/right border columns are masked.
        not_left = coords[4:5, :]
        not_right = coords[5:6, :]
        i = 0
        for pv in (pv_h, low_pv):           # h-branch taps first, then l-branch
            for kh in range(3):
                for kw in range(3):
                    off = kh * W + kw
                    tap = pv[:, off:off + HW]
                    if kw == 0:
                        tap = tap * not_left
                    elif kw == 2:
                        tap = tap * not_right
                    slab_ref[i * C:(i + 1) * C, :] = tap
                    i += 1

        # ---- fused flow_make(4ch) + flow_gate(1ch): ONE K = 18*C matmul ------
        conv5 = jnp.dot(w5_ref[...], slab_ref[...],
                        preferred_element_type=f32)                      # (5, HW)
        gate = jax.nn.sigmoid(conv5[4:5, :])                             # (1, HW)

        low_flat = low_pv[:, W + 1:W + 1 + HW]            # un-padded low feature

        # sampling coordinates in source-pixel space (align_corners=True)
        ix_h = coords[0:1, :] + conv5[0:1, :] * sx_h
        iy_h = coords[1:2, :] + conv5[1:2, :] * sy_h
        ix_l = coords[2:3, :] + conv5[2:3, :] * sx_l
        iy_l = coords[3:4, :] + conv5[3:4, :] * sy_l

        def warp(src, hs, ws, ix, iy):
            # src: (C, hs*ws) for the one-hot path, (C, HW) (zero-extended) for
            # the gather path.  Bilinear grid_sample, zero padding: each of the
            # 4 taps that falls outside the source contributes exactly 0.
            x0f = jnp.floor(ix)
            y0f = jnp.floor(iy)
            x0 = x0f.astype(jnp.int32)
            y0 = y0f.astype(jnp.int32)
            tx = ix - x0f
            ty = iy - y0f
            if use_gather:
                acc = jnp.zeros((C, HW), f32)
            else:
                Q = hs * ws
                qio = lax.broadcasted_iota(jnp.int32, (Q, HW), 0)
                sel = jnp.zeros((Q, HW), f32)
            for dy in (0, 1):
                for dx in (0, 1):
                    xc = x0 + dx
                    yc = y0 + dy
                    inb = (xc >= 0) & (xc < ws) & (yc >= 0) & (yc < hs)
                    wgt = jnp.where(
                        inb,
                        (tx if dx else 1.0 - tx) * (ty if dy else 1.0 - ty),
                        0.0)                                             # (1, HW)
                    # clipped flat index: OOB taps point at a valid (but unused)
                    # texel; their weight is already zero.
                    idx = (jnp.clip(yc, 0, hs - 1) * ws
                           + jnp.clip(xc, 0, ws - 1))                    # (1, HW)
                    if use_gather:
                        idx_b = jnp.broadcast_to(idx, (C, HW))
                        acc = acc + jnp.take_along_axis(src, idx_b, axis=1) * wgt
                    else:
                        sel = sel + jnp.where(qio == idx, wgt, 0.0)
            if use_gather:
                return acc
            return jnp.dot(src, sel, preferred_element_type=f32)         # (C, HW)

        if use_gather:
            if Qh == HW:
                src_h = hfe
            else:
                # zero-extended copy so operand/indices shapes match (C, HW);
                # indices never exceed Qh-1 so the tail is never read.
                gsrc_ref[...] = jnp.zeros((C, HW), f32)
                gsrc_ref[:, 0:Qh] = hfe
                src_h = gsrc_ref[...]
            src_l = low_flat
        else:
            src_h = hfe
            src_l = low_flat

        h_warp = warp(src_h, Hh, Wh, ix_h, iy_h)
        l_warp = warp(src_l, H, W, ix_l, iy_l)

        out_ref[0] = (h_warp * gate + l_warp * (1.0 - gate)).astype(out_ref.dtype)

    return kernel


# ----------------------------------------------------------------------------
# Host-side helpers
# ----------------------------------------------------------------------------
def _interp_matrix(out_size, in_size):
    """Row-interp matrix for bilinear resize with align_corners=True (numpy)."""
    m = np.zeros((out_size, in_size), np.float32)
    if out_size == 1:
        m[0, 0] = 1.0
        return m
    coords = np.arange(out_size) * (in_size - 1) / (out_size - 1)
    lo = np.floor(coords).astype(np.int64)
    hi = np.minimum(lo + 1, in_size - 1)
    frac = (coords - lo).astype(np.float32)
    for o in range(out_size):
        m[o, lo[o]] += 1.0 - frac[o]
        m[o, hi[o]] += frac[o]
    return m


def init_params(key, inplane, outplane):
    k1, k2, k3, k4 = jax.random.split(key, 4)
    s1 = 1.0 / np.sqrt(inplane)
    s3 = 1.0 / np.sqrt(2 * outplane * 9)
    return dict(
        down_h=jax.random.normal(k1, (outplane, inplane, 1, 1), jnp.float32) * s1,
        down_l=jax.random.normal(k2, (outplane, inplane, 1, 1), jnp.float32) * s1,
        flow_make=jax.random.normal(k3, (4, 2 * outplane, 3, 3), jnp.float32) * s3,
        flow_gate=jax.random.normal(k4, (1, 2 * outplane, 3, 3), jnp.float32) * s3,
    )


def aligned_module_v2(low_feature, h_feature, params, use_gather=True):
    """Forward pass of AlignedModulev2.  I/O is NCHW (matches the PyTorch module)."""
    B, C, H, W = low_feature.shape
    Hh, Wh = h_feature.shape[2], h_feature.shape[3]
    c_out = params['down_h'].shape[0]
    HW, Qh, PW = H * W, Hh * Wh, (H + 2) * W + 2
    assert Qh <= HW, "h_feature is expected to be the coarser pyramid level"
    f32 = jnp.float32

    # ---- fold the 1x1 down convs into the fused flow_make+flow_gate weights --
    wdh = params['down_h'][:, :, 0, 0].astype(f32)          # (C_out, C_in)
    wdl = params['down_l'][:, :, 0, 0].astype(f32)
    wf = jnp.concatenate([params['flow_make'], params['flow_gate']], axis=0)
    wf_h, wf_l = wf[:, :c_out], wf[:, c_out:]               # (5, C_out, 3, 3)
    wfh_c = jnp.einsum('fokl,oc->fckl', wf_h, wdh)          # (5, C_in, 3, 3)
    wfl_c = jnp.einsum('fokl,oc->fckl', wf_l, wdl)
    w5 = jnp.concatenate(
        [jnp.transpose(wfh_c, (0, 2, 3, 1)).reshape(5, 9 * C),
         jnp.transpose(wfl_c, (0, 2, 3, 1)).reshape(5, 9 * C)],
        axis=1).astype(f32)                                  # (5, 18*C)

    # ---- upsample (align_corners=True) fused with the conv zero border ------
    uy_pad = np.pad(_interp_matrix(H, Hh), ((1, 1), (0, 0)))    # (H+2, Hh)
    ux = _interp_matrix(W, Wh)                                  # (W, Wh)
    kup = np.zeros((Qh, PW), np.float32)
    kup[:, 1:1 + (H + 2) * W] = np.kron(uy_pad, ux).T
    kup = jnp.asarray(kup)

    # ---- per-pixel constants (base sampling coords + conv border masks) ------
    x = np.arange(W, dtype=np.float32)
    y = np.arange(H, dtype=np.float32)
    gx = np.tile(-1.0 + 2.0 * x / max(W - 1, 1), H)             # (HW,)
    gy = np.repeat(-1.0 + 2.0 * y / max(H - 1, 1), W)
    xcol = np.tile(np.arange(W), H)
    coords = np.zeros((8, HW), np.float32)
    coords[0] = (gx + 1.0) * 0.5 * (Wh - 1)
    coords[1] = (gy + 1.0) * 0.5 * (Hh - 1)
    coords[2] = (gx + 1.0) * 0.5 * (W - 1)
    coords[3] = (gy + 1.0) * 0.5 * (H - 1)
    coords[4] = (xcol != 0).astype(np.float32)
    coords[5] = (xcol != W - 1).astype(np.float32)
    coords = jnp.asarray(coords)

    # ---- lane-dense, de-duplicated feature inputs (each DMA'd once) ----------
    low_flat = low_feature.reshape(B, C, HW).astype(f32)
    low_pv = jnp.pad(low_flat, ((0, 0), (0, 0), (W + 1, W + 1)))   # (B, C, PW)
    hfe_flat = h_feature.reshape(B, C, Qh).astype(f32)

    kernel = _make_kernel(H, W, Hh, Wh, use_gather)

    # rough per-step VMEM budget: double-buffered inputs/outputs + scratch +
    # ~24 (C, HW)-sized f32 temporaries; clamped to a safe range.
    est_bytes = 4 * (2 * (C * PW + C * Qh + 90 * C + Qh * PW + 8 * HW + C * HW)
                     + 18 * C * HW + 24 * C * HW)
    vmem_limit = int(min(max(est_bytes, 16 * 2 ** 20), 64 * 2 ** 20))

    out_flat = pl.pallas_call(
        kernel,
        out_shape=jax.ShapeDtypeStruct((B, C, HW), low_feature.dtype),
        grid_spec=pltpu.PrefetchScalarGridSpec(
            num_scalar_prefetch=0,
            grid=(B,),
            in_specs=[
                pl.BlockSpec((1, C, PW), lambda b: (b, 0, 0)),   # padded flat low
                pl.BlockSpec((1, C, Qh), lambda b: (b, 0, 0)),   # flat h feature
                pl.BlockSpec((5, 18 * C), lambda b: (0, 0)),     # fused conv weight
                pl.BlockSpec((Qh, PW), lambda b: (0, 0)),        # upsample+pad matrix
                pl.BlockSpec((8, HW), lambda b: (0, 0)),         # per-pixel constants
            ],
            out_specs=pl.BlockSpec((1, C, HW), lambda b: (b, 0, 0)),
            scratch_shapes=[
                pltpu.VMEM((18 * C, HW), jnp.float32),           # im2col slab
                pltpu.VMEM((C, HW), jnp.float32),                # zero-extended warp src
            ],
        ),
        compiler_params=pltpu.CompilerParams(
            dimension_semantics=("parallel",),
            vmem_limit_bytes=vmem_limit,
        ),
    )(low_pv, hfe_flat, w5, kup, coords)
    return out_flat.reshape(B, C, H, W)


# ----------------------------------------------------------------------------
# Pure-JAX f32 reference (PyTorch semantics) for a correctness check
# ----------------------------------------------------------------------------
def reference_forward(low, hfe, params):
    prec = jax.lax.Precision.HIGHEST
    B, c_in, h, w = low.shape
    h_h, w_h = hfe.shape[2], hfe.shape[3]
    wdh = params['down_h'][:, :, 0, 0]
    wdl = params['down_l'][:, :, 0, 0]

    lf = jnp.einsum('dc,bchw->bdhw', wdl, low, precision=prec)
    hd = jnp.einsum('dc,bchw->bdhw', wdh, hfe, precision=prec)

    uy = _interp_matrix(h, h_h)
    ux = _interp_matrix(w, w_h)
    hu = jnp.einsum('ph,bdhw->bdpw', uy, hd, precision=prec)
    hu = jnp.einsum('qw,bdpw->bdpq', ux, hu, precision=prec)     # (B, C_out, h, w)

    cat = jnp.concatenate([hu, lf], axis=1)
    wflow = jnp.concatenate([params['flow_make'], params['flow_gate']], axis=0)
    conv5 = jax.lax.conv_general_dilated(
        cat, wflow, (1, 1), 'SAME',
        dimension_numbers=('NCHW', 'OIHW', 'NCHW'), precision=prec)

    gate = jax.nn.sigmoid(conv5[:, 4:5])
    flow = conv5[:, :4]

    gx_base = jnp.broadcast_to(jnp.linspace(-1.0, 1.0, w)[None, :], (h, w))
    gy_base = jnp.broadcast_to(jnp.linspace(-1.0, 1.0, h)[:, None], (h, w))

    def grid_sample(src, gx, gy):
        hs, ws = src.shape[2], src.shape[3]
        ixx = (gx + 1.0) * 0.5 * (ws - 1)
        iyy = (gy + 1.0) * 0.5 * (hs - 1)
        x0 = jnp.floor(ixx)
        y0 = jnp.floor(iyy)
        srcf = src.reshape(src.shape[0], src.shape[1], hs * ws)
        out = jnp.zeros(src.shape[:2] + gx.shape[1:], src.dtype)
        for dy in (0.0, 1.0):
            for dx in (0.0, 1.0):
                xc = x0 + dx
                yc = y0 + dy
                wgt = (1.0 - jnp.abs(ixx - xc)) * (1.0 - jnp.abs(iyy - yc))
                inb = (xc >= 0) & (xc <= ws - 1) & (yc >= 0) & (yc <= hs - 1)
                idx = (jnp.clip(yc, 0, hs - 1) * ws
                       + jnp.clip(xc, 0, ws - 1)).astype(jnp.int32)
                vals = jax.vmap(lambda s2, i2: s2[:, i2])(srcf, idx)
                out = out + vals * (wgt * inb)[:, None, :, :]
        return out

    gxu = gx_base[None] + flow[:, 0] / float(w)
    gyu = gy_base[None] + flow[:, 1] / float(h)
    gxd = gx_base[None] + flow[:, 2] / float(w)
    gyd = gy_base[None] + flow[:, 3] / float(h)
    h_warp = grid_sample(hfe, gxu, gyu)
    l_warp = grid_sample(low, gxd, gyd)
    return h_warp * gate + l_warp * (1.0 - gate)


# ----------------------------------------------------------------------------
if __name__ == "__main__":
    key = jax.random.PRNGKey(0)
    B, inplane, outplane = 2, 16, 16
    h, w = 16, 16        # low_feature spatial (= output size)
    h_h, w_h = 8, 8      # h_feature spatial (coarser level)

    ks = jax.random.split(key, 3)
    low = jax.random.normal(ks[0], (B, inplane, h, w), jnp.float32)
    hfe = jax.random.normal(ks[1], (B, inplane, h_h, w_h), jnp.float32)
    params = init_params(ks[2], inplane, outplane)

    ref = reference_forward(low, hfe, params)
    # default-precision MXU + sampling-coordinate sensitivity of grid_sample
    # vs an f32/HIGHEST reference => loose but safe bound (same as before).
    tol = 2e-1

    def run(use_gather):
        o = jax.block_until_ready(
            aligned_module_v2(low, hfe, params, use_gather=use_gather))
        return o, float(jnp.max(jnp.abs(o - ref)))

    out, err, ok = None, None, False
    try:
        out, err = run(True)
        ok = np.isfinite(err) and err < tol
    except Exception:
        ok = False
    if not ok:
        # TODO(synk): engaged only if this Mosaic build cannot lower the lane
        # take_along_axis gather; the one-hot warp fallback is O((H*W)^2) and
        # should not be used at production sizes.
        out, err = run(False)

    assert out.shape == (B, inplane, h, w)
    assert err < tol, f"max abs diff {err}"
    print("KERNEL_OK")
</pallas_src>

<mosaic_0001>
module attributes {stable_mosaic.version = 11 : i64} {
  func.func @kernel(%arg0: i32, %arg1: memref<1x16x290xf32, #tpu.memory_space<vmem>>, %arg2: memref<1x16x64xf32, #tpu.memory_space<vmem>>, %arg3: memref<5x288xf32, #tpu.memory_space<vmem>>, %arg4: memref<64x290xf32, #tpu.memory_space<vmem>>, %arg5: memref<8x256xf32, #tpu.memory_space<vmem>>, %arg6: memref<1x16x256xf32, #tpu.memory_space<vmem>>, %arg7: memref<288x256xf32, #tpu.memory_space<vmem>>, %arg8: memref<16x256xf32, #tpu.memory_space<vmem>>) attributes {dimension_semantics = [#tpu.dimension_semantics<parallel>], iteration_bounds = array<i64: 2>, scalar_prefetch = 0 : i64, scratch_operands = 2 : i64, tpu.core_type = #tpu.core_type<tc>, window_params = [{transform_indices = @transform_0, window_bounds = array<i64: 1, 16, 290>}, {transform_indices = @transform_1, window_bounds = array<i64: 1, 16, 64>}, {pipeline_mode = #tpu.pipeline_mode<synchronous>, transform_indices = @transform_2, window_bounds = array<i64: 5, 288>}, {pipeline_mode = #tpu.pipeline_mode<synchronous>, transform_indices = @transform_3, window_bounds = array<i64: 64, 290>}, {pipeline_mode = #tpu.pipeline_mode<synchronous>, transform_indices = @transform_4, window_bounds = array<i64: 8, 256>}, {transform_indices = @transform_5, window_bounds = array<i64: 1, 16, 256>}]} {
    %c0 = arith.constant 0 : index
    %c0_0 = arith.constant 0 : index
    %c0_1 = arith.constant 0 : index
    %0 = vector.load %arg1[%c0, %c0_0, %c0_1] : memref<1x16x290xf32, #tpu.memory_space<vmem>>, vector<1x16x290xf32>
    %1 = vector.shape_cast %0 : vector<1x16x290xf32> to vector<16x290xf32>
    %c0_2 = arith.constant 0 : index
    %c0_3 = arith.constant 0 : index
    %c0_4 = arith.constant 0 : index
    %2 = vector.load %arg2[%c0_2, %c0_3, %c0_4] : memref<1x16x64xf32, #tpu.memory_space<vmem>>, vector<1x16x64xf32>
    %3 = vector.shape_cast %2 : vector<1x16x64xf32> to vector<16x64xf32>
    %c0_5 = arith.constant 0 : index
    %c0_6 = arith.constant 0 : index
    %4 = vector.load %arg5[%c0_5, %c0_6] : memref<8x256xf32, #tpu.memory_space<vmem>>, vector<8x256xf32>
    %c0_7 = arith.constant 0 : index
    %c0_8 = arith.constant 0 : index
    %5 = vector.load %arg4[%c0_7, %c0_8] : memref<64x290xf32, #tpu.memory_space<vmem>>, vector<64x290xf32>
    %cst = arith.constant dense<0.000000e+00> : vector<16x290xf32>
    %6 = tpu.matmul %3, %5, %cst {dimension_numbers = #tpu.dot_dimension_numbers<[1], [0], [0], [1], [0, 0, 1, 1], [], []>} : vector<16x64xf32>, vector<64x290xf32>, vector<16x290xf32> -> vector<16x290xf32>
    %7 = vector.extract_strided_slice %4 {offsets = [4, 0], sizes = [1, 256], strides = [1, 1]} : vector<8x256xf32> to vector<1x256xf32>
    %8 = vector.extract_strided_slice %4 {offsets = [5, 0], sizes = [1, 256], strides = [1, 1]} : vector<8x256xf32> to vector<1x256xf32>
    %9 = vector.extract_strided_slice %6 {offsets = [0, 0], sizes = [16, 256], strides = [1, 1]} : vector<16x290xf32> to vector<16x256xf32>
    %10 = vector.broadcast %7 : vector<1x256xf32> to vector<16x256xf32>
    %11 = arith.mulf %9, %10 : vector<16x256xf32>
    %c0_9 = arith.constant 0 : index
    %c0_10 = arith.constant 0 : index
    %12 = vector.load %arg7[%c0_9, %c0_10] : memref<288x256xf32, #tpu.memory_space<vmem>>, vector<16x256xf32>
    tpu.vector_store %arg7[%c0_9, %c0_10], %11 {strides = array<i32>} : memref<288x256xf32, #tpu.memory_space<vmem>>, vector<16x256xf32>,
    %13 = vector.extract_strided_slice %6 {offsets = [0, 1], sizes = [16, 256], strides = [1, 1]} : vector<16x290xf32> to vector<16x256xf32>
    %c16 = arith.constant 16 : index
    %c0_11 = arith.constant 0 : index
    %14 = vector.load %arg7[%c16, %c0_11] : memref<288x256xf32, #tpu.memory_space<vmem>>, vector<16x256xf32>
    tpu.vector_store %arg7[%c16, %c0_11], %13 {strides = array<i32>} : memref<288x256xf32, #tpu.memory_space<vmem>>, vector<16x256xf32>,
    %15 = vector.extract_strided_slice %6 {offsets = [0, 2], sizes = [16, 256], strides = [1, 1]} : vector<16x290xf32> to vector<16x256xf32>
    %16 = vector.broadcast %8 : vector<1x256xf32> to vector<16x256xf32>
    %17 = arith.mulf %15, %16 : vector<16x256xf32>
    %c32 = arith.constant 32 : index
    %c0_12 = arith.constant 0 : index
    %18 = vector.load %arg7[%c32, %c0_12] : memref<288x256xf32, #tpu.memory_space<vmem>>, vector<16x256xf32>
    tpu.vector_store %arg7[%c32, %c0_12], %17 {strides = array<i32>} : memref<288x256xf32, #tpu.memory_space<vmem>>, vector<16x256xf32>,
    %19 = vector.extract_strided_slice %6 {offsets = [0, 16], sizes = [16, 256], strides = [1, 1]} : vector<16x290xf32> to vector<16x256xf32>
    %20 = vector.broadcast %7 : vector<1x256xf32> to vector<16x256xf32>
    %21 = arith.mulf %19, %20 : vector<16x256xf32>
    %c48 = arith.constant 48 : index
    %c0_13 = arith.constant 0 : index
    %22 = vector.load %arg7[%c48, %c0_13] : memref<288x256xf32, #tpu.memory_space<vmem>>, vector<16x256xf32>
    tpu.vector_store %arg7[%c48, %c0_13], %21 {strides = array<i32>} : memref<288x256xf32, #tpu.memory_space<vmem>>, vector<16x256xf32>,
    %23 = vector.extract_strided_slice %6 {offsets = [0, 17], sizes = [16, 256], strides = [1, 1]} : vector<16x290xf32> to vector<16x256xf32>
    %c64 = arith.constant 64 : index
    %c0_14 = arith.constant 0 : index
    %24 = vector.load %arg7[%c64, %c0_14] : memref<288x256xf32, #tpu.memory_space<vmem>>, vector<16x256xf32>
    tpu.vector_store %arg7[%c64, %c0_14], %23 {strides = array<i32>} : memref<288x256xf32, #tpu.memory_space<vmem>>, vector<16x256xf32>,
    %25 = vector.extract_strided_slice %6 {offsets = [0, 18], sizes = [16, 256], strides = [1, 1]} : vector<16x290xf32> to vector<16x256xf32>
    %26 = vector.broadcast %8 : vector<1x256xf32> to vector<16x256xf32>
    %27 = arith.mulf %25, %26 : vector<16x256xf32>
    %c80 = arith.constant 80 : index
    %c0_15 = arith.constant 0 : index
    %28 = vector.load %arg7[%c80, %c0_15] : memref<288x256xf32, #tpu.memory_space<vmem>>, vector<16x256xf32>
    tpu.vector_store %arg7[%c80, %c0_15], %27 {strides = array<i32>} : memref<288x256xf32, #tpu.memory_space<vmem>>, vector<16x256xf32>,
    %29 = vector.extract_strided_slice %6 {offsets = [0, 32], sizes = [16, 256], strides = [1, 1]} : vector<16x290xf32> to vector<16x256xf32>
    %30 = vector.broadcast %7 : vector<1x256xf32> to vector<16x256xf32>
    %31 = arith.mulf %29, %30 : vector<16x256xf32>
    %c96 = arith.constant 96 : index
    %c0_16 = arith.constant 0 : index
    %32 = vector.load %arg7[%c96, %c0_16] : memref<288x256xf32, #tpu.memory_space<vmem>>, vector<16x256xf32>
    tpu.vector_store %arg7[%c96, %c0_16], %31 {strides = array<i32>} : memref<288x256xf32, #tpu.memory_space<vmem>>, vector<16x256xf32>,
    %33 = vector.extract_strided_slice %6 {offsets = [0, 33], sizes = [16, 256], strides = [1, 1]} : vector<16x290xf32> to vector<16x256xf32>
    %c112 = arith.constant 112 : index
    %c0_17 = arith.constant 0 : index
    %34 = vector.load %arg7[%c112, %c0_17] : memref<288x256xf32, #tpu.memory_space<vmem>>, vector<16x256xf32>
    tpu.vector_store %arg7[%c112, %c0_17], %33 {strides = array<i32>} : memref<288x256xf32, #tpu.memory_space<vmem>>, vector<16x256xf32>,
    %35 = vector.extract_strided_slice %6 {offsets = [0, 34], sizes = [16, 256], strides = [1, 1]} : vector<16x290xf32> to vector<16x256xf32>
    %36 = vector.broadcast %8 : vector<1x256xf32> to vector<16x256xf32>
    %37 = arith.mulf %35, %36 : vector<16x256xf32>
    %c128 = arith.constant 128 : index
    %c0_18 = arith.constant 0 : index
    %38 = vector.load %arg7[%c128, %c0_18] : memref<288x256xf32, #tpu.memory_space<vmem>>, vector<16x256xf32>
    tpu.vector_store %arg7[%c128, %c0_18], %37 {strides = array<i32>} : memref<288x256xf32, #tpu.memory_space<vmem>>, vector<16x256xf32>,
    %39 = vector.extract_strided_slice %1 {offsets = [0, 0], sizes = [16, 256], strides = [1, 1]} : vector<16x290xf32> to vector<16x256xf32>
    %40 = vector.broadcast %7 : vector<1x256xf32> to vector<16x256xf32>
    %41 = arith.mulf %39, %40 : vector<16x256xf32>
    %c144 = arith.constant 144 : index
    %c0_19 = arith.constant 0 : index
    %42 = vector.load %arg7[%c144, %c0_19] : memref<288x256xf32, #tpu.memory_space<vmem>>, vector<16x256xf32>
    tpu.vector_store %arg7[%c144, %c0_19], %41 {strides = array<i32>} : memref<288x256xf32, #tpu.memory_space<vmem>>, vector<16x256xf32>,
    %43 = vector.extract_strided_slice %1 {offsets = [0, 1], sizes = [16, 256], strides = [1, 1]} : vector<16x290xf32> to vector<16x256xf32>
    %c160 = arith.constant 160 : index
    %c0_20 = arith.constant 0 : index
    %44 = vector.load %arg7[%c160, %c0_20] : memref<288x256xf32, #tpu.memory_space<vmem>>, vector<16x256xf32>
    tpu.vector_store %arg7[%c160, %c0_20], %43 {strides = array<i32>} : memref<288x256xf32, #tpu.memory_space<vmem>>, vector<16x256xf32>,
    %45 = vector.extract_strided_slice %1 {offsets = [0, 2], sizes = [16, 256], strides = [1, 1]} : vector<16x290xf32> to vector<16x256xf32>
    %46 = vector.broadcast %8 : vector<1x256xf32> to vector<16x256xf32>
    %47 = arith.mulf %45, %46 : vector<16x256xf32>
    %c176 = arith.constant 176 : index
    %c0_21 = arith.constant 0 : index
    %48 = vector.load %arg7[%c176, %c0_21] : memref<288x256xf32, #tpu.memory_space<vmem>>, vector<16x256xf32>
    tpu.vector_store %arg7[%c176, %c0_21], %47 {strides = array<i32>} : memref<288x256xf32, #tpu.memory_space<vmem>>, vector<16x256xf32>,
    %49 = vector.extract_strided_slice %1 {offsets = [0, 16], sizes = [16, 256], strides = [1, 1]} : vector<16x290xf32> to vector<16x256xf32>
    %50 = vector.broadcast %7 : vector<1x256xf32> to vector<16x256xf32>
    %51 = arith.mulf %49, %50 : vector<16x256xf32>
    %c192 = arith.constant 192 : index
    %c0_22 = arith.constant 0 : index
    %52 = vector.load %arg7[%c192, %c0_22] : memref<288x256xf32, #tpu.memory_space<vmem>>, vector<16x256xf32>
    tpu.vector_store %arg7[%c192, %c0_22], %51 {strides = array<i32>} : memref<288x256xf32, #tpu.memory_space<vmem>>, vector<16x256xf32>,
    %53 = vector.extract_strided_slice %1 {offsets = [0, 17], sizes = [16, 256], strides = [1, 1]} : vector<16x290xf32> to vector<16x256xf32>
    %c208 = arith.constant 208 : index
    %c0_23 = arith.constant 0 : index
    %54 = vector.load %arg7[%c208, %c0_23] : memref<288x256xf32, #tpu.memory_space<vmem>>, vector<16x256xf32>
    tpu.vector_store %arg7[%c208, %c0_23], %53 {strides = array<i32>} : memref<288x256xf32, #tpu.memory_space<vmem>>, vector<16x256xf32>,
    %55 = vector.extract_strided_slice %1 {offsets = [0, 18], sizes = [16, 256], strides = [1, 1]} : vector<16x290xf32> to vector<16x256xf32>
    %56 = vector.broadcast %8 : vector<1x256xf32> to vector<16x256xf32>
    %57 = arith.mulf %55, %56 : vector<16x256xf32>
    %c224 = arith.constant 224 : index
    %c0_24 = arith.constant 0 : index
    %58 = vector.load %arg7[%c224, %c0_24] : memref<288x256xf32, #tpu.memory_space<vmem>>, vector<16x256xf32>
    tpu.vector_store %arg7[%c224, %c0_24], %57 {strides = array<i32>} : memref<288x256xf32, #tpu.memory_space<vmem>>, vector<16x256xf32>,
    %59 = vector.extract_strided_slice %1 {offsets = [0, 32], sizes = [16, 256], strides = [1, 1]} : vector<16x290xf32> to vector<16x256xf32>
    %60 = vector.broadcast %7 : vector<1x256xf32> to vector<16x256xf32>
    %61 = arith.mulf %59, %60 : vector<16x256xf32>
    %c240 = arith.constant 240 : index
    %c0_25 = arith.constant 0 : index
    %62 = vector.load %arg7[%c240, %c0_25] : memref<288x256xf32, #tpu.memory_space<vmem>>, vector<16x256xf32>
    tpu.vector_store %arg7[%c240, %c0_25], %61 {strides = array<i32>} : memref<288x256xf32, #tpu.memory_space<vmem>>, vector<16x256xf32>,
    %63 = vector.extract_strided_slice %1 {offsets = [0, 33], sizes = [16, 256], strides = [1, 1]} : vector<16x290xf32> to vector<16x256xf32>
    %c256 = arith.constant 256 : index
    %c0_26 = arith.constant 0 : index
    %64 = vector.load %arg7[%c256, %c0_26] : memref<288x256xf32, #tpu.memory_space<vmem>>, vector<16x256xf32>
    tpu.vector_store %arg7[%c256, %c0_26], %63 {strides = array<i32>} : memref<288x256xf32, #tpu.memory_space<vmem>>, vector<16x256xf32>,
    %65 = vector.extract_strided_slice %1 {offsets = [0, 34], sizes = [16, 256], strides = [1, 1]} : vector<16x290xf32> to vector<16x256xf32>
    %66 = vector.broadcast %8 : vector<1x256xf32> to vector<16x256xf32>
    %67 = arith.mulf %65, %66 : vector<16x256xf32>
    %c272 = arith.constant 272 : index
    %c0_27 = arith.constant 0 : index
    %68 = vector.load %arg7[%c272, %c0_27] : memref<288x256xf32, #tpu.memory_space<vmem>>, vector<16x256xf32>
    tpu.vector_store %arg7[%c272, %c0_27], %67 {strides = array<i32>} : memref<288x256xf32, #tpu.memory_space<vmem>>, vector<16x256xf32>,
    %c0_28 = arith.constant 0 : index
    %c0_29 = arith.constant 0 : index
    %69 = vector.load %arg3[%c0_28, %c0_29] : memref<5x288xf32, #tpu.memory_space<vmem>>, vector<5x288xf32>
    %c0_30 = arith.constant 0 : index
    %c0_31 = arith.constant 0 : index
    %70 = vector.load %arg7[%c0_30, %c0_31] : memref<288x256xf32, #tpu.memory_space<vmem>>, vector<288x256xf32>
    %cst_32 = arith.constant dense<0.000000e+00> : vector<5x256xf32>
    %71 = tpu.matmul %69, %70, %cst_32 {dimension_numbers = #tpu.dot_dimension_numbers<[1], [0], [0], [1], [0, 0, 1, 1], [], []>} : vector<5x288xf32>, vector<288x256xf32>, vector<5x256xf32> -> vector<5x256xf32>
    %72 = vector.extract_strided_slice %71 {offsets = [4, 0], sizes = [1, 256], strides = [1, 1]} : vector<5x256xf32> to vector<1x256xf32>
    %73 = arith.negf %72 : vector<1x256xf32>
    %74 = math.exp %73 : vector<1x256xf32>
    %cst_33 = arith.constant 1.000000e+00 : f32
    %75 = vector.broadcast %cst_33 : f32 to vector<1x256xf32>
    %76 = arith.addf %75, %74 : vector<1x256xf32>
    %77 = arith.divf %75, %76 : vector<1x256xf32>
    %78 = vector.extract_strided_slice %1 {offsets = [0, 17], sizes = [16, 256], strides = [1, 1]} : vector<16x290xf32> to vector<16x256xf32>
    %79 = vector.extract_strided_slice %4 {offsets = [0, 0], sizes = [1, 256], strides = [1, 1]} : vector<8x256xf32> to vector<1x256xf32>
    %80 = vector.extract_strided_slice %71 {offsets = [0, 0], sizes = [1, 256], strides = [1, 1]} : vector<5x256xf32> to vector<1x256xf32>
    %cst_34 = arith.constant 2.187500e-01 : f32
    %81 = vector.broadcast %cst_34 : f32 to vector<1x256xf32>
    %82 = arith.mulf %80, %81 : vector<1x256xf32>
    %83 = arith.addf %79, %82 : vector<1x256xf32>
    %84 = vector.extract_strided_slice %4 {offsets = [1, 0], sizes = [1, 256], strides = [1, 1]} : vector<8x256xf32> to vector<1x256xf32>
    %85 = vector.extract_strided_slice %71 {offsets = [1, 0], sizes = [1, 256], strides = [1, 1]} : vector<5x256xf32> to vector<1x256xf32>
    %cst_35 = arith.constant 2.187500e-01 : f32
    %86 = vector.broadcast %cst_35 : f32 to vector<1x256xf32>
    %87 = arith.mulf %85, %86 : vector<1x256xf32>
    %88 = arith.addf %84, %87 : vector<1x256xf32>
    %89 = vector.extract_strided_slice %4 {offsets = [2, 0], sizes = [1, 256], strides = [1, 1]} : vector<8x256xf32> to vector<1x256xf32>
    %90 = vector.extract_strided_slice %71 {offsets = [2, 0], sizes = [1, 256], strides = [1, 1]} : vector<5x256xf32> to vector<1x256xf32>
    %cst_36 = arith.constant 4.687500e-01 : f32
    %91 = vector.broadcast %cst_36 : f32 to vector<1x256xf32>
    %92 = arith.mulf %90, %91 : vector<1x256xf32>
    %93 = arith.addf %89, %92 : vector<1x256xf32>
    %94 = vector.extract_strided_slice %4 {offsets = [3, 0], sizes = [1, 256], strides = [1, 1]} : vector<8x256xf32> to vector<1x256xf32>
    %95 = vector.extract_strided_slice %71 {offsets = [3, 0], sizes = [1, 256], strides = [1, 1]} : vector<5x256xf32> to vector<1x256xf32>
    %cst_37 = arith.constant 4.687500e-01 : f32
    %96 = vector.broadcast %cst_37 : f32 to vector<1x256xf32>
    %97 = arith.mulf %95, %96 : vector<1x256xf32>
    %98 = arith.addf %94, %97 : vector<1x256xf32>
    %cst_38 = arith.constant 0.000000e+00 : f32
    %99 = vector.broadcast %cst_38 : f32 to vector<16x256xf32>
    %c0_39 = arith.constant 0 : index
    %c0_40 = arith.constant 0 : index
    %100 = vector.load %arg8[%c0_39, %c0_40] : memref<16x256xf32, #tpu.memory_space<vmem>>, vector<16x256xf32>
    tpu.vector_store %arg8[%c0_39, %c0_40], %99 {strides = array<i32>} : memref<16x256xf32, #tpu.memory_space<vmem>>, vector<16x256xf32>,
    %c0_41 = arith.constant 0 : index
    %c0_42 = arith.constant 0 : index
    %101 = vector.load %arg8[%c0_41, %c0_42] : memref<16x256xf32, #tpu.memory_space<vmem>>, vector<16x64xf32>
    tpu.vector_store %arg8[%c0_41, %c0_42], %3 {strides = array<i32>} : memref<16x256xf32, #tpu.memory_space<vmem>>, vector<16x64xf32>,
    %c0_43 = arith.constant 0 : index
    %c0_44 = arith.constant 0 : index
    %102 = vector.load %arg8[%c0_43, %c0_44] : memref<16x256xf32, #tpu.memory_space<vmem>>, vector<16x256xf32>
    %103 = math.floor %83 : vector<1x256xf32>
    %104 = math.floor %88 : vector<1x256xf32>
    %105 = arith.fptosi %103 : vector<1x256xf32> to vector<1x256xi32>
    %106 = arith.fptosi %104 : vector<1x256xf32> to vector<1x256xi32>
    %107 = arith.subf %83, %103 : vector<1x256xf32>
    %108 = arith.subf %88, %104 : vector<1x256xf32>
    %cst_45 = arith.constant 0.000000e+00 : f32
    %109 = vector.broadcast %cst_45 : f32 to vector<16x256xf32>
    %c0_i32 = arith.constant 0 : i32
    %110 = vector.broadcast %c0_i32 : i32 to vector<1x256xi32>
    %111 = arith.addi %105, %110 : vector<1x256xi32>
    %c0_i32_46 = arith.constant 0 : i32
    %112 = vector.broadcast %c0_i32_46 : i32 to vector<1x256xi32>
    %113 = arith.addi %106, %112 : vector<1x256xi32>
    %c0_i32_47 = arith.constant 0 : i32
    %114 = vector.broadcast %c0_i32_47 : i32 to vector<1x256xi32>
    %115 = arith.cmpi sge, %111, %114 : vector<1x256xi32>
    %c8_i32 = arith.constant 8 : i32
    %116 = vector.broadcast %c8_i32 : i32 to vector<1x256xi32>
    %117 = arith.cmpi slt, %111, %116 : vector<1x256xi32>
    %118 = arith.andi %115, %117 : vector<1x256xi1>
    %c0_i32_48 = arith.constant 0 : i32
    %119 = vector.broadcast %c0_i32_48 : i32 to vector<1x256xi32>
    %120 = arith.cmpi sge, %113, %119 : vector<1x256xi32>
    %121 = arith.andi %118, %120 : vector<1x256xi1>
    %c8_i32_49 = arith.constant 8 : i32
    %122 = vector.broadcast %c8_i32_49 : i32 to vector<1x256xi32>
    %123 = arith.cmpi slt, %113, %122 : vector<1x256xi32>
    %124 = arith.andi %121, %123 : vector<1x256xi1>
    %cst_50 = arith.constant 1.000000e+00 : f32
    %125 = vector.broadcast %cst_50 : f32 to vector<1x256xf32>
    %126 = arith.subf %125, %107 : vector<1x256xf32>
    %cst_51 = arith.constant 1.000000e+00 : f32
    %127 = vector.broadcast %cst_51 : f32 to vector<1x256xf32>
    %128 = arith.subf %127, %108 : vector<1x256xf32>
    %129 = arith.mulf %126, %128 : vector<1x256xf32>
    %cst_52 = arith.constant 0.000000e+00 : f32
    %130 = vector.broadcast %cst_52 : f32 to vector<1x256xf32>
    %131 = arith.select %124, %129, %130 : vector<1x256xi1>, vector<1x256xf32>
    %c0_i32_53 = arith.constant 0 : i32
    %c7_i32 = arith.constant 7 : i32
    %132 = vector.broadcast %c0_i32_53 : i32 to vector<1x256xi32>
    %133 = arith.maxsi %132, %113 : vector<1x256xi32>
    %134 = vector.broadcast %c7_i32 : i32 to vector<1x256xi32>
    %135 = arith.minsi %134, %133 : vector<1x256xi32>
    %c8_i32_54 = arith.constant 8 : i32
    %136 = vector.broadcast %c8_i32_54 : i32 to vector<1x256xi32>
    %137 = arith.muli %135, %136 : vector<1x256xi32>
    %c0_i32_55 = arith.constant 0 : i32
    %c7_i32_56 = arith.constant 7 : i32
    %138 = vector.broadcast %c0_i32_55 : i32 to vector<1x256xi32>
    %139 = arith.maxsi %138, %111 : vector<1x256xi32>
    %140 = vector.broadcast %c7_i32_56 : i32 to vector<1x256xi32>
    %141 = arith.minsi %140, %139 : vector<1x256xi32>
    %142 = arith.addi %137, %141 : vector<1x256xi32>
    %143 = vector.shape_cast %142 : vector<1x256xi32> to vector<1x256xi32>
    %144 = vector.broadcast %143 : vector<1x256xi32> to vector<16x256xi32>
    %c0_i32_57 = arith.constant 0 : i32
    %145 = vector.broadcast %c0_i32_57 : i32 to vector<16x256xi32>
    %146 = arith.cmpi slt, %144, %145 : vector<16x256xi32>
    %c256_i32 = arith.constant 256 : i32
    %147 = vector.broadcast %c256_i32 : i32 to vector<16x256xi32>
    %148 = arith.addi %144, %147 : vector<16x256xi32>
    %149 = arith.select %146, %148, %144 : vector<16x256xi1>, vector<16x256xi32>
    %150 = vector.shape_cast %149 : vector<16x256xi32> to vector<16x256x1xi32>
    %151 = vector.shape_cast %150 : vector<16x256x1xi32> to vector<16x256xi32>
    %152 = tpu.dynamic_gather %102[%151] in [1] : vector<16x256xf32>, vector<16x256xi32> -> vector<16x256xf32>
    %153 = vector.broadcast %131 : vector<1x256xf32> to vector<16x256xf32>
    %154 = arith.mulf %152, %153 : vector<16x256xf32>
    %155 = arith.addf %109, %154 : vector<16x256xf32>
    %c1_i32 = arith.constant 1 : i32
    %156 = vector.broadcast %c1_i32 : i32 to vector<1x256xi32>
    %157 = arith.addi %105, %156 : vector<1x256xi32>
    %c0_i32_58 = arith.constant 0 : i32
    %158 = vector.broadcast %c0_i32_58 : i32 to vector<1x256xi32>
    %159 = arith.addi %106, %158 : vector<1x256xi32>
    %c0_i32_59 = arith.constant 0 : i32
    %160 = vector.broadcast %c0_i32_59 : i32 to vector<1x256xi32>
    %161 = arith.cmpi sge, %157, %160 : vector<1x256xi32>
    %c8_i32_60 = arith.constant 8 : i32
    %162 = vector.broadcast %c8_i32_60 : i32 to vector<1x256xi32>
    %163 = arith.cmpi slt, %157, %162 : vector<1x256xi32>
    %164 = arith.andi %161, %163 : vector<1x256xi1>
    %c0_i32_61 = arith.constant 0 : i32
    %165 = vector.broadcast %c0_i32_61 : i32 to vector<1x256xi32>
    %166 = arith.cmpi sge, %159, %165 : vector<1x256xi32>
    %167 = arith.andi %164, %166 : vector<1x256xi1>
    %c8_i32_62 = arith.constant 8 : i32
    %168 = vector.broadcast %c8_i32_62 : i32 to vector<1x256xi32>
    %169 = arith.cmpi slt, %159, %168 : vector<1x256xi32>
    %170 = arith.andi %167, %169 : vector<1x256xi1>
    %cst_63 = arith.constant 1.000000e+00 : f32
    %171 = vector.broadcast %cst_63 : f32 to vector<1x256xf32>
    %172 = arith.subf %171, %108 : vector<1x256xf32>
    %173 = arith.mulf %107, %172 : vector<1x256xf32>
    %cst_64 = arith.constant 0.000000e+00 : f32
    %174 = vector.broadcast %cst_64 : f32 to vector<1x256xf32>
    %175 = arith.select %170, %173, %174 : vector<1x256xi1>, vector<1x256xf32>
    %c0_i32_65 = arith.constant 0 : i32
    %c7_i32_66 = arith.constant 7 : i32
    %176 = vector.broadcast %c0_i32_65 : i32 to vector<1x256xi32>
    %177 = arith.maxsi %176, %159 : vector<1x256xi32>
    %178 = vector.broadcast %c7_i32_66 : i32 to vector<1x256xi32>
    %179 = arith.minsi %178, %177 : vector<1x256xi32>
    %c8_i32_67 = arith.constant 8 : i32
    %180 = vector.broadcast %c8_i32_67 : i32 to vector<1x256xi32>
    %181 = arith.muli %179, %180 : vector<1x256xi32>
    %c0_i32_68 = arith.constant 0 : i32
    %c7_i32_69 = arith.constant 7 : i32
    %182 = vector.broadcast %c0_i32_68 : i32 to vector<1x256xi32>
    %183 = arith.maxsi %182, %157 : vector<1x256xi32>
    %184 = vector.broadcast %c7_i32_69 : i32 to vector<1x256xi32>
    %185 = arith.minsi %184, %183 : vector<1x256xi32>
    %186 = arith.addi %181, %185 : vector<1x256xi32>
    %187 = vector.shape_cast %186 : vector<1x256xi32> to vector<1x256xi32>
    %188 = vector.broadcast %187 : vector<1x256xi32> to vector<16x256xi32>
    %c0_i32_70 = arith.constant 0 : i32
    %189 = vector.broadcast %c0_i32_70 : i32 to vector<16x256xi32>
    %190 = arith.cmpi slt, %188, %189 : vector<16x256xi32>
    %c256_i32_71 = arith.constant 256 : i32
    %191 = vector.broadcast %c256_i32_71 : i32 to vector<16x256xi32>
    %192 = arith.addi %188, %191 : vector<16x256xi32>
    %193 = arith.select %190, %192, %188 : vector<16x256xi1>, vector<16x256xi32>
    %194 = vector.shape_cast %193 : vector<16x256xi32> to vector<16x256x1xi32>
    %195 = vector.shape_cast %194 : vector<16x256x1xi32> to vector<16x256xi32>
    %196 = tpu.dynamic_gather %102[%195] in [1] : vector<16x256xf32>, vector<16x256xi32> -> vector<16x256xf32>
    %197 = vector.broadcast %175 : vector<1x256xf32> to vector<16x256xf32>
    %198 = arith.mulf %196, %197 : vector<16x256xf32>
    %199 = arith.addf %155, %198 : vector<16x256xf32>
    %c0_i32_72 = arith.constant 0 : i32
    %200 = vector.broadcast %c0_i32_72 : i32 to vector<1x256xi32>
    %201 = arith.addi %105, %200 : vector<1x256xi32>
    %c1_i32_73 = arith.constant 1 : i32
    %202 = vector.broadcast %c1_i32_73 : i32 to vector<1x256xi32>
    %203 = arith.addi %106, %202 : vector<1x256xi32>
    %c0_i32_74 = arith.constant 0 : i32
    %204 = vector.broadcast %c0_i32_74 : i32 to vector<1x256xi32>
    %205 = arith.cmpi sge, %201, %204 : vector<1x256xi32>
    %c8_i32_75 = arith.constant 8 : i32
    %206 = vector.broadcast %c8_i32_75 : i32 to vector<1x256xi32>
    %207 = arith.cmpi slt, %201, %206 : vector<1x256xi32>
    %208 = arith.andi %205, %207 : vector<1x256xi1>
    %c0_i32_76 = arith.constant 0 : i32
    %209 = vector.broadcast %c0_i32_76 : i32 to vector<1x256xi32>
    %210 = arith.cmpi sge, %203, %209 : vector<1x256xi32>
    %211 = arith.andi %208, %210 : vector<1x256xi1>
    %c8_i32_77 = arith.constant 8 : i32
    %212 = vector.broadcast %c8_i32_77 : i32 to vector<1x256xi32>
    %213 = arith.cmpi slt, %203, %212 : vector<1x256xi32>
    %214 = arith.andi %211, %213 : vector<1x256xi1>
    %cst_78 = arith.constant 1.000000e+00 : f32
    %215 = vector.broadcast %cst_78 : f32 to vector<1x256xf32>
    %216 = arith.subf %215, %107 : vector<1x256xf32>
    %217 = arith.mulf %216, %108 : vector<1x256xf32>
    %cst_79 = arith.constant 0.000000e+00 : f32
    %218 = vector.broadcast %cst_79 : f32 to vector<1x256xf32>
    %219 = arith.select %214, %217, %218 : vector<1x256xi1>, vector<1x256xf32>
    %c0_i32_80 = arith.constant 0 : i32
    %c7_i32_81 = arith.constant 7 : i32
    %220 = vector.broadcast %c0_i32_80 : i32 to vector<1x256xi32>
    %221 = arith.maxsi %220, %203 : vector<1x256xi32>
    %222 = vector.broadcast %c7_i32_81 : i32 to vector<1x256xi32>
    %223 = arith.minsi %222, %221 : vector<1x256xi32>
    %c8_i32_82 = arith.constant 8 : i32
    %224 = vector.broadcast %c8_i32_82 : i32 to vector<1x256xi32>
    %225 = arith.muli %223, %224 : vector<1x256xi32>
    %c0_i32_83 = arith.constant 0 : i32
    %c7_i32_84 = arith.constant 7 : i32
    %226 = vector.broadcast %c0_i32_83 : i32 to vector<1x256xi32>
    %227 = arith.maxsi %226, %201 : vector<1x256xi32>
    %228 = vector.broadcast %c7_i32_84 : i32 to vector<1x256xi32>
    %229 = arith.minsi %228, %227 : vector<1x256xi32>
    %230 = arith.addi %225, %229 : vector<1x256xi32>
    %231 = vector.shape_cast %230 : vector<1x256xi32> to vector<1x256xi32>
    %232 = vector.broadcast %231 : vector<1x256xi32> to vector<16x256xi32>
    %c0_i32_85 = arith.constant 0 : i32
    %233 = vector.broadcast %c0_i32_85 : i32 to vector<16x256xi32>
    %234 = arith.cmpi slt, %232, %233 : vector<16x256xi32>
    %c256_i32_86 = arith.constant 256 : i32
    %235 = vector.broadcast %c256_i32_86 : i32 to vector<16x256xi32>
    %236 = arith.addi %232, %235 : vector<16x256xi32>
    %237 = arith.select %234, %236, %232 : vector<16x256xi1>, vector<16x256xi32>
    %238 = vector.shape_cast %237 : vector<16x256xi32> to vector<16x256x1xi32>
    %239 = vector.shape_cast %238 : vector<16x256x1xi32> to vector<16x256xi32>
    %240 = tpu.dynamic_gather %102[%239] in [1] : vector<16x256xf32>, vector<16x256xi32> -> vector<16x256xf32>
    %241 = vector.broadcast %219 : vector<1x256xf32> to vector<16x256xf32>
    %242 = arith.mulf %240, %241 : vector<16x256xf32>
    %243 = arith.addf %199, %242 : vector<16x256xf32>
    %c1_i32_87 = arith.constant 1 : i32
    %244 = vector.broadcast %c1_i32_87 : i32 to vector<1x256xi32>
    %245 = arith.addi %105, %244 : vector<1x256xi32>
    %c1_i32_88 = arith.constant 1 : i32
    %246 = vector.broadcast %c1_i32_88 : i32 to vector<1x256xi32>
    %247 = arith.addi %106, %246 : vector<1x256xi32>
    %c0_i32_89 = arith.constant 0 : i32
    %248 = vector.broadcast %c0_i32_89 : i32 to vector<1x256xi32>
    %249 = arith.cmpi sge, %245, %248 : vector<1x256xi32>
    %c8_i32_90 = arith.constant 8 : i32
    %250 = vector.broadcast %c8_i32_90 : i32 to vector<1x256xi32>
    %251 = arith.cmpi slt, %245, %250 : vector<1x256xi32>
    %252 = arith.andi %249, %251 : vector<1x256xi1>
    %c0_i32_91 = arith.constant 0 : i32
    %253 = vector.broadcast %c0_i32_91 : i32 to vector<1x256xi32>
    %254 = arith.cmpi sge, %247, %253 : vector<1x256xi32>
    %255 = arith.andi %252, %254 : vector<1x256xi1>
    %c8_i32_92 = arith.constant 8 : i32
    %256 = vector.broadcast %c8_i32_92 : i32 to vector<1x256xi32>
    %257 = arith.cmpi slt, %247, %256 : vector<1x256xi32>
    %258 = arith.andi %255, %257 : vector<1x256xi1>
    %259 = arith.mulf %107, %108 : vector<1x256xf32>
    %cst_93 = arith.constant 0.000000e+00 : f32
    %260 = vector.broadcast %cst_93 : f32 to vector<1x256xf32>
    %261 = arith.select %258, %259, %260 : vector<1x256xi1>, vector<1x256xf32>
    %c0_i32_94 = arith.constant 0 : i32
    %c7_i32_95 = arith.constant 7 : i32
    %262 = vector.broadcast %c0_i32_94 : i32 to vector<1x256xi32>
    %263 = arith.maxsi %262, %247 : vector<1x256xi32>
    %264 = vector.broadcast %c7_i32_95 : i32 to vector<1x256xi32>
    %265 = arith.minsi %264, %263 : vector<1x256xi32>
    %c8_i32_96 = arith.constant 8 : i32
    %266 = vector.broadcast %c8_i32_96 : i32 to vector<1x256xi32>
    %267 = arith.muli %265, %266 : vector<1x256xi32>
    %c0_i32_97 = arith.constant 0 : i32
    %c7_i32_98 = arith.constant 7 : i32
    %268 = vector.broadcast %c0_i32_97 : i32 to vector<1x256xi32>
    %269 = arith.maxsi %268, %245 : vector<1x256xi32>
    %270 = vector.broadcast %c7_i32_98 : i32 to vector<1x256xi32>
    %271 = arith.minsi %270, %269 : vector<1x256xi32>
    %272 = arith.addi %267, %271 : vector<1x256xi32>
    %273 = vector.shape_cast %272 : vector<1x256xi32> to vector<1x256xi32>
    %274 = vector.broadcast %273 : vector<1x256xi32> to vector<16x256xi32>
    %c0_i32_99 = arith.constant 0 : i32
    %275 = vector.broadcast %c0_i32_99 : i32 to vector<16x256xi32>
    %276 = arith.cmpi slt, %274, %275 : vector<16x256xi32>
    %c256_i32_100 = arith.constant 256 : i32
    %277 = vector.broadcast %c256_i32_100 : i32 to vector<16x256xi32>
    %278 = arith.addi %274, %277 : vector<16x256xi32>
    %279 = arith.select %276, %278, %274 : vector<16x256xi1>, vector<16x256xi32>
    %280 = vector.shape_cast %279 : vector<16x256xi32> to vector<16x256x1xi32>
    %281 = vector.shape_cast %280 : vector<16x256x1xi32> to vector<16x256xi32>
    %282 = tpu.dynamic_gather %102[%281] in [1] : vector<16x256xf32>, vector<16x256xi32> -> vector<16x256xf32>
    %283 = vector.broadcast %261 : vector<1x256xf32> to vector<16x256xf32>
    %284 = arith.mulf %282, %283 : vector<16x256xf32>
    %285 = arith.addf %243, %284 : vector<16x256xf32>
    %286 = math.floor %93 : vector<1x256xf32>
    %287 = math.floor %98 : vector<1x256xf32>
    %288 = arith.fptosi %286 : vector<1x256xf32> to vector<1x256xi32>
    %289 = arith.fptosi %287 : vector<1x256xf32> to vector<1x256xi32>
    %290 = arith.subf %93, %286 : vector<1x256xf32>
    %291 = arith.subf %98, %287 : vector<1x256xf32>
    %cst_101 = arith.constant 0.000000e+00 : f32
    %292 = vector.broadcast %cst_101 : f32 to vector<16x256xf32>
    %c0_i32_102 = arith.constant 0 : i32
    %293 = vector.broadcast %c0_i32_102 : i32 to vector<1x256xi32>
    %294 = arith.addi %288, %293 : vector<1x256xi32>
    %c0_i32_103 = arith.constant 0 : i32
    %295 = vector.broadcast %c0_i32_103 : i32 to vector<1x256xi32>
    %296 = arith.addi %289, %295 : vector<1x256xi32>
    %c0_i32_104 = arith.constant 0 : i32
    %297 = vector.broadcast %c0_i32_104 : i32 to vector<1x256xi32>
    %298 = arith.cmpi sge, %294, %297 : vector<1x256xi32>
    %c16_i32 = arith.constant 16 : i32
    %299 = vector.broadcast %c16_i32 : i32 to vector<1x256xi32>
    %300 = arith.cmpi slt, %294, %299 : vector<1x256xi32>
    %301 = arith.andi %298, %300 : vector<1x256xi1>
    %c0_i32_105 = arith.constant 0 : i32
    %302 = vector.broadcast %c0_i32_105 : i32 to vector<1x256xi32>
    %303 = arith.cmpi sge, %296, %302 : vector<1x256xi32>
    %304 = arith.andi %301, %303 : vector<1x256xi1>
    %c16_i32_106 = arith.constant 16 : i32
    %305 = vector.broadcast %c16_i32_106 : i32 to vector<1x256xi32>
    %306 = arith.cmpi slt, %296, %305 : vector<1x256xi32>
    %307 = arith.andi %304, %306 : vector<1x256xi1>
    %cst_107 = arith.constant 1.000000e+00 : f32
    %308 = vector.broadcast %cst_107 : f32 to vector<1x256xf32>
    %309 = arith.subf %308, %290 : vector<1x256xf32>
    %cst_108 = arith.constant 1.000000e+00 : f32
    %310 = vector.broadcast %cst_108 : f32 to vector<1x256xf32>
    %311 = arith.subf %310, %291 : vector<1x256xf32>
    %312 = arith.mulf %309, %311 : vector<1x256xf32>
    %cst_109 = arith.constant 0.000000e+00 : f32
    %313 = vector.broadcast %cst_109 : f32 to vector<1x256xf32>
    %314 = arith.select %307, %312, %313 : vector<1x256xi1>, vector<1x256xf32>
    %c0_i32_110 = arith.constant 0 : i32
    %c15_i32 = arith.constant 15 : i32
    %315 = vector.broadcast %c0_i32_110 : i32 to vector<1x256xi32>
    %316 = arith.maxsi %315, %296 : vector<1x256xi32>
    %317 = vector.broadcast %c15_i32 : i32 to vector<1x256xi32>
    %318 = arith.minsi %317, %316 : vector<1x256xi32>
    %c16_i32_111 = arith.constant 16 : i32
    %319 = vector.broadcast %c16_i32_111 : i32 to vector<1x256xi32>
    %320 = arith.muli %318, %319 : vector<1x256xi32>
    %c0_i32_112 = arith.constant 0 : i32
    %c15_i32_113 = arith.constant 15 : i32
    %321 = vector.broadcast %c0_i32_112 : i32 to vector<1x256xi32>
    %322 = arith.maxsi %321, %294 : vector<1x256xi32>
    %323 = vector.broadcast %c15_i32_113 : i32 to vector<1x256xi32>
    %324 = arith.minsi %323, %322 : vector<1x256xi32>
    %325 = arith.addi %320, %324 : vector<1x256xi32>
    %326 = vector.shape_cast %325 : vector<1x256xi32> to vector<1x256xi32>
    %327 = vector.broadcast %326 : vector<1x256xi32> to vector<16x256xi32>
    %c0_i32_114 = arith.constant 0 : i32
    %328 = vector.broadcast %c0_i32_114 : i32 to vector<16x256xi32>
    %329 = arith.cmpi slt, %327, %328 : vector<16x256xi32>
    %c256_i32_115 = arith.constant 256 : i32
    %330 = vector.broadcast %c256_i32_115 : i32 to vector<16x256xi32>
    %331 = arith.addi %327, %330 : vector<16x256xi32>
    %332 = arith.select %329, %331, %327 : vector<16x256xi1>, vector<16x256xi32>
    %333 = vector.shape_cast %332 : vector<16x256xi32> to vector<16x256x1xi32>
    %334 = vector.shape_cast %333 : vector<16x256x1xi32> to vector<16x256xi32>
    %335 = tpu.dynamic_gather %78[%334] in [1] : vector<16x256xf32>, vector<16x256xi32> -> vector<16x256xf32>
    %336 = vector.broadcast %314 : vector<1x256xf32> to vector<16x256xf32>
    %337 = arith.mulf %335, %336 : vector<16x256xf32>
    %338 = arith.addf %292, %337 : vector<16x256xf32>
    %c1_i32_116 = arith.constant 1 : i32
    %339 = vector.broadcast %c1_i32_116 : i32 to vector<1x256xi32>
    %340 = arith.addi %288, %339 : vector<1x256xi32>
    %c0_i32_117 = arith.constant 0 : i32
    %341 = vector.broadcast %c0_i32_117 : i32 to vector<1x256xi32>
    %342 = arith.addi %289, %341 : vector<1x256xi32>
    %c0_i32_118 = arith.constant 0 : i32
    %343 = vector.broadcast %c0_i32_118 : i32 to vector<1x256xi32>
    %344 = arith.cmpi sge, %340, %343 : vector<1x256xi32>
    %c16_i32_119 = arith.constant 16 : i32
    %345 = vector.broadcast %c16_i32_119 : i32 to vector<1x256xi32>
    %346 = arith.cmpi slt, %340, %345 : vector<1x256xi32>
    %347 = arith.andi %344, %346 : vector<1x256xi1>
    %c0_i32_120 = arith.constant 0 : i32
    %348 = vector.broadcast %c0_i32_120 : i32 to vector<1x256xi32>
    %349 = arith.cmpi sge, %342, %348 : vector<1x256xi32>
    %350 = arith.andi %347, %349 : vector<1x256xi1>
    %c16_i32_121 = arith.constant 16 : i32
    %351 = vector.broadcast %c16_i32_121 : i32 to vector<1x256xi32>
    %352 = arith.cmpi slt, %342, %351 : vector<1x256xi32>
    %353 = arith.andi %350, %352 : vector<1x256xi1>
    %cst_122 = arith.constant 1.000000e+00 : f32
    %354 = vector.broadcast %cst_122 : f32 to vector<1x256xf32>
    %355 = arith.subf %354, %291 : vector<1x256xf32>
    %356 = arith.mulf %290, %355 : vector<1x256xf32>
    %cst_123 = arith.constant 0.000000e+00 : f32
    %357 = vector.broadcast %cst_123 : f32 to vector<1x256xf32>
    %358 = arith.select %353, %356, %357 : vector<1x256xi1>, vector<1x256xf32>
    %c0_i32_124 = arith.constant 0 : i32
    %c15_i32_125 = arith.constant 15 : i32
    %359 = vector.broadcast %c0_i32_124 : i32 to vector<1x256xi32>
    %360 = arith.maxsi %359, %342 : vector<1x256xi32>
    %361 = vector.broadcast %c15_i32_125 : i32 to vector<1x256xi32>
    %362 = arith.minsi %361, %360 : vector<1x256xi32>
    %c16_i32_126 = arith.constant 16 : i32
    %363 = vector.broadcast %c16_i32_126 : i32 to vector<1x256xi32>
    %364 = arith.muli %362, %363 : vector<1x256xi32>
    %c0_i32_127 = arith.constant 0 : i32
    %c15_i32_128 = arith.constant 15 : i32
    %365 = vector.broadcast %c0_i32_127 : i32 to vector<1x256xi32>
    %366 = arith.maxsi %365, %340 : vector<1x256xi32>
    %367 = vector.broadcast %c15_i32_128 : i32 to vector<1x256xi32>
    %368 = arith.minsi %367, %366 : vector<1x256xi32>
    %369 = arith.addi %364, %368 : vector<1x256xi32>
    %370 = vector.shape_cast %369 : vector<1x256xi32> to vector<1x256xi32>
    %371 = vector.broadcast %370 : vector<1x256xi32> to vector<16x256xi32>
    %c0_i32_129 = arith.constant 0 : i32
    %372 = vector.broadcast %c0_i32_129 : i32 to vector<16x256xi32>
    %373 = arith.cmpi slt, %371, %372 : vector<16x256xi32>
    %c256_i32_130 = arith.constant 256 : i32
    %374 = vector.broadcast %c256_i32_130 : i32 to vector<16x256xi32>
    %375 = arith.addi %371, %374 : vector<16x256xi32>
    %376 = arith.select %373, %375, %371 : vector<16x256xi1>, vector<16x256xi32>
    %377 = vector.shape_cast %376 : vector<16x256xi32> to vector<16x256x1xi32>
    %378 = vector.shape_cast %377 : vector<16x256x1xi32> to vector<16x256xi32>
    %379 = tpu.dynamic_gather %78[%378] in [1] : vector<16x256xf32>, vector<16x256xi32> -> vector<16x256xf32>
    %380 = vector.broadcast %358 : vector<1x256xf32> to vector<16x256xf32>
    %381 = arith.mulf %379, %380 : vector<16x256xf32>
    %382 = arith.addf %338, %381 : vector<16x256xf32>
    %c0_i32_131 = arith.constant 0 : i32
    %383 = vector.broadcast %c0_i32_131 : i32 to vector<1x256xi32>
    %384 = arith.addi %288, %383 : vector<1x256xi32>
    %c1_i32_132 = arith.constant 1 : i32
    %385 = vector.broadcast %c1_i32_132 : i32 to vector<1x256xi32>
    %386 = arith.addi %289, %385 : vector<1x256xi32>
    %c0_i32_133 = arith.constant 0 : i32
    %387 = vector.broadcast %c0_i32_133 : i32 to vector<1x256xi32>
    %388 = arith.cmpi sge, %384, %387 : vector<1x256xi32>
    %c16_i32_134 = arith.constant 16 : i32
    %389 = vector.broadcast %c16_i32_134 : i32 to vector<1x256xi32>
    %390 = arith.cmpi slt, %384, %389 : vector<1x256xi32>
    %391 = arith.andi %388, %390 : vector<1x256xi1>
    %c0_i32_135 = arith.constant 0 : i32
    %392 = vector.broadcast %c0_i32_135 : i32 to vector<1x256xi32>
    %393 = arith.cmpi sge, %386, %392 : vector<1x256xi32>
    %394 = arith.andi %391, %393 : vector<1x256xi1>
    %c16_i32_136 = arith.constant 16 : i32
    %395 = vector.broadcast %c16_i32_136 : i32 to vector<1x256xi32>
    %396 = arith.cmpi slt, %386, %395 : vector<1x256xi32>
    %397 = arith.andi %394, %396 : vector<1x256xi1>
    %cst_137 = arith.constant 1.000000e+00 : f32
    %398 = vector.broadcast %cst_137 : f32 to vector<1x256xf32>
    %399 = arith.subf %398, %290 : vector<1x256xf32>
    %400 = arith.mulf %399, %291 : vector<1x256xf32>
    %cst_138 = arith.constant 0.000000e+00 : f32
    %401 = vector.broadcast %cst_138 : f32 to vector<1x256xf32>
    %402 = arith.select %397, %400, %401 : vector<1x256xi1>, vector<1x256xf32>
    %c0_i32_139 = arith.constant 0 : i32
    %c15_i32_140 = arith.constant 15 : i32
    %403 = vector.broadcast %c0_i32_139 : i32 to vector<1x256xi32>
    %404 = arith.maxsi %403, %386 : vector<1x256xi32>
    %405 = vector.broadcast %c15_i32_140 : i32 to vector<1x256xi32>
    %406 = arith.minsi %405, %404 : vector<1x256xi32>
    %c16_i32_141 = arith.constant 16 : i32
    %407 = vector.broadcast %c16_i32_141 : i32 to vector<1x256xi32>
    %408 = arith.muli %406, %407 : vector<1x256xi32>
    %c0_i32_142 = arith.constant 0 : i32
    %c15_i32_143 = arith.constant 15 : i32
    %409 = vector.broadcast %c0_i32_142 : i32 to vector<1x256xi32>
    %410 = arith.maxsi %409, %384 : vector<1x256xi32>
    %411 = vector.broadcast %c15_i32_143 : i32 to vector<1x256xi32>
    %412 = arith.minsi %411, %410 : vector<1x256xi32>
    %413 = arith.addi %408, %412 : vector<1x256xi32>
    %414 = vector.shape_cast %413 : vector<1x256xi32> to vector<1x256xi32>
    %415 = vector.broadcast %414 : vector<1x256xi32> to vector<16x256xi32>
    %c0_i32_144 = arith.constant 0 : i32
    %416 = vector.broadcast %c0_i32_144 : i32 to vector<16x256xi32>
    %417 = arith.cmpi slt, %415, %416 : vector<16x256xi32>
    %c256_i32_145 = arith.constant 256 : i32
    %418 = vector.broadcast %c256_i32_145 : i32 to vector<16x256xi32>
    %419 = arith.addi %415, %418 : vector<16x256xi32>
    %420 = arith.select %417, %419, %415 : vector<16x256xi1>, vector<16x256xi32>
    %421 = vector.shape_cast %420 : vector<16x256xi32> to vector<16x256x1xi32>
    %422 = vector.shape_cast %421 : vector<16x256x1xi32> to vector<16x256xi32>
    %423 = tpu.dynamic_gather %78[%422] in [1] : vector<16x256xf32>, vector<16x256xi32> -> vector<16x256xf32>
    %424 = vector.broadcast %402 : vector<1x256xf32> to vector<16x256xf32>
    %425 = arith.mulf %423, %424 : vector<16x256xf32>
    %426 = arith.addf %382, %425 : vector<16x256xf32>
    %c1_i32_146 = arith.constant 1 : i32
    %427 = vector.broadcast %c1_i32_146 : i32 to vector<1x256xi32>
    %428 = arith.addi %288, %427 : vector<1x256xi32>
    %c1_i32_147 = arith.constant 1 : i32
    %429 = vector.broadcast %c1_i32_147 : i32 to vector<1x256xi32>
    %430 = arith.addi %289, %429 : vector<1x256xi32>
    %c0_i32_148 = arith.constant 0 : i32
    %431 = vector.broadcast %c0_i32_148 : i32 to vector<1x256xi32>
    %432 = arith.cmpi sge, %428, %431 : vector<1x256xi32>
    %c16_i32_149 = arith.constant 16 : i32
    %433 = vector.broadcast %c16_i32_149 : i32 to vector<1x256xi32>
    %434 = arith.cmpi slt, %428, %433 : vector<1x256xi32>
    %435 = arith.andi %432, %434 : vector<1x256xi1>
    %c0_i32_150 = arith.constant 0 : i32
    %436 = vector.broadcast %c0_i32_150 : i32 to vector<1x256xi32>
    %437 = arith.cmpi sge, %430, %436 : vector<1x256xi32>
    %438 = arith.andi %435, %437 : vector<1x256xi1>
    %c16_i32_151 = arith.constant 16 : i32
    %439 = vector.broadcast %c16_i32_151 : i32 to vector<1x256xi32>
    %440 = arith.cmpi slt, %430, %439 : vector<1x256xi32>
    %441 = arith.andi %438, %440 : vector<1x256xi1>
    %442 = arith.mulf %290, %291 : vector<1x256xf32>
    %cst_152 = arith.constant 0.000000e+00 : f32
    %443 = vector.broadcast %cst_152 : f32 to vector<1x256xf32>
    %444 = arith.select %441, %442, %443 : vector<1x256xi1>, vector<1x256xf32>
    %c0_i32_153 = arith.constant 0 : i32
    %c15_i32_154 = arith.constant 15 : i32
    %445 = vector.broadcast %c0_i32_153 : i32 to vector<1x256xi32>
    %446 = arith.maxsi %445, %430 : vector<1x256xi32>
    %447 = vector.broadcast %c15_i32_154 : i32 to vector<1x256xi32>
    %448 = arith.minsi %447, %446 : vector<1x256xi32>
    %c16_i32_155 = arith.constant 16 : i32
    %449 = vector.broadcast %c16_i32_155 : i32 to vector<1x256xi32>
    %450 = arith.muli %448, %449 : vector<1x256xi32>
    %c0_i32_156 = arith.constant 0 : i32
    %c15_i32_157 = arith.constant 15 : i32
    %451 = vector.broadcast %c0_i32_156 : i32 to vector<1x256xi32>
    %452 = arith.maxsi %451, %428 : vector<1x256xi32>
    %453 = vector.broadcast %c15_i32_157 : i32 to vector<1x256xi32>
    %454 = arith.minsi %453, %452 : vector<1x256xi32>
    %455 = arith.addi %450, %454 : vector<1x256xi32>
    %456 = vector.shape_cast %455 : vector<1x256xi32> to vector<1x256xi32>
    %457 = vector.broadcast %456 : vector<1x256xi32> to vector<16x256xi32>
    %c0_i32_158 = arith.constant 0 : i32
    %458 = vector.broadcast %c0_i32_158 : i32 to vector<16x256xi32>
    %459 = arith.cmpi slt, %457, %458 : vector<16x256xi32>
    %c256_i32_159 = arith.constant 256 : i32
    %460 = vector.broadcast %c256_i32_159 : i32 to vector<16x256xi32>
    %461 = arith.addi %457, %460 : vector<16x256xi32>
    %462 = arith.select %459, %461, %457 : vector<16x256xi1>, vector<16x256xi32>
    %463 = vector.shape_cast %462 : vector<16x256xi32> to vector<16x256x1xi32>
    %464 = vector.shape_cast %463 : vector<16x256x1xi32> to vector<16x256xi32>
    %465 = tpu.dynamic_gather %78[%464] in [1] : vector<16x256xf32>, vector<16x256xi32> -> vector<16x256xf32>
    %466 = vector.broadcast %444 : vector<1x256xf32> to vector<16x256xf32>
    %467 = arith.mulf %465, %466 : vector<16x256xf32>
    %468 = arith.addf %426, %467 : vector<16x256xf32>
    %469 = vector.broadcast %77 : vector<1x256xf32> to vector<16x256xf32>
    %470 = arith.mulf %285, %469 : vector<16x256xf32>
    %cst_160 = arith.constant 1.000000e+00 : f32
    %471 = vector.broadcast %cst_160 : f32 to vector<1x256xf32>
    %472 = arith.subf %471, %77 : vector<1x256xf32>
    %473 = vector.broadcast %472 : vector<1x256xf32> to vector<16x256xf32>
    %474 = arith.mulf %468, %473 : vector<16x256xf32>
    %475 = arith.addf %470, %474 : vector<16x256xf32>
    %c0_161 = arith.constant 0 : index
    %c0_162 = arith.constant 0 : index
    %c0_163 = arith.constant 0 : index
    %476 = vector.load %arg6[%c0_161, %c0_162, %c0_163] : memref<1x16x256xf32, #tpu.memory_space<vmem>>, vector<1x16x256xf32>
    %477 = vector.shape_cast %476 : vector<1x16x256xf32> to vector<16x256xf32>
    %478 = vector.shape_cast %475 : vector<16x256xf32> to vector<1x16x256xf32>
    tpu.vector_store %arg6[%c0_161, %c0_162, %c0_163], %478 {strides = array<i32>} : memref<1x16x256xf32, #tpu.memory_space<vmem>>, vector<1x16x256xf32>,
    return
  }
  func.func @transform_0(%arg0: i32) -> (i32, i32, i32) {
    %c0_i32 = arith.constant 0 : i32
    %c0_i32_0 = arith.constant 0 : i32
    %c0_i32_1 = arith.constant 0 : i32
    return %arg0, %c0_i32, %c0_i32_0 : i32, i32, i32
  }
  func.func @transform_1(%arg0: i32) -> (i32, i32, i32) {
    %c0_i32 = arith.constant 0 : i32
    %c0_i32_0 = arith.constant 0 : i32
    %c0_i32_1 = arith.constant 0 : i32
    return %arg0, %c0_i32, %c0_i32_0 : i32, i32, i32
  }
  func.func @transform_2(%arg0: i32) -> (i32, i32) {
    %c0_i32 = arith.constant 0 : i32
    %c0_i32_0 = arith.constant 0 : i32
    %c0_i32_1 = arith.constant 0 : i32
    return %c0_i32, %c0_i32_0 : i32, i32
  }
  func.func @transform_3(%arg0: i32) -> (i32, i32) {
    %c0_i32 = arith.constant 0 : i32
    %c0_i32_0 = arith.constant 0 : i32
    %c0_i32_1 = arith.constant 0 : i32
    return %c0_i32, %c0_i32_0 : i32, i32
  }
  func.func @transform_4(%arg0: i32) -> (i32, i32) {
    %c0_i32 = arith.constant 0 : i32
    %c0_i32_0 = arith.constant 0 : i32
    %c0_i32_1 = arith.constant 0 : i32
    return %c0_i32, %c0_i32_0 : i32, i32
  }
  func.func @transform_5(%arg0: i32) -> (i32, i32, i32) {
    %c0_i32 = arith.constant 0 : i32
    %c0_i32_0 = arith.constant 0 : i32
    %c0_i32_1 = arith.constant 0 : i32
    return %arg0, %c0_i32, %c0_i32_0 : i32, i32, i32
  }
}

module attributes {stable_mosaic.version = 11 : i64} {
  func.func @kernel(%arg0: i32, %arg1: memref<1x16x290xf32, #tpu.memory_space<vmem>>, %arg2: memref<1x16x64xf32, #tpu.memory_space<vmem>>, %arg3: memref<5x288xf32, #tpu.memory_space<vmem>>, %arg4: memref<64x290xf32, #tpu.memory_space<vmem>>, %arg5: memref<8x256xf32, #tpu.memory_space<vmem>>, %arg6: memref<1x16x256xf32, #tpu.memory_space<vmem>>, %arg7: memref<288x256xf32, #tpu.memory_space<vmem>>, %arg8: memref<16x256xf32, #tpu.memory_space<vmem>>) attributes {dimension_semantics = [#tpu.dimension_semantics<parallel>], iteration_bounds = array<i64: 2>, scalar_prefetch = 0 : i64, scratch_operands = 2 : i64, tpu.core_type = #tpu.core_type<tc>, window_params = [{transform_indices = @transform_0, window_bounds = array<i64: 1, 16, 290>}, {transform_indices = @transform_1, window_bounds = array<i64: 1, 16, 64>}, {pipeline_mode = #tpu.pipeline_mode<synchronous>, transform_indices = @transform_2, window_bounds = array<i64: 5, 288>}, {pipeline_mode = #tpu.pipeline_mode<synchronous>, transform_indices = @transform_3, window_bounds = array<i64: 64, 290>}, {pipeline_mode = #tpu.pipeline_mode<synchronous>, transform_indices = @transform_4, window_bounds = array<i64: 8, 256>}, {transform_indices = @transform_5, window_bounds = array<i64: 1, 16, 256>}]} {
    %c0 = arith.constant 0 : index
    %c0_0 = arith.constant 0 : index
    %c0_1 = arith.constant 0 : index
    %0 = vector.load %arg1[%c0, %c0_0, %c0_1] : memref<1x16x290xf32, #tpu.memory_space<vmem>>, vector<1x16x290xf32>
    %1 = vector.shape_cast %0 : vector<1x16x290xf32> to vector<16x290xf32>
    %c0_2 = arith.constant 0 : index
    %c0_3 = arith.constant 0 : index
    %c0_4 = arith.constant 0 : index
    %2 = vector.load %arg2[%c0_2, %c0_3, %c0_4] : memref<1x16x64xf32, #tpu.memory_space<vmem>>, vector<1x16x64xf32>
    %3 = vector.shape_cast %2 : vector<1x16x64xf32> to vector<16x64xf32>
    %c0_5 = arith.constant 0 : index
    %c0_6 = arith.constant 0 : index
    %4 = vector.load %arg5[%c0_5, %c0_6] : memref<8x256xf32, #tpu.memory_space<vmem>>, vector<8x256xf32>
    %c0_7 = arith.constant 0 : index
    %c0_8 = arith.constant 0 : index
    %5 = vector.load %arg4[%c0_7, %c0_8] : memref<64x290xf32, #tpu.memory_space<vmem>>, vector<64x290xf32>
    %cst = arith.constant dense<0.000000e+00> : vector<16x290xf32>
    %6 = tpu.matmul %3, %5, %cst {dimension_numbers = #tpu.dot_dimension_numbers<[1], [0], [0], [1], [0, 0, 1, 1], [], []>} : vector<16x64xf32>, vector<64x290xf32>, vector<16x290xf32> -> vector<16x290xf32>
    %7 = vector.extract_strided_slice %4 {offsets = [4, 0], sizes = [1, 256], strides = [1, 1]} : vector<8x256xf32> to vector<1x256xf32>
    %8 = vector.extract_strided_slice %4 {offsets = [5, 0], sizes = [1, 256], strides = [1, 1]} : vector<8x256xf32> to vector<1x256xf32>
    %9 = vector.extract_strided_slice %6 {offsets = [0, 0], sizes = [16, 256], strides = [1, 1]} : vector<16x290xf32> to vector<16x256xf32>
    %10 = vector.broadcast %7 : vector<1x256xf32> to vector<16x256xf32>
    %11 = arith.mulf %9, %10 : vector<16x256xf32>
    %c0_9 = arith.constant 0 : index
    %c0_10 = arith.constant 0 : index
    %12 = vector.load %arg7[%c0_9, %c0_10] : memref<288x256xf32, #tpu.memory_space<vmem>>, vector<16x256xf32>
    tpu.vector_store %arg7[%c0_9, %c0_10], %11 {strides = array<i32>} : memref<288x256xf32, #tpu.memory_space<vmem>>, vector<16x256xf32>,
    %13 = vector.extract_strided_slice %6 {offsets = [0, 1], sizes = [16, 256], strides = [1, 1]} : vector<16x290xf32> to vector<16x256xf32>
    %c16 = arith.constant 16 : index
    %c0_11 = arith.constant 0 : index
    %14 = vector.load %arg7[%c16, %c0_11] : memref<288x256xf32, #tpu.memory_space<vmem>>, vector<16x256xf32>
    tpu.vector_store %arg7[%c16, %c0_11], %13 {strides = array<i32>} : memref<288x256xf32, #tpu.memory_space<vmem>>, vector<16x256xf32>,
    %15 = vector.extract_strided_slice %6 {offsets = [0, 2], sizes = [16, 256], strides = [1, 1]} : vector<16x290xf32> to vector<16x256xf32>
    %16 = vector.broadcast %8 : vector<1x256xf32> to vector<16x256xf32>
    %17 = arith.mulf %15, %16 : vector<16x256xf32>
    %c32 = arith.constant 32 : index
    %c0_12 = arith.constant 0 : index
    %18 = vector.load %arg7[%c32, %c0_12] : memref<288x256xf32, #tpu.memory_space<vmem>>, vector<16x256xf32>
    tpu.vector_store %arg7[%c32, %c0_12], %17 {strides = array<i32>} : memref<288x256xf32, #tpu.memory_space<vmem>>, vector<16x256xf32>,
    %19 = vector.extract_strided_slice %6 {offsets = [0, 16], sizes = [16, 256], strides = [1, 1]} : vector<16x290xf32> to vector<16x256xf32>
    %20 = vector.broadcast %7 : vector<1x256xf32> to vector<16x256xf32>
    %21 = arith.mulf %19, %20 : vector<16x256xf32>
    %c48 = arith.constant 48 : index
    %c0_13 = arith.constant 0 : index
    %22 = vector.load %arg7[%c48, %c0_13] : memref<288x256xf32, #tpu.memory_space<vmem>>, vector<16x256xf32>
    tpu.vector_store %arg7[%c48, %c0_13], %21 {strides = array<i32>} : memref<288x256xf32, #tpu.memory_space<vmem>>, vector<16x256xf32>,
    %23 = vector.extract_strided_slice %6 {offsets = [0, 17], sizes = [16, 256], strides = [1, 1]} : vector<16x290xf32> to vector<16x256xf32>
    %c64 = arith.constant 64 : index
    %c0_14 = arith.constant 0 : index
    %24 = vector.load %arg7[%c64, %c0_14] : memref<288x256xf32, #tpu.memory_space<vmem>>, vector<16x256xf32>
    tpu.vector_store %arg7[%c64, %c0_14], %23 {strides = array<i32>} : memref<288x256xf32, #tpu.memory_space<vmem>>, vector<16x256xf32>,
    %25 = vector.extract_strided_slice %6 {offsets = [0, 18], sizes = [16, 256], strides = [1, 1]} : vector<16x290xf32> to vector<16x256xf32>
    %26 = vector.broadcast %8 : vector<1x256xf32> to vector<16x256xf32>
    %27 = arith.mulf %25, %26 : vector<16x256xf32>
    %c80 = arith.constant 80 : index
    %c0_15 = arith.constant 0 : index
    %28 = vector.load %arg7[%c80, %c0_15] : memref<288x256xf32, #tpu.memory_space<vmem>>, vector<16x256xf32>
    tpu.vector_store %arg7[%c80, %c0_15], %27 {strides = array<i32>} : memref<288x256xf32, #tpu.memory_space<vmem>>, vector<16x256xf32>,
    %29 = vector.extract_strided_slice %6 {offsets = [0, 32], sizes = [16, 256], strides = [1, 1]} : vector<16x290xf32> to vector<16x256xf32>
    %30 = vector.broadcast %7 : vector<1x256xf32> to vector<16x256xf32>
    %31 = arith.mulf %29, %30 : vector<16x256xf32>
    %c96 = arith.constant 96 : index
    %c0_16 = arith.constant 0 : index
    %32 = vector.load %arg7[%c96, %c0_16] : memref<288x256xf32, #tpu.memory_space<vmem>>, vector<16x256xf32>
    tpu.vector_store %arg7[%c96, %c0_16], %31 {strides = array<i32>} : memref<288x256xf32, #tpu.memory_space<vmem>>, vector<16x256xf32>,
    %33 = vector.extract_strided_slice %6 {offsets = [0, 33], sizes = [16, 256], strides = [1, 1]} : vector<16x290xf32> to vector<16x256xf32>
    %c112 = arith.constant 112 : index
    %c0_17 = arith.constant 0 : index
    %34 = vector.load %arg7[%c112, %c0_17] : memref<288x256xf32, #tpu.memory_space<vmem>>, vector<16x256xf32>
    tpu.vector_store %arg7[%c112, %c0_17], %33 {strides = array<i32>} : memref<288x256xf32, #tpu.memory_space<vmem>>, vector<16x256xf32>,
    %35 = vector.extract_strided_slice %6 {offsets = [0, 34], sizes = [16, 256], strides = [1, 1]} : vector<16x290xf32> to vector<16x256xf32>
    %36 = vector.broadcast %8 : vector<1x256xf32> to vector<16x256xf32>
    %37 = arith.mulf %35, %36 : vector<16x256xf32>
    %c128 = arith.constant 128 : index
    %c0_18 = arith.constant 0 : index
    %38 = vector.load %arg7[%c128, %c0_18] : memref<288x256xf32, #tpu.memory_space<vmem>>, vector<16x256xf32>
    tpu.vector_store %arg7[%c128, %c0_18], %37 {strides = array<i32>} : memref<288x256xf32, #tpu.memory_space<vmem>>, vector<16x256xf32>,
    %39 = vector.extract_strided_slice %1 {offsets = [0, 0], sizes = [16, 256], strides = [1, 1]} : vector<16x290xf32> to vector<16x256xf32>
    %40 = vector.broadcast %7 : vector<1x256xf32> to vector<16x256xf32>
    %41 = arith.mulf %39, %40 : vector<16x256xf32>
    %c144 = arith.constant 144 : index
    %c0_19 = arith.constant 0 : index
    %42 = vector.load %arg7[%c144, %c0_19] : memref<288x256xf32, #tpu.memory_space<vmem>>, vector<16x256xf32>
    tpu.vector_store %arg7[%c144, %c0_19], %41 {strides = array<i32>} : memref<288x256xf32, #tpu.memory_space<vmem>>, vector<16x256xf32>,
    %43 = vector.extract_strided_slice %1 {offsets = [0, 1], sizes = [16, 256], strides = [1, 1]} : vector<16x290xf32> to vector<16x256xf32>
    %c160 = arith.constant 160 : index
    %c0_20 = arith.constant 0 : index
    %44 = vector.load %arg7[%c160, %c0_20] : memref<288x256xf32, #tpu.memory_space<vmem>>, vector<16x256xf32>
    tpu.vector_store %arg7[%c160, %c0_20], %43 {strides = array<i32>} : memref<288x256xf32, #tpu.memory_space<vmem>>, vector<16x256xf32>,
    %45 = vector.extract_strided_slice %1 {offsets = [0, 2], sizes = [16, 256], strides = [1, 1]} : vector<16x290xf32> to vector<16x256xf32>
    %46 = vector.broadcast %8 : vector<1x256xf32> to vector<16x256xf32>
    %47 = arith.mulf %45, %46 : vector<16x256xf32>
    %c176 = arith.constant 176 : index
    %c0_21 = arith.constant 0 : index
    %48 = vector.load %arg7[%c176, %c0_21] : memref<288x256xf32, #tpu.memory_space<vmem>>, vector<16x256xf32>
    tpu.vector_store %arg7[%c176, %c0_21], %47 {strides = array<i32>} : memref<288x256xf32, #tpu.memory_space<vmem>>, vector<16x256xf32>,
    %49 = vector.extract_strided_slice %1 {offsets = [0, 16], sizes = [16, 256], strides = [1, 1]} : vector<16x290xf32> to vector<16x256xf32>
    %50 = vector.broadcast %7 : vector<1x256xf32> to vector<16x256xf32>
    %51 = arith.mulf %49, %50 : vector<16x256xf32>
    %c192 = arith.constant 192 : index
    %c0_22 = arith.constant 0 : index
    %52 = vector.load %arg7[%c192, %c0_22] : memref<288x256xf32, #tpu.memory_space<vmem>>, vector<16x256xf32>
    tpu.vector_store %arg7[%c192, %c0_22], %51 {strides = array<i32>} : memref<288x256xf32, #tpu.memory_space<vmem>>, vector<16x256xf32>,
    %53 = vector.extract_strided_slice %1 {offsets = [0, 17], sizes = [16, 256], strides = [1, 1]} : vector<16x290xf32> to vector<16x256xf32>
    %c208 = arith.constant 208 : index
    %c0_23 = arith.constant 0 : index
    %54 = vector.load %arg7[%c208, %c0_23] : memref<288x256xf32, #tpu.memory_space<vmem>>, vector<16x256xf32>
    tpu.vector_store %arg7[%c208, %c0_23], %53 {strides = array<i32>} : memref<288x256xf32, #tpu.memory_space<vmem>>, vector<16x256xf32>,
    %55 = vector.extract_strided_slice %1 {offsets = [0, 18], sizes = [16, 256], strides = [1, 1]} : vector<16x290xf32> to vector<16x256xf32>
    %56 = vector.broadcast %8 : vector<1x256xf32> to vector<16x256xf32>
    %57 = arith.mulf %55, %56 : vector<16x256xf32>
    %c224 = arith.constant 224 : index
    %c0_24 = arith.constant 0 : index
    %58 = vector.load %arg7[%c224, %c0_24] : memref<288x256xf32, #tpu.memory_space<vmem>>, vector<16x256xf32>
    tpu.vector_store %arg7[%c224, %c0_24], %57 {strides = array<i32>} : memref<288x256xf32, #tpu.memory_space<vmem>>, vector<16x256xf32>,
    %59 = vector.extract_strided_slice %1 {offsets = [0, 32], sizes = [16, 256], strides = [1, 1]} : vector<16x290xf32> to vector<16x256xf32>
    %60 = vector.broadcast %7 : vector<1x256xf32> to vector<16x256xf32>
    %61 = arith.mulf %59, %60 : vector<16x256xf32>
    %c240 = arith.constant 240 : index
    %c0_25 = arith.constant 0 : index
    %62 = vector.load %arg7[%c240, %c0_25] : memref<288x256xf32, #tpu.memory_space<vmem>>, vector<16x256xf32>
    tpu.vector_store %arg7[%c240, %c0_25], %61 {strides = array<i32>} : memref<288x256xf32, #tpu.memory_space<vmem>>, vector<16x256xf32>,
    %63 = vector.extract_strided_slice %1 {offsets = [0, 33], sizes = [16, 256], strides = [1, 1]} : vector<16x290xf32> to vector<16x256xf32>
    %c256 = arith.constant 256 : index
    %c0_26 = arith.constant 0 : index
    %64 = vector.load %arg7[%c256, %c0_26] : memref<288x256xf32, #tpu.memory_space<vmem>>, vector<16x256xf32>
    tpu.vector_store %arg7[%c256, %c0_26], %63 {strides = array<i32>} : memref<288x256xf32, #tpu.memory_space<vmem>>, vector<16x256xf32>,
    %65 = vector.extract_strided_slice %1 {offsets = [0, 34], sizes = [16, 256], strides = [1, 1]} : vector<16x290xf32> to vector<16x256xf32>
    %66 = vector.broadcast %8 : vector<1x256xf32> to vector<16x256xf32>
    %67 = arith.mulf %65, %66 : vector<16x256xf32>
    %c272 = arith.constant 272 : index
    %c0_27 = arith.constant 0 : index
    %68 = vector.load %arg7[%c272, %c0_27] : memref<288x256xf32, #tpu.memory_space<vmem>>, vector<16x256xf32>
    tpu.vector_store %arg7[%c272, %c0_27], %67 {strides = array<i32>} : memref<288x256xf32, #tpu.memory_space<vmem>>, vector<16x256xf32>,
    %c0_28 = arith.constant 0 : index
    %c0_29 = arith.constant 0 : index
    %69 = vector.load %arg3[%c0_28, %c0_29] : memref<5x288xf32, #tpu.memory_space<vmem>>, vector<5x288xf32>
    %c0_30 = arith.constant 0 : index
    %c0_31 = arith.constant 0 : index
    %70 = vector.load %arg7[%c0_30, %c0_31] : memref<288x256xf32, #tpu.memory_space<vmem>>, vector<288x256xf32>
    %cst_32 = arith.constant dense<0.000000e+00> : vector<5x256xf32>
    %71 = tpu.matmul %69, %70, %cst_32 {dimension_numbers = #tpu.dot_dimension_numbers<[1], [0], [0], [1], [0, 0, 1, 1], [], []>} : vector<5x288xf32>, vector<288x256xf32>, vector<5x256xf32> -> vector<5x256xf32>
    %72 = vector.extract_strided_slice %71 {offsets = [4, 0], sizes = [1, 256], strides = [1, 1]} : vector<5x256xf32> to vector<1x256xf32>
    %73 = arith.negf %72 : vector<1x256xf32>
    %74 = math.exp %73 : vector<1x256xf32>
    %cst_33 = arith.constant 1.000000e+00 : f32
    %75 = vector.broadcast %cst_33 : f32 to vector<1x256xf32>
    %76 = arith.addf %75, %74 : vector<1x256xf32>
    %77 = arith.divf %75, %76 : vector<1x256xf32>
    %78 = vector.extract_strided_slice %1 {offsets = [0, 17], sizes = [16, 256], strides = [1, 1]} : vector<16x290xf32> to vector<16x256xf32>
    %79 = vector.extract_strided_slice %4 {offsets = [0, 0], sizes = [1, 256], strides = [1, 1]} : vector<8x256xf32> to vector<1x256xf32>
    %80 = vector.extract_strided_slice %71 {offsets = [0, 0], sizes = [1, 256], strides = [1, 1]} : vector<5x256xf32> to vector<1x256xf32>
    %cst_34 = arith.constant 2.187500e-01 : f32
    %81 = vector.broadcast %cst_34 : f32 to vector<1x256xf32>
    %82 = arith.mulf %80, %81 : vector<1x256xf32>
    %83 = arith.addf %79, %82 : vector<1x256xf32>
    %84 = vector.extract_strided_slice %4 {offsets = [1, 0], sizes = [1, 256], strides = [1, 1]} : vector<8x256xf32> to vector<1x256xf32>
    %85 = vector.extract_strided_slice %71 {offsets = [1, 0], sizes = [1, 256], strides = [1, 1]} : vector<5x256xf32> to vector<1x256xf32>
    %cst_35 = arith.constant 2.187500e-01 : f32
    %86 = vector.broadcast %cst_35 : f32 to vector<1x256xf32>
    %87 = arith.mulf %85, %86 : vector<1x256xf32>
    %88 = arith.addf %84, %87 : vector<1x256xf32>
    %89 = vector.extract_strided_slice %4 {offsets = [2, 0], sizes = [1, 256], strides = [1, 1]} : vector<8x256xf32> to vector<1x256xf32>
    %90 = vector.extract_strided_slice %71 {offsets = [2, 0], sizes = [1, 256], strides = [1, 1]} : vector<5x256xf32> to vector<1x256xf32>
    %cst_36 = arith.constant 4.687500e-01 : f32
    %91 = vector.broadcast %cst_36 : f32 to vector<1x256xf32>
    %92 = arith.mulf %90, %91 : vector<1x256xf32>
    %93 = arith.addf %89, %92 : vector<1x256xf32>
    %94 = vector.extract_strided_slice %4 {offsets = [3, 0], sizes = [1, 256], strides = [1, 1]} : vector<8x256xf32> to vector<1x256xf32>
    %95 = vector.extract_strided_slice %71 {offsets = [3, 0], sizes = [1, 256], strides = [1, 1]} : vector<5x256xf32> to vector<1x256xf32>
    %cst_37 = arith.constant 4.687500e-01 : f32
    %96 = vector.broadcast %cst_37 : f32 to vector<1x256xf32>
    %97 = arith.mulf %95, %96 : vector<1x256xf32>
    %98 = arith.addf %94, %97 : vector<1x256xf32>
    %99 = math.floor %83 : vector<1x256xf32>
    %100 = math.floor %88 : vector<1x256xf32>
    %101 = arith.fptosi %99 : vector<1x256xf32> to vector<1x256xi32>
    %102 = arith.fptosi %100 : vector<1x256xf32> to vector<1x256xi32>
    %103 = arith.subf %83, %99 : vector<1x256xf32>
    %104 = arith.subf %88, %100 : vector<1x256xf32>
    %105 = tpu.iota {dimensions = array<i32: 0>} : vector<64x256xi32>
    %cst_38 = arith.constant 0.000000e+00 : f32
    %106 = vector.broadcast %cst_38 : f32 to vector<64x256xf32>
    %c0_i32 = arith.constant 0 : i32
    %107 = vector.broadcast %c0_i32 : i32 to vector<1x256xi32>
    %108 = arith.addi %101, %107 : vector<1x256xi32>
    %c0_i32_39 = arith.constant 0 : i32
    %109 = vector.broadcast %c0_i32_39 : i32 to vector<1x256xi32>
    %110 = arith.addi %102, %109 : vector<1x256xi32>
    %c0_i32_40 = arith.constant 0 : i32
    %111 = vector.broadcast %c0_i32_40 : i32 to vector<1x256xi32>
    %112 = arith.cmpi sge, %108, %111 : vector<1x256xi32>
    %c8_i32 = arith.constant 8 : i32
    %113 = vector.broadcast %c8_i32 : i32 to vector<1x256xi32>
    %114 = arith.cmpi slt, %108, %113 : vector<1x256xi32>
    %115 = arith.andi %112, %114 : vector<1x256xi1>
    %c0_i32_41 = arith.constant 0 : i32
    %116 = vector.broadcast %c0_i32_41 : i32 to vector<1x256xi32>
    %117 = arith.cmpi sge, %110, %116 : vector<1x256xi32>
    %118 = arith.andi %115, %117 : vector<1x256xi1>
    %c8_i32_42 = arith.constant 8 : i32
    %119 = vector.broadcast %c8_i32_42 : i32 to vector<1x256xi32>
    %120 = arith.cmpi slt, %110, %119 : vector<1x256xi32>
    %121 = arith.andi %118, %120 : vector<1x256xi1>
    %cst_43 = arith.constant 1.000000e+00 : f32
    %122 = vector.broadcast %cst_43 : f32 to vector<1x256xf32>
    %123 = arith.subf %122, %103 : vector<1x256xf32>
    %cst_44 = arith.constant 1.000000e+00 : f32
    %124 = vector.broadcast %cst_44 : f32 to vector<1x256xf32>
    %125 = arith.subf %124, %104 : vector<1x256xf32>
    %126 = arith.mulf %123, %125 : vector<1x256xf32>
    %cst_45 = arith.constant 0.000000e+00 : f32
    %127 = vector.broadcast %cst_45 : f32 to vector<1x256xf32>
    %128 = arith.select %121, %126, %127 : vector<1x256xi1>, vector<1x256xf32>
    %c0_i32_46 = arith.constant 0 : i32
    %c7_i32 = arith.constant 7 : i32
    %129 = vector.broadcast %c0_i32_46 : i32 to vector<1x256xi32>
    %130 = arith.maxsi %129, %110 : vector<1x256xi32>
    %131 = vector.broadcast %c7_i32 : i32 to vector<1x256xi32>
    %132 = arith.minsi %131, %130 : vector<1x256xi32>
    %c8_i32_47 = arith.constant 8 : i32
    %133 = vector.broadcast %c8_i32_47 : i32 to vector<1x256xi32>
    %134 = arith.muli %132, %133 : vector<1x256xi32>
    %c0_i32_48 = arith.constant 0 : i32
    %c7_i32_49 = arith.constant 7 : i32
    %135 = vector.broadcast %c0_i32_48 : i32 to vector<1x256xi32>
    %136 = arith.maxsi %135, %108 : vector<1x256xi32>
    %137 = vector.broadcast %c7_i32_49 : i32 to vector<1x256xi32>
    %138 = arith.minsi %137, %136 : vector<1x256xi32>
    %139 = arith.addi %134, %138 : vector<1x256xi32>
    %140 = vector.broadcast %139 : vector<1x256xi32> to vector<64x256xi32>
    %141 = arith.cmpi eq, %105, %140 : vector<64x256xi32>
    %cst_50 = arith.constant 0.000000e+00 : f32
    %142 = vector.shape_cast %128 : vector<1x256xf32> to vector<1x256xf32>
    %143 = vector.broadcast %142 : vector<1x256xf32> to vector<64x256xf32>
    %144 = vector.broadcast %cst_50 : f32 to vector<64x256xf32>
    %145 = arith.select %141, %143, %144 : vector<64x256xi1>, vector<64x256xf32>
    %146 = arith.addf %106, %145 : vector<64x256xf32>
    %c1_i32 = arith.constant 1 : i32
    %147 = vector.broadcast %c1_i32 : i32 to vector<1x256xi32>
    %148 = arith.addi %101, %147 : vector<1x256xi32>
    %c0_i32_51 = arith.constant 0 : i32
    %149 = vector.broadcast %c0_i32_51 : i32 to vector<1x256xi32>
    %150 = arith.addi %102, %149 : vector<1x256xi32>
    %c0_i32_52 = arith.constant 0 : i32
    %151 = vector.broadcast %c0_i32_52 : i32 to vector<1x256xi32>
    %152 = arith.cmpi sge, %148, %151 : vector<1x256xi32>
    %c8_i32_53 = arith.constant 8 : i32
    %153 = vector.broadcast %c8_i32_53 : i32 to vector<1x256xi32>
    %154 = arith.cmpi slt, %148, %153 : vector<1x256xi32>
    %155 = arith.andi %152, %154 : vector<1x256xi1>
    %c0_i32_54 = arith.constant 0 : i32
    %156 = vector.broadcast %c0_i32_54 : i32 to vector<1x256xi32>
    %157 = arith.cmpi sge, %150, %156 : vector<1x256xi32>
    %158 = arith.andi %155, %157 : vector<1x256xi1>
    %c8_i32_55 = arith.constant 8 : i32
    %159 = vector.broadcast %c8_i32_55 : i32 to vector<1x256xi32>
    %160 = arith.cmpi slt, %150, %159 : vector<1x256xi32>
    %161 = arith.andi %158, %160 : vector<1x256xi1>
    %cst_56 = arith.constant 1.000000e+00 : f32
    %162 = vector.broadcast %cst_56 : f32 to vector<1x256xf32>
    %163 = arith.subf %162, %104 : vector<1x256xf32>
    %164 = arith.mulf %103, %163 : vector<1x256xf32>
    %cst_57 = arith.constant 0.000000e+00 : f32
    %165 = vector.broadcast %cst_57 : f32 to vector<1x256xf32>
    %166 = arith.select %161, %164, %165 : vector<1x256xi1>, vector<1x256xf32>
    %c0_i32_58 = arith.constant 0 : i32
    %c7_i32_59 = arith.constant 7 : i32
    %167 = vector.broadcast %c0_i32_58 : i32 to vector<1x256xi32>
    %168 = arith.maxsi %167, %150 : vector<1x256xi32>
    %169 = vector.broadcast %c7_i32_59 : i32 to vector<1x256xi32>
    %170 = arith.minsi %169, %168 : vector<1x256xi32>
    %c8_i32_60 = arith.constant 8 : i32
    %171 = vector.broadcast %c8_i32_60 : i32 to vector<1x256xi32>
    %172 = arith.muli %170, %171 : vector<1x256xi32>
    %c0_i32_61 = arith.constant 0 : i32
    %c7_i32_62 = arith.constant 7 : i32
    %173 = vector.broadcast %c0_i32_61 : i32 to vector<1x256xi32>
    %174 = arith.maxsi %173, %148 : vector<1x256xi32>
    %175 = vector.broadcast %c7_i32_62 : i32 to vector<1x256xi32>
    %176 = arith.minsi %175, %174 : vector<1x256xi32>
    %177 = arith.addi %172, %176 : vector<1x256xi32>
    %178 = vector.broadcast %177 : vector<1x256xi32> to vector<64x256xi32>
    %179 = arith.cmpi eq, %105, %178 : vector<64x256xi32>
    %cst_63 = arith.constant 0.000000e+00 : f32
    %180 = vector.shape_cast %166 : vector<1x256xf32> to vector<1x256xf32>
    %181 = vector.broadcast %180 : vector<1x256xf32> to vector<64x256xf32>
    %182 = vector.broadcast %cst_63 : f32 to vector<64x256xf32>
    %183 = arith.select %179, %181, %182 : vector<64x256xi1>, vector<64x256xf32>
    %184 = arith.addf %146, %183 : vector<64x256xf32>
    %c0_i32_64 = arith.constant 0 : i32
    %185 = vector.broadcast %c0_i32_64 : i32 to vector<1x256xi32>
    %186 = arith.addi %101, %185 : vector<1x256xi32>
    %c1_i32_65 = arith.constant 1 : i32
    %187 = vector.broadcast %c1_i32_65 : i32 to vector<1x256xi32>
    %188 = arith.addi %102, %187 : vector<1x256xi32>
    %c0_i32_66 = arith.constant 0 : i32
    %189 = vector.broadcast %c0_i32_66 : i32 to vector<1x256xi32>
    %190 = arith.cmpi sge, %186, %189 : vector<1x256xi32>
    %c8_i32_67 = arith.constant 8 : i32
    %191 = vector.broadcast %c8_i32_67 : i32 to vector<1x256xi32>
    %192 = arith.cmpi slt, %186, %191 : vector<1x256xi32>
    %193 = arith.andi %190, %192 : vector<1x256xi1>
    %c0_i32_68 = arith.constant 0 : i32
    %194 = vector.broadcast %c0_i32_68 : i32 to vector<1x256xi32>
    %195 = arith.cmpi sge, %188, %194 : vector<1x256xi32>
    %196 = arith.andi %193, %195 : vector<1x256xi1>
    %c8_i32_69 = arith.constant 8 : i32
    %197 = vector.broadcast %c8_i32_69 : i32 to vector<1x256xi32>
    %198 = arith.cmpi slt, %188, %197 : vector<1x256xi32>
    %199 = arith.andi %196, %198 : vector<1x256xi1>
    %cst_70 = arith.constant 1.000000e+00 : f32
    %200 = vector.broadcast %cst_70 : f32 to vector<1x256xf32>
    %201 = arith.subf %200, %103 : vector<1x256xf32>
    %202 = arith.mulf %201, %104 : vector<1x256xf32>
    %cst_71 = arith.constant 0.000000e+00 : f32
    %203 = vector.broadcast %cst_71 : f32 to vector<1x256xf32>
    %204 = arith.select %199, %202, %203 : vector<1x256xi1>, vector<1x256xf32>
    %c0_i32_72 = arith.constant 0 : i32
    %c7_i32_73 = arith.constant 7 : i32
    %205 = vector.broadcast %c0_i32_72 : i32 to vector<1x256xi32>
    %206 = arith.maxsi %205, %188 : vector<1x256xi32>
    %207 = vector.broadcast %c7_i32_73 : i32 to vector<1x256xi32>
    %208 = arith.minsi %207, %206 : vector<1x256xi32>
    %c8_i32_74 = arith.constant 8 : i32
    %209 = vector.broadcast %c8_i32_74 : i32 to vector<1x256xi32>
    %210 = arith.muli %208, %209 : vector<1x256xi32>
    %c0_i32_75 = arith.constant 0 : i32
    %c7_i32_76 = arith.constant 7 : i32
    %211 = vector.broadcast %c0_i32_75 : i32 to vector<1x256xi32>
    %212 = arith.maxsi %211, %186 : vector<1x256xi32>
    %213 = vector.broadcast %c7_i32_76 : i32 to vector<1x256xi32>
    %214 = arith.minsi %213, %212 : vector<1x256xi32>
    %215 = arith.addi %210, %214 : vector<1x256xi32>
    %216 = vector.broadcast %215 : vector<1x256xi32> to vector<64x256xi32>
    %217 = arith.cmpi eq, %105, %216 : vector<64x256xi32>
    %cst_77 = arith.constant 0.000000e+00 : f32
    %218 = vector.shape_cast %204 : vector<1x256xf32> to vector<1x256xf32>
    %219 = vector.broadcast %218 : vector<1x256xf32> to vector<64x256xf32>
    %220 = vector.broadcast %cst_77 : f32 to vector<64x256xf32>
    %221 = arith.select %217, %219, %220 : vector<64x256xi1>, vector<64x256xf32>
    %222 = arith.addf %184, %221 : vector<64x256xf32>
    %c1_i32_78 = arith.constant 1 : i32
    %223 = vector.broadcast %c1_i32_78 : i32 to vector<1x256xi32>
    %224 = arith.addi %101, %223 : vector<1x256xi32>
    %c1_i32_79 = arith.constant 1 : i32
    %225 = vector.broadcast %c1_i32_79 : i32 to vector<1x256xi32>
    %226 = arith.addi %102, %225 : vector<1x256xi32>
    %c0_i32_80 = arith.constant 0 : i32
    %227 = vector.broadcast %c0_i32_80 : i32 to vector<1x256xi32>
    %228 = arith.cmpi sge, %224, %227 : vector<1x256xi32>
    %c8_i32_81 = arith.constant 8 : i32
    %229 = vector.broadcast %c8_i32_81 : i32 to vector<1x256xi32>
    %230 = arith.cmpi slt, %224, %229 : vector<1x256xi32>
    %231 = arith.andi %228, %230 : vector<1x256xi1>
    %c0_i32_82 = arith.constant 0 : i32
    %232 = vector.broadcast %c0_i32_82 : i32 to vector<1x256xi32>
    %233 = arith.cmpi sge, %226, %232 : vector<1x256xi32>
    %234 = arith.andi %231, %233 : vector<1x256xi1>
    %c8_i32_83 = arith.constant 8 : i32
    %235 = vector.broadcast %c8_i32_83 : i32 to vector<1x256xi32>
    %236 = arith.cmpi slt, %226, %235 : vector<1x256xi32>
    %237 = arith.andi %234, %236 : vector<1x256xi1>
    %238 = arith.mulf %103, %104 : vector<1x256xf32>
    %cst_84 = arith.constant 0.000000e+00 : f32
    %239 = vector.broadcast %cst_84 : f32 to vector<1x256xf32>
    %240 = arith.select %237, %238, %239 : vector<1x256xi1>, vector<1x256xf32>
    %c0_i32_85 = arith.constant 0 : i32
    %c7_i32_86 = arith.constant 7 : i32
    %241 = vector.broadcast %c0_i32_85 : i32 to vector<1x256xi32>
    %242 = arith.maxsi %241, %226 : vector<1x256xi32>
    %243 = vector.broadcast %c7_i32_86 : i32 to vector<1x256xi32>
    %244 = arith.minsi %243, %242 : vector<1x256xi32>
    %c8_i32_87 = arith.constant 8 : i32
    %245 = vector.broadcast %c8_i32_87 : i32 to vector<1x256xi32>
    %246 = arith.muli %244, %245 : vector<1x256xi32>
    %c0_i32_88 = arith.constant 0 : i32
    %c7_i32_89 = arith.constant 7 : i32
    %247 = vector.broadcast %c0_i32_88 : i32 to vector<1x256xi32>
    %248 = arith.maxsi %247, %224 : vector<1x256xi32>
    %249 = vector.broadcast %c7_i32_89 : i32 to vector<1x256xi32>
    %250 = arith.minsi %249, %248 : vector<1x256xi32>
    %251 = arith.addi %246, %250 : vector<1x256xi32>
    %252 = vector.broadcast %251 : vector<1x256xi32> to vector<64x256xi32>
    %253 = arith.cmpi eq, %105, %252 : vector<64x256xi32>
    %cst_90 = arith.constant 0.000000e+00 : f32
    %254 = vector.shape_cast %240 : vector<1x256xf32> to vector<1x256xf32>
    %255 = vector.broadcast %254 : vector<1x256xf32> to vector<64x256xf32>
    %256 = vector.broadcast %cst_90 : f32 to vector<64x256xf32>
    %257 = arith.select %253, %255, %256 : vector<64x256xi1>, vector<64x256xf32>
    %258 = arith.addf %222, %257 : vector<64x256xf32>
    %cst_91 = arith.constant dense<0.000000e+00> : vector<16x256xf32>
    %259 = tpu.matmul %3, %258, %cst_91 {dimension_numbers = #tpu.dot_dimension_numbers<[1], [0], [0], [1], [0, 0, 1, 1], [], []>} : vector<16x64xf32>, vector<64x256xf32>, vector<16x256xf32> -> vector<16x256xf32>
    %260 = math.floor %93 : vector<1x256xf32>
    %261 = math.floor %98 : vector<1x256xf32>
    %262 = arith.fptosi %260 : vector<1x256xf32> to vector<1x256xi32>
    %263 = arith.fptosi %261 : vector<1x256xf32> to vector<1x256xi32>
    %264 = arith.subf %93, %260 : vector<1x256xf32>
    %265 = arith.subf %98, %261 : vector<1x256xf32>
    %266 = tpu.iota {dimensions = array<i32: 0>} : vector<256x256xi32>
    %cst_92 = arith.constant 0.000000e+00 : f32
    %267 = vector.broadcast %cst_92 : f32 to vector<256x256xf32>
    %c0_i32_93 = arith.constant 0 : i32
    %268 = vector.broadcast %c0_i32_93 : i32 to vector<1x256xi32>
    %269 = arith.addi %262, %268 : vector<1x256xi32>
    %c0_i32_94 = arith.constant 0 : i32
    %270 = vector.broadcast %c0_i32_94 : i32 to vector<1x256xi32>
    %271 = arith.addi %263, %270 : vector<1x256xi32>
    %c0_i32_95 = arith.constant 0 : i32
    %272 = vector.broadcast %c0_i32_95 : i32 to vector<1x256xi32>
    %273 = arith.cmpi sge, %269, %272 : vector<1x256xi32>
    %c16_i32 = arith.constant 16 : i32
    %274 = vector.broadcast %c16_i32 : i32 to vector<1x256xi32>
    %275 = arith.cmpi slt, %269, %274 : vector<1x256xi32>
    %276 = arith.andi %273, %275 : vector<1x256xi1>
    %c0_i32_96 = arith.constant 0 : i32
    %277 = vector.broadcast %c0_i32_96 : i32 to vector<1x256xi32>
    %278 = arith.cmpi sge, %271, %277 : vector<1x256xi32>
    %279 = arith.andi %276, %278 : vector<1x256xi1>
    %c16_i32_97 = arith.constant 16 : i32
    %280 = vector.broadcast %c16_i32_97 : i32 to vector<1x256xi32>
    %281 = arith.cmpi slt, %271, %280 : vector<1x256xi32>
    %282 = arith.andi %279, %281 : vector<1x256xi1>
    %cst_98 = arith.constant 1.000000e+00 : f32
    %283 = vector.broadcast %cst_98 : f32 to vector<1x256xf32>
    %284 = arith.subf %283, %264 : vector<1x256xf32>
    %cst_99 = arith.constant 1.000000e+00 : f32
    %285 = vector.broadcast %cst_99 : f32 to vector<1x256xf32>
    %286 = arith.subf %285, %265 : vector<1x256xf32>
    %287 = arith.mulf %284, %286 : vector<1x256xf32>
    %cst_100 = arith.constant 0.000000e+00 : f32
    %288 = vector.broadcast %cst_100 : f32 to vector<1x256xf32>
    %289 = arith.select %282, %287, %288 : vector<1x256xi1>, vector<1x256xf32>
    %c0_i32_101 = arith.constant 0 : i32
    %c15_i32 = arith.constant 15 : i32
    %290 = vector.broadcast %c0_i32_101 : i32 to vector<1x256xi32>
    %291 = arith.maxsi %290, %271 : vector<1x256xi32>
    %292 = vector.broadcast %c15_i32 : i32 to vector<1x256xi32>
    %293 = arith.minsi %292, %291 : vector<1x256xi32>
    %c16_i32_102 = arith.constant 16 : i32
    %294 = vector.broadcast %c16_i32_102 : i32 to vector<1x256xi32>
    %295 = arith.muli %293, %294 : vector<1x256xi32>
    %c0_i32_103 = arith.constant 0 : i32
    %c15_i32_104 = arith.constant 15 : i32
    %296 = vector.broadcast %c0_i32_103 : i32 to vector<1x256xi32>
    %297 = arith.maxsi %296, %269 : vector<1x256xi32>
    %298 = vector.broadcast %c15_i32_104 : i32 to vector<1x256xi32>
    %299 = arith.minsi %298, %297 : vector<1x256xi32>
    %300 = arith.addi %295, %299 : vector<1x256xi32>
    %301 = vector.broadcast %300 : vector<1x256xi32> to vector<256x256xi32>
    %302 = arith.cmpi eq, %266, %301 : vector<256x256xi32>
    %cst_105 = arith.constant 0.000000e+00 : f32
    %303 = vector.shape_cast %289 : vector<1x256xf32> to vector<1x256xf32>
    %304 = vector.broadcast %303 : vector<1x256xf32> to vector<256x256xf32>
    %305 = vector.broadcast %cst_105 : f32 to vector<256x256xf32>
    %306 = arith.select %302, %304, %305 : vector<256x256xi1>, vector<256x256xf32>
    %307 = arith.addf %267, %306 : vector<256x256xf32>
    %c1_i32_106 = arith.constant 1 : i32
    %308 = vector.broadcast %c1_i32_106 : i32 to vector<1x256xi32>
    %309 = arith.addi %262, %308 : vector<1x256xi32>
    %c0_i32_107 = arith.constant 0 : i32
    %310 = vector.broadcast %c0_i32_107 : i32 to vector<1x256xi32>
    %311 = arith.addi %263, %310 : vector<1x256xi32>
    %c0_i32_108 = arith.constant 0 : i32
    %312 = vector.broadcast %c0_i32_108 : i32 to vector<1x256xi32>
    %313 = arith.cmpi sge, %309, %312 : vector<1x256xi32>
    %c16_i32_109 = arith.constant 16 : i32
    %314 = vector.broadcast %c16_i32_109 : i32 to vector<1x256xi32>
    %315 = arith.cmpi slt, %309, %314 : vector<1x256xi32>
    %316 = arith.andi %313, %315 : vector<1x256xi1>
    %c0_i32_110 = arith.constant 0 : i32
    %317 = vector.broadcast %c0_i32_110 : i32 to vector<1x256xi32>
    %318 = arith.cmpi sge, %311, %317 : vector<1x256xi32>
    %319 = arith.andi %316, %318 : vector<1x256xi1>
    %c16_i32_111 = arith.constant 16 : i32
    %320 = vector.broadcast %c16_i32_111 : i32 to vector<1x256xi32>
    %321 = arith.cmpi slt, %311, %320 : vector<1x256xi32>
    %322 = arith.andi %319, %321 : vector<1x256xi1>
    %cst_112 = arith.constant 1.000000e+00 : f32
    %323 = vector.broadcast %cst_112 : f32 to vector<1x256xf32>
    %324 = arith.subf %323, %265 : vector<1x256xf32>
    %325 = arith.mulf %264, %324 : vector<1x256xf32>
    %cst_113 = arith.constant 0.000000e+00 : f32
    %326 = vector.broadcast %cst_113 : f32 to vector<1x256xf32>
    %327 = arith.select %322, %325, %326 : vector<1x256xi1>, vector<1x256xf32>
    %c0_i32_114 = arith.constant 0 : i32
    %c15_i32_115 = arith.constant 15 : i32
    %328 = vector.broadcast %c0_i32_114 : i32 to vector<1x256xi32>
    %329 = arith.maxsi %328, %311 : vector<1x256xi32>
    %330 = vector.broadcast %c15_i32_115 : i32 to vector<1x256xi32>
    %331 = arith.minsi %330, %329 : vector<1x256xi32>
    %c16_i32_116 = arith.constant 16 : i32
    %332 = vector.broadcast %c16_i32_116 : i32 to vector<1x256xi32>
    %333 = arith.muli %331, %332 : vector<1x256xi32>
    %c0_i32_117 = arith.constant 0 : i32
    %c15_i32_118 = arith.constant 15 : i32
    %334 = vector.broadcast %c0_i32_117 : i32 to vector<1x256xi32>
    %335 = arith.maxsi %334, %309 : vector<1x256xi32>
    %336 = vector.broadcast %c15_i32_118 : i32 to vector<1x256xi32>
    %337 = arith.minsi %336, %335 : vector<1x256xi32>
    %338 = arith.addi %333, %337 : vector<1x256xi32>
    %339 = vector.broadcast %338 : vector<1x256xi32> to vector<256x256xi32>
    %340 = arith.cmpi eq, %266, %339 : vector<256x256xi32>
    %cst_119 = arith.constant 0.000000e+00 : f32
    %341 = vector.shape_cast %327 : vector<1x256xf32> to vector<1x256xf32>
    %342 = vector.broadcast %341 : vector<1x256xf32> to vector<256x256xf32>
    %343 = vector.broadcast %cst_119 : f32 to vector<256x256xf32>
    %344 = arith.select %340, %342, %343 : vector<256x256xi1>, vector<256x256xf32>
    %345 = arith.addf %307, %344 : vector<256x256xf32>
    %c0_i32_120 = arith.constant 0 : i32
    %346 = vector.broadcast %c0_i32_120 : i32 to vector<1x256xi32>
    %347 = arith.addi %262, %346 : vector<1x256xi32>
    %c1_i32_121 = arith.constant 1 : i32
    %348 = vector.broadcast %c1_i32_121 : i32 to vector<1x256xi32>
    %349 = arith.addi %263, %348 : vector<1x256xi32>
    %c0_i32_122 = arith.constant 0 : i32
    %350 = vector.broadcast %c0_i32_122 : i32 to vector<1x256xi32>
    %351 = arith.cmpi sge, %347, %350 : vector<1x256xi32>
    %c16_i32_123 = arith.constant 16 : i32
    %352 = vector.broadcast %c16_i32_123 : i32 to vector<1x256xi32>
    %353 = arith.cmpi slt, %347, %352 : vector<1x256xi32>
    %354 = arith.andi %351, %353 : vector<1x256xi1>
    %c0_i32_124 = arith.constant 0 : i32
    %355 = vector.broadcast %c0_i32_124 : i32 to vector<1x256xi32>
    %356 = arith.cmpi sge, %349, %355 : vector<1x256xi32>
    %357 = arith.andi %354, %356 : vector<1x256xi1>
    %c16_i32_125 = arith.constant 16 : i32
    %358 = vector.broadcast %c16_i32_125 : i32 to vector<1x256xi32>
    %359 = arith.cmpi slt, %349, %358 : vector<1x256xi32>
    %360 = arith.andi %357, %359 : vector<1x256xi1>
    %cst_126 = arith.constant 1.000000e+00 : f32
    %361 = vector.broadcast %cst_126 : f32 to vector<1x256xf32>
    %362 = arith.subf %361, %264 : vector<1x256xf32>
    %363 = arith.mulf %362, %265 : vector<1x256xf32>
    %cst_127 = arith.constant 0.000000e+00 : f32
    %364 = vector.broadcast %cst_127 : f32 to vector<1x256xf32>
    %365 = arith.select %360, %363, %364 : vector<1x256xi1>, vector<1x256xf32>
    %c0_i32_128 = arith.constant 0 : i32
    %c15_i32_129 = arith.constant 15 : i32
    %366 = vector.broadcast %c0_i32_128 : i32 to vector<1x256xi32>
    %367 = arith.maxsi %366, %349 : vector<1x256xi32>
    %368 = vector.broadcast %c15_i32_129 : i32 to vector<1x256xi32>
    %369 = arith.minsi %368, %367 : vector<1x256xi32>
    %c16_i32_130 = arith.constant 16 : i32
    %370 = vector.broadcast %c16_i32_130 : i32 to vector<1x256xi32>
    %371 = arith.muli %369, %370 : vector<1x256xi32>
    %c0_i32_131 = arith.constant 0 : i32
    %c15_i32_132 = arith.constant 15 : i32
    %372 = vector.broadcast %c0_i32_131 : i32 to vector<1x256xi32>
    %373 = arith.maxsi %372, %347 : vector<1x256xi32>
    %374 = vector.broadcast %c15_i32_132 : i32 to vector<1x256xi32>
    %375 = arith.minsi %374, %373 : vector<1x256xi32>
    %376 = arith.addi %371, %375 : vector<1x256xi32>
    %377 = vector.broadcast %376 : vector<1x256xi32> to vector<256x256xi32>
    %378 = arith.cmpi eq, %266, %377 : vector<256x256xi32>
    %cst_133 = arith.constant 0.000000e+00 : f32
    %379 = vector.shape_cast %365 : vector<1x256xf32> to vector<1x256xf32>
    %380 = vector.broadcast %379 : vector<1x256xf32> to vector<256x256xf32>
    %381 = vector.broadcast %cst_133 : f32 to vector<256x256xf32>
    %382 = arith.select %378, %380, %381 : vector<256x256xi1>, vector<256x256xf32>
    %383 = arith.addf %345, %382 : vector<256x256xf32>
    %c1_i32_134 = arith.constant 1 : i32
    %384 = vector.broadcast %c1_i32_134 : i32 to vector<1x256xi32>
    %385 = arith.addi %262, %384 : vector<1x256xi32>
    %c1_i32_135 = arith.constant 1 : i32
    %386 = vector.broadcast %c1_i32_135 : i32 to vector<1x256xi32>
    %387 = arith.addi %263, %386 : vector<1x256xi32>
    %c0_i32_136 = arith.constant 0 : i32
    %388 = vector.broadcast %c0_i32_136 : i32 to vector<1x256xi32>
    %389 = arith.cmpi sge, %385, %388 : vector<1x256xi32>
    %c16_i32_137 = arith.constant 16 : i32
    %390 = vector.broadcast %c16_i32_137 : i32 to vector<1x256xi32>
    %391 = arith.cmpi slt, %385, %390 : vector<1x256xi32>
    %392 = arith.andi %389, %391 : vector<1x256xi1>
    %c0_i32_138 = arith.constant 0 : i32
    %393 = vector.broadcast %c0_i32_138 : i32 to vector<1x256xi32>
    %394 = arith.cmpi sge, %387, %393 : vector<1x256xi32>
    %395 = arith.andi %392, %394 : vector<1x256xi1>
    %c16_i32_139 = arith.constant 16 : i32
    %396 = vector.broadcast %c16_i32_139 : i32 to vector<1x256xi32>
    %397 = arith.cmpi slt, %387, %396 : vector<1x256xi32>
    %398 = arith.andi %395, %397 : vector<1x256xi1>
    %399 = arith.mulf %264, %265 : vector<1x256xf32>
    %cst_140 = arith.constant 0.000000e+00 : f32
    %400 = vector.broadcast %cst_140 : f32 to vector<1x256xf32>
    %401 = arith.select %398, %399, %400 : vector<1x256xi1>, vector<1x256xf32>
    %c0_i32_141 = arith.constant 0 : i32
    %c15_i32_142 = arith.constant 15 : i32
    %402 = vector.broadcast %c0_i32_141 : i32 to vector<1x256xi32>
    %403 = arith.maxsi %402, %387 : vector<1x256xi32>
    %404 = vector.broadcast %c15_i32_142 : i32 to vector<1x256xi32>
    %405 = arith.minsi %404, %403 : vector<1x256xi32>
    %c16_i32_143 = arith.constant 16 : i32
    %406 = vector.broadcast %c16_i32_143 : i32 to vector<1x256xi32>
    %407 = arith.muli %405, %406 : vector<1x256xi32>
    %c0_i32_144 = arith.constant 0 : i32
    %c15_i32_145 = arith.constant 15 : i32
    %408 = vector.broadcast %c0_i32_144 : i32 to vector<1x256xi32>
    %409 = arith.maxsi %408, %385 : vector<1x256xi32>
    %410 = vector.broadcast %c15_i32_145 : i32 to vector<1x256xi32>
    %411 = arith.minsi %410, %409 : vector<1x256xi32>
    %412 = arith.addi %407, %411 : vector<1x256xi32>
    %413 = vector.broadcast %412 : vector<1x256xi32> to vector<256x256xi32>
    %414 = arith.cmpi eq, %266, %413 : vector<256x256xi32>
    %cst_146 = arith.constant 0.000000e+00 : f32
    %415 = vector.shape_cast %401 : vector<1x256xf32> to vector<1x256xf32>
    %416 = vector.broadcast %415 : vector<1x256xf32> to vector<256x256xf32>
    %417 = vector.broadcast %cst_146 : f32 to vector<256x256xf32>
    %418 = arith.select %414, %416, %417 : vector<256x256xi1>, vector<256x256xf32>
    %419 = arith.addf %383, %418 : vector<256x256xf32>
    %cst_147 = arith.constant dense<0.000000e+00> : vector<16x256xf32>
    %420 = tpu.matmul %78, %419, %cst_147 {dimension_numbers = #tpu.dot_dimension_numbers<[1], [0], [0], [1], [0, 0, 1, 1], [], []>} : vector<16x256xf32>, vector<256x256xf32>, vector<16x256xf32> -> vector<16x256xf32>
    %421 = vector.broadcast %77 : vector<1x256xf32> to vector<16x256xf32>
    %422 = arith.mulf %259, %421 : vector<16x256xf32>
    %cst_148 = arith.constant 1.000000e+00 : f32
    %423 = vector.broadcast %cst_148 : f32 to vector<1x256xf32>
    %424 = arith.subf %423, %77 : vector<1x256xf32>
    %425 = vector.broadcast %424 : vector<1x256xf32> to vector<16x256xf32>
    %426 = arith.mulf %420, %425 : vector<16x256xf32>
    %427 = arith.addf %422, %426 : vector<16x256xf32>
    %c0_149 = arith.constant 0 : index
    %c0_150 = arith.constant 0 : index
    %c0_151 = arith.constant 0 : index
    %428 = vector.load %arg6[%c0_149, %c0_150, %c0_151] : memref<1x16x256xf32, #tpu.memory_space<vmem>>, vector<1x16x256xf32>
    %429 = vector.shape_cast %428 : vector<1x16x256xf32> to vector<16x256xf32>
    %430 = vector.shape_cast %427 : vector<16x256xf32> to vector<1x16x256xf32>
    tpu.vector_store %arg6[%c0_149, %c0_150, %c0_151], %430 {strides = array<i32>} : memref<1x16x256xf32, #tpu.memory_space<vmem>>, vector<1x16x256xf32>,
    return
  }
  func.func @transform_0(%arg0: i32) -> (i32, i32, i32) {
    %c0_i32 = arith.constant 0 : i32
    %c0_i32_0 = arith.constant 0 : i32
    %c0_i32_1 = arith.constant 0 : i32
    return %arg0, %c0_i32, %c0_i32_0 : i32, i32, i32
  }
  func.func @transform_1(%arg0: i32) -> (i32, i32, i32) {
    %c0_i32 = arith.constant 0 : i32
    %c0_i32_0 = arith.constant 0 : i32
    %c0_i32_1 = arith.constant 0 : i32
    return %arg0, %c0_i32, %c0_i32_0 : i32, i32, i32
  }
  func.func @transform_2(%arg0: i32) -> (i32, i32) {
    %c0_i32 = arith.constant 0 : i32
    %c0_i32_0 = arith.constant 0 : i32
    %c0_i32_1 = arith.constant 0 : i32
    return %c0_i32, %c0_i32_0 : i32, i32
  }
  func.func @transform_3(%arg0: i32) -> (i32, i32) {
    %c0_i32 = arith.constant 0 : i32
    %c0_i32_0 = arith.constant 0 : i32
    %c0_i32_1 = arith.constant 0 : i32
    return %c0_i32, %c0_i32_0 : i32, i32
  }
  func.func @transform_4(%arg0: i32) -> (i32, i32) {
    %c0_i32 = arith.constant 0 : i32
    %c0_i32_0 = arith.constant 0 : i32
    %c0_i32_1 = arith.constant 0 : i32
    return %c0_i32, %c0_i32_0 : i32, i32
  }
  func.func @transform_5(%arg0: i32) -> (i32, i32, i32) {
    %c0_i32 = arith.constant 0 : i32
    %c0_i32_0 = arith.constant 0 : i32
    %c0_i32_1 = arith.constant 0 : i32
    return %arg0, %c0_i32, %c0_i32_0 : i32, i32, i32
  }
}

</mosaic_0001>

<bundles_post_ra>
// kernel: tpu_custom_call.1
= control target key start
LH: loop header
LB: loop body
LE: loop exit
PB: predicated region body
PF: predicated region fallthrough
CT: control target
= control target key end

     0   :  { %s5718_s0 = inlined_call_operand.hbm [shape: f32[2,16,290], index: 0, kind: input, shape index: {}]   ;;  %s5719_s1 = inlined_call_operand.hbm [shape: f32[2,16,64], index: 1, kind: input, shape index: {}]   ;;  %s5720_s2 = inlined_call_operand.hbm [shape: f32[5,288], index: 2, kind: input, shape index: {}]   ;;  %s5721_s3 = inlined_call_operand.hbm [shape: f32[64,290], index: 3, kind: input, shape index: {}]   ;;  %s5722_s4 = inlined_call_operand.hbm [shape: f32[8,256], index: 4, kind: input, shape index: {}]   ;;  %s5723_s5 = inlined_call_operand.hbm [shape: f32[2,16,256], index: 5, kind: output, shape index: {}]  }
   0x1   :  { %5748 = sst [smem:[#allocation31_spill]] %s5718_s0 }
   0x2   :  { %5749 = sst [smem:[#allocation32_spill]] %s5720_s2 }
   0x3   :  { %5750 = sst [smem:[#allocation33_spill]] %s5721_s3 }
   0x4   :  { %10 = vsyncpa [#allocation5], 0 }
   0x5   :  { %12 = vsyncpa [#allocation5 + $0x1], 0 }
   0x6   :  { %13 = vsyncpa [#allocation8], 0 }
   0x7   :  { %15 = vsyncpa [#allocation8 + $0x1], 0 }
   0x8   :  { %16 = vsyncpa [#allocation11], 0 }
   0x9   :  { %17 = vsyncpa [#allocation6], 0 }
   0xa   :  { %19 = vsyncpa [#allocation6 + $0x1], 0  ;;  %s3505_s18 = smov 0   ;;  %s3507_s19 = smov 0  }
   0xb   :  { %s3509_s20 = smov 0   ;;  %s3511_s21 = smov 0  }
   0xc LB: > { %s3526_s22 = sadd.s32 4294967295, %s3447_s21   ;;  %s3051_s23 = sadd.s32 4294967294, %s3447_s21   ;;  %s3447_s21 = sphi %s3511_s21, %s5871_s21   ;;  %s3443_s20 = sphi %s3509_s20, %s5870_s20   ;;  %s3439_s19 = sphi %s3507_s19, %s5869_s19   ;;  %s3435_s18 = sphi %s3505_s18, %s5868_s18  }
   0xd   : > { %p45_p0 = scmp.ne.s32.totalorder %s3439_s19, %s3435_s18  ;;  %p5724_p1 = scmp.eq.s32.totalorder %s3526_s22, 0 }
   0xe   : > { %p164_p3 = scmp.eq.s32.totalorder %s3051_s23, 1  ;;  %p3052_p5 = scmp.ge.s32.totalorder %s3447_s21, 1 }
   0xf   : > { %p3535_p4 = por %p5724_p1, %p45_p0  ;;  %p171_p7 = scmp.lt.s32.totalorder %s3447_s21, 3 }
  0x10   : > { %p3540_p6 = por %p164_p3, %p45_p0  ;;  %s3449_s27 = smov [#allocation9]  }
  0x11   : > { %s5751_s24 = scalar_select %p3535_p4, 1, 0 }
  0x12   : > { %s5752_s25 = scalar_select %p3540_p6, 1, 0 }
  0x13   : > { %p3545_p8 = pnand %p3052_p5, %p171_p7  ;;  %s184_s28 = sshll.u32 %s3449_s27, 4  ;;  %s185_s28 = int_to_ptr.vmem [resolvable:$true] %s184_s28 }
  0x14   : > { %s3450_s29 = smov [#allocation10]   ;;  %s3451_s7 = smov [#allocation12]  }
  0x15   : > { %s5753_s26 = scalar_select %p3545_p8, 1, 0 }
  0x16   : > { %p3141_p10 = pneg %p3545_p8  ;;  %s194_s30 = sshll.u32 %s3450_s29, 4  ;;  %s195_s30 = int_to_ptr.vmem [resolvable:$true] %s194_s30 }
  0x17   : > { %s208_s8 = sshll.u32 %s3451_s7, 4  ;;  %s3248_s9 = scalar_lea.vmem %s185_s28, 384  ;;  %s209_s8 = int_to_ptr.vmem [resolvable:$true] %s208_s8 }
  0x18   : > { %p3554_p11 = pnand %p3141_p10, %p5724_p1  ;;  %p3249_p13 = scmp.ne.s32.totalorder %s185_s28, %s3248_s9 }
  0x19   : > { %p3256_p5 = scmp.lt.s32.totalorder %s185_s28, %s185_s28  ;;  %p3257_p7 = scmp.lt.s32.totalorder %s3248_s9, %s3248_s9 }
  0x1a   : > { %p3239_p12 = pneg %p3554_p11 }
  0x1b   : > { %p3258_p9 = por %p3257_p7, %p3256_p5 }
  0x1c   : > { %p3251_p0 = pnand %p3249_p13, %p3239_p12 }
  0x1e   : > { %p3252_p3 = pneg %p3251_p0 }
  0x20   : > { %p3259_p10 = pnand %p3258_p9, %p3252_p3 }
  0x22   : > { %3262 = shalt.err (!%p3259_p10)
}
  0x23   : > { %s5755_s2 = sld [smem:[#allocation32_spill]]  ;;  %s3274_s12 = scalar_lea.vmem %s195_s30, 3072 }
  0x24   : > { %p3275_p1 = scmp.ne.s32.totalorder %s195_s30, %s3274_s12  ;;  %p3282_p13 = scmp.lt.s32.totalorder %s195_s30, %s195_s30 }
  0x25   : > { %p3283_p0 = scmp.lt.s32.totalorder %s3274_s12, %s3274_s12 }
  0x26   : > { %p3277_p2 = pnand %p3275_p1, %p3239_p12 }
  0x27   : > { %p3284_p4 = por %p3283_p0, %p3282_p13 }
  0x28   : > { %p3278_p6 = pneg %p3277_p2 }
  0x29   : > { %3144 = dma.hbm_to_vmem [thread:$0]  (!%p3554_p11), %s5755_s2, 384, %s185_s28, [#allocation8]  }
  0x2a   : > { %p3285_p8 = pnand %p3284_p4, %p3278_p6 }
  0x2c   : > { %3288 = shalt.err (!%p3285_p8)
}
  0x2d   : > { %s5727_s13 = smov 384   ;;  %s5728_s14 = smov 24  }
  0x2e   : > { %s5756_s3 = sld [smem:[#allocation33_spill]]  ;;  %s3300_s17 = scalar_lea.vmem %s209_s8, 256 }
  0x2f   : > { %p3301_p1 = scmp.ne.s32.totalorder %s209_s8, %s3300_s17  ;;  %p3308_p6 = scmp.lt.s32.totalorder %s209_s8, %s209_s8 }
  0x30   : > { %p3309_p8 = scmp.lt.s32.totalorder %s3300_s17, %s3300_s17 }
  0x31   : > { %p3303_p2 = pnand %p3301_p1, %p3239_p12 }
  0x32   : > { %p3310_p9 = por %p3309_p8, %p3308_p6 }
  0x33   : > { %p3304_p4 = pneg %p3303_p2 }
  0x34   : > { %3147 = dma.hbm_to_vmem [thread:$0]  (!%p3554_p11), %s5756_s3, 3072, %s195_s30, [#allocation11], %s5727_s13, %s5727_s13, %s5728_s14  }
  0x35   : > { %p3311_p3 = pnand %p3310_p9, %p3304_p4 }
  0x37   : > { %3314 = shalt.err (!%p3311_p3)
}
  0x38   : > { %3150 = dma.hbm_to_vmem [thread:$0]  (!%p3554_p11), %s5722_s4, 256, %s209_s8, [#allocation11]  }
  0x39   : > { %s3588_s28 = sadd.s32 1, %s3447_s21   ;;  %s32_s30 = sadd.s32 1, %s3443_s20 }
  0x3a   : > { %s29_s29 = ssub.s32 %s3447_s21, %s3588_s28  ;;  %p39_p5 = scmp.ne.s32.totalorder %s3443_s20, %s3439_s19 }
  0x3b   : > { %p30_p12 = scmp.eq.s32.totalorder %s29_s29, 0  ;;  %p40_p7 = scmp.eq.s32.totalorder %s3447_s21, 0 }
  0x3c   : > { %p3165_p10 = scmp.lt.s32.totalorder %s3447_s21, 2  ;;  %p5757_p0 = scmp.eq.s32.totalorder %s3526_s22, 1 }
  0x3d   : > { %s3598_s6 = scalar_select %p30_p12, %s3443_s20, %s32_s30  }
  0x3e   : > { %p41_p13 = por %p40_p7, %p39_p5  ;;  %p3602_p1 = por %p5757_p0, %p39_p5 }
  0x3f   : > { %s3607_s9 = sand.u32 1, %s3443_s20   ;;  %s3113_s8 = smul.u32 768, %s3447_s21 }
  0x40   : > { %s3112_s10 = smul.u32 48, %s3607_s9  ;;  %s5759_s0 = sld [smem:[#allocation31_spill]] }
  0x41   : > { %p3616_p11 = pnand %p3165_p10, %p41_p13  ;;  %s220_s29 = scalar_lea.sflag [#allocation5], %s3607_s9 }
  0x42   : > { %s223_s23 = scalar_lea.vmem [#allocation4], %s3112_s10 }
  0x43   : > { %s230_s27 = sshll.u32 %s223_s23, 4  ;;  %p3317_p4 = pneg %p3616_p11  ;;  %s3621_s27 = int_to_ptr.vmem [resolvable:$true] %s230_s27 }
  0x46   : > { %s3614_s15 = scalar_lea.hbm %s5759_s0, %s3113_s8  ;;  %s3320_s12 = scalar_lea.hbm %s5759_s0, 1536 }
  0x47   : > { %s3315_s30 = scalar_lea.hbm %s3614_s15, 768  ;;  %p3321_p9 = scmp.lt.s32.totalorder %s3614_s15, %s5759_s0 }
  0x48   : > { %p3316_p2 = scmp.ne.s32.totalorder %s3614_s15, %s3315_s30  ;;  %p3322_p3 = scmp.lt.s32.totalorder %s3320_s12, %s3315_s30 }
  0x4a   : > { %p3318_p6 = pnand %p3317_p4, %p3316_p2  ;;  %p3323_p12 = por %p3322_p3, %p3321_p9 }
  0x4c   : > { %p3319_p8 = pneg %p3318_p6 }
  0x4e   : > { %p3324_p5 = pnand %p3323_p12, %p3319_p8 }
  0x50   : > { %3327 = shalt.err (!%p3324_p5)
}
  0x51   : > { %s3328_s10 = scalar_lea.vmem %s3621_s27, 768  ;;  %s3454_s23 = smov [#allocation4]  }
  0x52   : > { %p3329_p7 = scmp.ne.s32.totalorder %s3621_s27, %s3328_s10  ;;  %s3333_s8 = sshll.u32 %s3454_s23, 4  ;;  %s3334_s8 = int_to_ptr.vmem [resolvable:$false] %s3333_s8 }
  0x53   : > { %s3335_s11 = scalar_lea.vmem %s3334_s8, 1536  ;;  %p3336_p0 = scmp.lt.s32.totalorder %s3621_s27, %s3334_s8 }
  0x54   : > { %p3331_p10 = pnand %p3329_p7, %p3317_p4  ;;  %p3337_p2 = scmp.lt.s32.totalorder %s3335_s11, %s3328_s10 }
  0x56   : > { %p3332_p13 = pneg %p3331_p10  ;;  %p3338_p6 = por %p3337_p2, %p3336_p0 }
  0x58   : > { %p3339_p9 = pnand %p3338_p6, %p3332_p13 }
  0x5a   : > { %3342 = shalt.err (!%p3339_p9)
}
  0x5b   : > { %s5761_s13 = smov 24   ;;  %s5762_s14 = smov 384  }
  0x5c   : > { %3154 = dma.hbm_to_vmem [thread:$0]  (!%p3616_p11), %s3614_s15, 768, %s3621_s27, %s220_s29, %s5762_s14, %s5762_s14, %s5761_s13  }
  0x5d   : > { %s3058_s30 = sshll.u32 %s3607_s9, 4  ;;  %s3081_s12 = sshll.u32 %s3447_s21, 8 }
  0x5e   : > { %s3658_s8 = scalar_lea.hbm %s5719_s1, %s3081_s12  ;;  %s244_s11 = scalar_lea.vmem [#allocation7], %s3058_s30 }
  0x5f   : > { %s251_s17 = sshll.u32 %s244_s11, 4  ;;  %s5763_s0 = sand.u32 1, %s3447_s21   ;;  %s3660_s17 = int_to_ptr.vmem [resolvable:$true] %s251_s17 }
  0x60   : > { %s3664_s2 = scalar_lea.sflag [#allocation8], %s5763_s0  ;;  %s3343_s3 = scalar_lea.hbm %s3658_s8, 256 }
  0x61   : > { %p3344_p8 = scmp.ne.s32.totalorder %s3658_s8, %s3343_s3  ;;  %s3348_s27 = scalar_lea.hbm %s5719_s1, 512 }
  0x62   : > { %p3349_p5 = scmp.lt.s32.totalorder %s3658_s8, %s5719_s1  ;;  %p3350_p7 = scmp.lt.s32.totalorder %s3348_s27, %s3343_s3 }
  0x63   : > { %p3346_p3 = pnand %p3344_p8, %p3317_p4 }
  0x64   : > { %p3351_p10 = por %p3350_p7, %p3349_p5 }
  0x65   : > { %p3347_p12 = pneg %p3346_p3 }
  0x67   : > { %p3352_p13 = pnand %p3351_p10, %p3347_p12 }
  0x69   : > { %3355 = shalt.err (!%p3352_p13)
}
  0x6a   : > { %s3356_s0 = scalar_lea.vmem %s3660_s17, 256  ;;  %s3455_s14 = smov [#allocation7]  }
  0x6b   : > { %p3357_p0 = scmp.ne.s32.totalorder %s3660_s17, %s3356_s0  ;;  %s3361_s30 = sshll.u32 %s3455_s14, 4  ;;  %s3362_s30 = int_to_ptr.vmem [resolvable:$false] %s3361_s30 }
  0x6c   : > { %s3363_s12 = scalar_lea.vmem %s3362_s30, 512  ;;  %p3364_p9 = scmp.lt.s32.totalorder %s3660_s17, %s3362_s30 }
  0x6d   : > { %p3359_p2 = pnand %p3357_p0, %p3317_p4  ;;  %p3365_p8 = scmp.lt.s32.totalorder %s3363_s12, %s3356_s0 }
  0x6f   : > { %p3360_p6 = pneg %p3359_p2  ;;  %p3366_p3 = por %p3365_p8, %p3364_p9 }
  0x71   : > { %p3367_p5 = pnand %p3366_p3, %p3360_p6 }
  0x73   : > { %3370 = shalt.err (!%p3367_p5)
}
  0x74   : > { %s3456_s3 = smov 128   ;;  %s3457_s10 = smov 8  }
  0x75   : > { %3157 = dma.hbm_to_vmem [thread:$0]  (!%p3616_p11), %s3658_s8, 256, %s3660_s17, %s3664_s2, %s3456_s3, %s3456_s3, %s3457_s10  }
  0x76   : > { %p5764_p4 = scmp.ne.s32.totalorder %s5753_s26, 0 }
  0x78   : > { %263 = sbr.rel (%p5764_p4) target bundleno = 1305 (0x519), region = 40 }
  0x7d   : > { %s3692_s23 = sand.u32 1, %s3439_s19   ;;  %p5765_p12 = scmp.ne.s32.totalorder %s5751_s24, 0 }
  0x7e   : > { %s3114_s11 = smul.u32 48, %s3692_s23  ;;  %s266_s9 = scalar_lea.sflag [#allocation5], %s3692_s23 }
  0x80   : > { %s3696_s15 = scalar_lea.vmem [#allocation4], %s3114_s11 }
  0x81   : > { %3414 = dma.done.wait (%p5765_p12), %s266_s9, 768  }
  0x82   : > { %3416 = vsyncadd (%p5765_p12), %s266_s9, 4294966528  ;;  %s274_s2 = sand.u32 1, %s3526_s22   ;;  %s3062_s26 = sshll.u32 %s3692_s23, 4 }
  0x83   : > { %s275_s16 = scalar_lea.sflag [#allocation8], %s274_s2  ;;  %s3704_s17 = scalar_lea.vmem [#allocation7], %s3062_s26 }
  0x84   : > { %3418 = dma.done.wait (%p5765_p12), %s275_s16, 256  }
  0x85   : > { %3420 = vsyncadd (%p5765_p12), %s275_s16, 4294967040  ;;  %p5766_p11 = scmp.eq.s32.totalorder %s3526_s22, 0 }
  0x87   : > { %3422 = dma.done.wait (%p5766_p11), [#allocation8], 384   ;;  %p5767_p7 = pmov %p5766_p11 }
  0x89   : > { %3424 = vsyncadd (%p5767_p7), [#allocation8], 4294966912  ;;  %p5768_p10 = pmov %p5767_p7 }
  0x8a   : > { %p5769_p13 = pmov %p5767_p7 }
  0x8b   : > { %3426 = dma.done.wait (%p5768_p10), [#allocation11], 3328  }
  0x8c   : > { %3428 = vsyncadd (%p5769_p13), [#allocation11], 4294963968  ;;  %v515_v0 = vlaneseq  ;;  %v5729_v1 = vmov 0.0   ;;  %v354_v3 = vld [vmem:[#allocation10 + $0xb0] sm:$0xff]  ;;  %v353_v4 = vld [vmem:[#allocation10 + $0xa8] sm:$0xff]  ;;  %s3459_s24 = smov 32  }
  0x8d   : > { %427 = vmatprep.mubr.f32.mxu0 %v5729_v1  ;;  %1333 = vmatprep.mubr.f32.mxu1 %v5729_v1  ;;  %v351_v5 = vld [vmem:[#allocation10 + $0x98] sm:$0xff]  ;;  %v350_v8 = vld [vmem:[#allocation10 + $0x90] sm:$0xff]  ;;  %v348_v9 = vld [vmem:[#allocation10 + $0x80] sm:$0xff]  ;;  %s3460_s8 = smov 18   ;;  %vm356_vm0 = vcmask 523264   ;;  %s3461_s27 = smov 16  }
  0x8e   : > { %v3720_v2 = vshrl.u32 %v515_v0, 7  ;;  %379 = vmatprep.subr.mxu0 %v354_v3  ;;  %v347_v10 = vld [vmem:[#allocation10 + $0x78] sm:$0xff]  ;;  %v330_v11 = vld [vmem:[#allocation12] sm:$0xff]  ;;  %v345_v12 = vld [vmem:[#allocation10 + $0x68] sm:$0xff]  ;;  %s3462_s29 = smov 2   ;;  %s3463_s13 = smov 34  }
  0x8f   : > { %380 = vmatpush1.msra.mxu0 %v353_v4  ;;  %v331_v14 = vld [vmem:[#allocation12 + $0x8] sm:$0xff]  ;;  %v344_v16 = vld [vmem:[#allocation10 + $0x60] sm:$0xff]  ;;  %v342_v17 = vld [vmem:[#allocation10 + $0x50] sm:$0xff]  ;;  %s3464_s0 = smov 111   ;;  %s3465_s14 = smov 96   ;;  %vm678_vm1 = vcmask 908288  }
  0x90   : > { %5770 = vst [vmem:[#allocation19_spill] sm:$0xff] %v3720_v2  ;;  %v3723_v6 = vsub.s32 4, %v3720_v2  ;;  %v564_v7 = vsub.s32 5, %v3720_v2  ;;  %381 = vmatprep.subr.mxu0 %v351_v5  ;;  %v341_v19 = vld [vmem:[#allocation10 + $0x48] sm:$0xff]  ;;  %v339_v21 = vld [vmem:[#allocation10 + $0x38] sm:$0xff]  ;;  %v338_v22 = vld [vmem:[#allocation10 + $0x30] sm:$0xff] }
  0x91   : > { %382 = vmatpush1.msra.mxu0 %v350_v8  ;;  %v336_v23 = vld [vmem:[#allocation10 + $0x20] sm:$0xff]  ;;  %v335_v24 = vld [vmem:[#allocation10 + $0x18] sm:$0xff]  ;;  %v333_v25 = vld [vmem:[#allocation10 + $0x8] sm:$0xff]  ;;  %s3466_s30 = smov 110   ;;  %s3467_s12 = smov 112   ;;  %vm741_vm2 = vcmask 261120  }
  0x92   : > { %5771 = vst [vmem:[#allocation20_spill] sm:$0xff] %v3723_v6  ;;  %v3727_v13 = vrot.slane %v330_v11, %v3723_v6  ;;  %v565_v15 = vrot.slane %v330_v11, %v564_v7  ;;  %383 = vmatprep.subr.mxu0 %v348_v9  ;;  %v3731_v18 = vrot.slane %v331_v14, %v3723_v6  ;;  %v332_v26 = vld [vmem:[#allocation10] sm:$0xff]  ;;  %v355_v27 = vld [vmem:[#allocation10 + $0xb8] sm:$0xff]  ;;  %v349_v31 = vld [vmem:[#allocation10 + $0x88] sm:$0xff]  ;;  %s3468_s3 = smov 126   ;;  %vm695_vm3 = vcmask 146432  }
  0x93   : > { %384 = vmatpush1.msra.mxu0 %v347_v10  ;;  %v569_v20 = vrot.slane %v331_v14, %v564_v7  ;;  %v328_v28 = vld [vmem:[%s3704_s17] sm:$0xff]  ;;  %v352_v29 = vld [vmem:[#allocation10 + $0xa0] sm:$0xff]  ;;  %v346_v32 = vld [vmem:[#allocation10 + $0x70] sm:$0xff]  ;;  %vm624_vm4 = vcmask 130048   ;;  %vm576_vm5 = vcmask 15360   ;;  %s3469_s10 = smov 95  }
  0x94   : > { %737 = vrot.lane.b32.xlu0 %v3727_v13, %s3459_s24  ;;  %385 = vmatprep.subr.mxu0 %v345_v12  ;;  %v329_v30 = vld [vmem:[%s3704_s17 + $0x8] sm:$0xff]  ;;  %v343_v33 = vld [vmem:[#allocation10 + $0x58] sm:$0xff]  ;;  %v337_v37 = vld [vmem:[#allocation10 + $0x28] sm:$0xff]  ;;  %s3470_s11 = smov 127   ;;  %vm770_vm6 = vcmask 785408   ;;  %vm724_vm7 = vcmask 900096  }
  0x95   : > { %691 = vrot.lane.b32.xlu1 %v565_v15, %s3460_s8  ;;  %386 = vmatpush1.msra.mxu0 %v344_v16  ;;  %v340_v34 = vld [vmem:[#allocation10 + $0x40] sm:$0xff]  ;;  %v3748_v36 = vld [vmem:[%s3696_s15 + $0x20] sm:$0xff]  ;;  %v334_v38 = vld [vmem:[#allocation10 + $0x10] sm:$0xff]  ;;  %vm653_vm8 = vcmask 916480   ;;  %vm605_vm9 = vcmask 1031168   ;;  %vm812_vm10 = vcmask 277504  }
  0x96   : > { %387 = vmatprep.subr.mxu0 %v342_v17  ;;  %v3745_v35 = vld [vmem:[%s3696_s15 + $0x28] sm:$0xff]  ;;  %5772 = vst [vmem:[#allocation21_spill] sm:$0xff] %v3748_v36  ;;  %v3758_v40 = vld [vmem:[%s3696_s15 + $0x18] sm:$0xff]  ;;  %v3765_v41 = vld [vmem:[%s3696_s15] sm:$0xff]  ;;  %s3471_s9 = smov 94   ;;  %vm795_vm11 = vcmask 777216  }
  0x97   : > { %388 = vmatpush1.msra.mxu0 %v341_v19  ;;  %v3755_v39 = vld [vmem:[%s3696_s15 + $0x8] sm:$0xff]  ;;  %5774 = vst [vmem:[#allocation23_spill] sm:$0xff] %v3758_v40  ;;  %5775 = vst [vmem:[#allocation24_spill] sm:$0xff] %v3765_v41  ;;  %v3769_v42 = vld [vmem:[%s3696_s15 + $0x10] sm:$0xff]  ;;  %vm549_vm12 = vcmask 1039360   ;;  %vm841_vm13 = vcmask 769024  }
  0x98   : > { %739 = vrot.lane.b32.xlu0 %v3731_v18, %s3459_s24  ;;  %389 = vmatprep.subr.mxu0 %v339_v21  ;;  %5773 = vst [vmem:[#allocation22_spill] sm:$0xff] %v3755_v39  ;;  %s3066_s15 = sshll.u32 %s3692_s23, 5  ;;  %s3082_s16 = sshll.u32 %s3526_s22, 9 }
  0x99   : > { %693 = vrot.lane.b32.xlu1 %v569_v20, %s3460_s8  ;;  %390 = vmatpush1.msra.mxu0 %v338_v22  ;;  %s321_s2 = scalar_lea.vmem [#allocation13], %s3066_s15  ;;  %s5674_s8 = scalar_lea.hbm %s5723_s5, %s3082_s16 }
  0x9a   : > { %391 = vmatprep.subr.mxu0 %v336_v23  ;;  %s2927_s26 = sshll.u32 %s321_s2, 4  ;;  %s3473_s22 = smov [#allocation13]   ;;  %s5669_s26 = int_to_ptr.vmem [resolvable:$true] %s2927_s26 }
  0x9b   : > { %392 = vmatpush1.msra.mxu0 %v335_v24 }
  0x9c   : > { %620 = vrot.lane.b32.xlu0 %v3727_v13, %s3461_s27  ;;  %393 = vmatprep.subr.mxu0 %v333_v25 }
  0x9d   : > { %622 = vrot.lane.b32.xlu1 %v3731_v18, %s3461_s27  ;;  %394 = vmatpush1.msra.mxu0 %v332_v26 }
  0x9e   : > { %3093 = vmatprep.subr.mxu0 %v355_v27  ;;  %3067 = vmatmul.mubr.msk.f32.vlgmr.msra.gmra.mxu0 %vm356_vm0, %v328_v28 }
  0x9f   : > { %3094 = vmatpush3.msra.mxu0 %v355_v27  ;;  %433 = vmatprep.mubr.f32.mxu0 %v5729_v1 }
  0xa0   : > { %3095 = vmatprep.subr.mxu0 %v352_v29  ;;  %572 = vrot.lane.b32.xlu0 %v565_v15, %s3462_s29 }
  0xa1   : > { %574 = vrot.lane.b32.xlu1 %v569_v20, %s3462_s29  ;;  %3096 = vmatpush3.msra.mxu0 %v352_v29  ;;  %s2914_s29 = scalar_lea.sflag [#allocation6], %s3692_s23 }
  0xa2   : > { %3068 = vmatmul.mubr.msk.f32.gmra.mxu0 %vm356_vm0, %v329_v30  ;;  %3097 = vmatprep.subr.mxu0 %v349_v31 }
  0xa3   : > { %3098 = vmatpush3.msra.mxu0 %v349_v31  ;;  %3109 = vmatprep.mubr.msk.f32.mxu0 %vm356_vm0, %v328_v28 }
  0xa4   : > { %3099 = vmatprep.subr.mxu0 %v346_v32  ;;  %808 = vrot.lane.b32.xlu0 %v565_v15, %s3463_s13 }
  0xa5   : > { %810 = vrot.lane.b32.xlu1 %v569_v20, %s3463_s13  ;;  %3100 = vmatpush3.msra.mxu0 %v346_v32  ;;  %s3371_s13 = scalar_lea.vmem %s5669_s26, 512 }
  0xa6   : > { %3101 = vmatprep.subr.mxu0 %v343_v33  ;;  %p3372_p0 = scmp.ne.s32.totalorder %s5669_s26, %s3371_s13 }
  0xa7   : > { %3102 = vmatpush3.msra.mxu0 %v343_v33 }
  0xa8   : > { %3103 = vmatprep.subr.mxu0 %v340_v34  ;;  %972 = vrot.lane.b32.xlu0 %v3748_v36, %s3464_s0  ;;  %p3373_p2 = pnand %p3372_p0, %p3602_p1 }
  0xa9   : > { %974 = vrot.lane.b32.xlu1 %v3745_v35, %s3464_s0  ;;  %3104 = vmatpush3.msra.mxu0 %v340_v34 }
  0xaa   : > { %3105 = vmatprep.subr.mxu0 %v337_v37  ;;  %p3374_p6 = pneg %p3373_p2 }
  0xab   : > { %3106 = vmatpush3.msra.mxu0 %v337_v37 }
  0xac   : > { %3107 = vmatprep.subr.mxu0 %v334_v38  ;;  %970 = vrot.lane.b32.xlu0 %v3758_v40, %s3464_s0 }
  0xad   : > { %966 = vrot.lane.b32.xlu1 %v3755_v39, %s3464_s0  ;;  %3108 = vmatpush3.msra.mxu0 %v334_v38 }
  0xae   : > { %3110 = vmatmul.mubr.msk.f32.vlgmr.msra.gmra.mxu0 %vm356_vm0, %v329_v30 }
  0xb0   : > { %968 = vrot.lane.b32.xlu0 %v3769_v42, %s3464_s0 }
  0xb1   : > { %964 = vrot.lane.b32.xlu1 %v3765_v41, %s3464_s0 }
 0x106   : > { %v3775_v43 = vpop.permute.xlu0 %737 }
 0x107   : > { %v1027_v44 = vmul.f32 %v3775_v43, %v3758_v40  ;;  %v3779_v45 = vpop.permute.xlu1 %691  ;;  %v1024_v50 = vmul.f32 %v3775_v43, %v3765_v41 }
 0x108   : > { %v991_v51 = vmul.f32 %v3779_v45, %v3758_v40  ;;  %v988_v58 = vmul.f32 %v3779_v45, %v3765_v41 }
 0x109   : > { %1042 = vrot.lane.b32.xlu0 %v1027_v44, %s3465_s14 }
 0x10a   : > { %v3782_v46 = vpop.permute.xlu0 %739 }
 0x10b   : > { %v1029_v47 = vmul.f32 %v3782_v46, %v3745_v35  ;;  %v1026_v48 = vmul.f32 %v3782_v46, %v3769_v42  ;;  %v3788_v49 = vpop.permute.xlu1 %693  ;;  %v3847_v12 = vsel %vm741_vm2, %v3775_v43, %v3782_v46 }
 0x10c   : > { %v993_v54 = vmul.f32 %v3788_v49, %v3745_v35  ;;  %v990_v55 = vmul.f32 %v3788_v49, %v3769_v42  ;;  %v1028_v15 = vmul.f32 %v3847_v12, %v3748_v36  ;;  %v3857_v16 = vsel %vm695_vm3, %v3779_v45, %v3788_v49 }
 0x10d   : > { %1046 = vrot.lane.b32.xlu1 %v1029_v47, %s3465_s14  ;;  %1040 = vrot.lane.b32.xlu0 %v1026_v48, %s3465_s14  ;;  %v1025_v17 = vmul.f32 %v3847_v12, %v3755_v39  ;;  %v992_v19 = vmul.f32 %v3857_v16, %v3748_v36  ;;  %v989_v21 = vmul.f32 %v3857_v16, %v3755_v39 }
 0x10e   : > { %v3798_v53 = vpop.permute.xlu0 %620 }
 0x10f   : > { %v3796_v52 = vpop.permute.xlu1 %622  ;;  %v931_v59 = vmul.f32 %v3798_v53, %v3758_v40  ;;  %v928_v4 = vmul.f32 %v3798_v53, %v3765_v41 }
 0x110   : > { %v933_v62 = vmul.f32 %v3796_v52, %v3745_v35  ;;  %v930_v63 = vmul.f32 %v3796_v52, %v3769_v42  ;;  %v3867_v20 = vsel %vm624_vm4, %v3798_v53, %v3796_v52 }
 0x111   : > { %1036 = vrot.lane.b32.xlu1 %v1024_v50, %s3465_s14  ;;  %1006 = vrot.lane.b32.xlu0 %v991_v51, %s3466_s30  ;;  %v932_v22 = vmul.f32 %v3867_v20, %v3748_v36  ;;  %v929_v24 = vmul.f32 %v3867_v20, %v3755_v39 }
 0x112   : > { %v3808_v57 = vpop.permute.xlu0 %572 }
 0x113   : > { %v3806_v56 = vpop.permute.xlu1 %574  ;;  %v895_v5 = vmul.f32 %v3808_v57, %v3758_v40  ;;  %v892_v14 = vmul.f32 %v3808_v57, %v3765_v41 }
 0x114   : > { %v897_v9 = vmul.f32 %v3806_v56, %v3745_v35  ;;  %v894_v10 = vmul.f32 %v3806_v56, %v3769_v42  ;;  %v3877_v23 = vsel %vm576_vm5, %v3808_v57, %v3806_v56 }
 0x115   : > { %1010 = vrot.lane.b32.xlu1 %v993_v54, %s3466_s30  ;;  %1004 = vrot.lane.b32.xlu0 %v990_v55, %s3466_s30  ;;  %v896_v25 = vmul.f32 %v3877_v23, %v3748_v36  ;;  %v893_v26 = vmul.f32 %v3877_v23, %v3755_v39 }
 0x116   : > { %v3816_v60 = vpop.permute.xlu0 %808 }
 0x117   : > { %v3818_v61 = vpop.permute.xlu1 %810 }
 0x119   : > { %1000 = vrot.lane.b32.xlu1 %v988_v58, %s3466_s30  ;;  %946 = vrot.lane.b32.xlu0 %v931_v59, %s3467_s12 }
 0x11a   : > { %v973_v3 = vpop.permute.xlu0 %972 }
 0x11b   : > { %v975_v0 = vpop.permute.xlu1 %974 }
 0x11c   : > { %v3833_v7 = vsel %vm678_vm1, %v973_v3, %v975_v0 }
 0x11d   : > { %950 = vrot.lane.b32.xlu1 %v933_v62, %s3467_s12  ;;  %944 = vrot.lane.b32.xlu0 %v930_v63, %s3467_s12  ;;  %5776 = vst [vmem:[#allocation25_spill] sm:$0xff] %v3833_v7 }
 0x11e   : > { %v971_v8 = vpop.permute.xlu0 %970 }
 0x11f   : > { %v3842_v11 = vsel %vm678_vm1, %v971_v8, %v973_v3  ;;  %v3921_v34 = vpop.permute.xlu1 %966 }
 0x120   : > { %5777 = vst [vmem:[#allocation26_spill] sm:$0xff] %v3842_v11 }
 0x121   : > { %940 = vrot.lane.b32.xlu1 %v928_v4, %s3467_s12  ;;  %910 = vrot.lane.b32.xlu0 %v895_v5, %s3468_s3 }
 0x122   : > { %v3925_v37 = vpop.permute.xlu0 %968 }
 0x125   : > { %914 = vrot.lane.b32.xlu1 %v897_v9, %s3468_s3  ;;  %908 = vrot.lane.b32.xlu0 %v894_v10, %s3468_s3 }
 0x129   : > { %904 = vrot.lane.b32.xlu1 %v892_v14, %s3468_s3  ;;  %1044 = vrot.lane.b32.xlu0 %v1028_v15, %s3465_s14 }
 0x12d   : > { %1038 = vrot.lane.b32.xlu1 %v1025_v17, %s3465_s14  ;;  %1008 = vrot.lane.b32.xlu0 %v992_v19, %s3466_s30 }
 0x131   : > { %1002 = vrot.lane.b32.xlu1 %v989_v21, %s3466_s30  ;;  %948 = vrot.lane.b32.xlu0 %v932_v22, %s3467_s12 }
 0x135   : > { %942 = vrot.lane.b32.xlu1 %v929_v24, %s3467_s12  ;;  %912 = vrot.lane.b32.xlu0 %v896_v25, %s3468_s3 }
 0x139   : > { %906 = vrot.lane.b32.xlu1 %v893_v26, %s3468_s3 }
 0x15e   : > { %v3890_v27 = vpop.f32.mrf.mxu0 }
 0x15f   : > { %783 = vrot.lane.b32.xlu1 %v3890_v27, %s3469_s10  ;;  %v746_v30 = vmul.f32 %v3775_v43, %v3890_v27  ;;  %v700_v33 = vmul.f32 %v3779_v45, %v3890_v27  ;;  %v629_v44 = vmul.f32 %v3798_v53, %v3890_v27 }
 0x160   : > { %v3894_v28 = vpop.f32.mrf.mxu0 }
 0x161   : > { %v701_v63 = vmul.f32 %v3857_v16, %v3894_v28  ;;  %v630_v5 = vmul.f32 %v3867_v20, %v3894_v28 }
 0x162   : > { %v3896_v29 = vpop.f32.mrf.mxu0 }
 0x163   : > { %789 = vrot.lane.b32.xlu0 %v3896_v29, %s3469_s10  ;;  %666 = vrot.lane.b32.xlu1 %v3890_v27, %s3464_s0  ;;  %v749_v32 = vmul.f32 %v3775_v43, %v3896_v29  ;;  %v703_v38 = vmul.f32 %v3779_v45, %v3896_v29  ;;  %v3932_v43 = vpop.permute.xlu1 %964  ;;  %v632_v48 = vmul.f32 %v3798_v53, %v3896_v29 }
 0x164   : > { %v3912_v31 = vpop.f32.mrf.mxu0  ;;  %v581_v45 = vmul.f32 %v3808_v57, %v3890_v27  ;;  %v584_v54 = vmul.f32 %v3808_v57, %v3896_v29  ;;  %v747_v53 = vmul.f32 %v3847_v12, %v3894_v28 }
 0x165   : > { %v750_v57 = vmul.f32 %v3847_v12, %v3912_v31  ;;  %v704_v4 = vmul.f32 %v3857_v16, %v3912_v31  ;;  %v633_v10 = vmul.f32 %v3867_v20, %v3912_v31  ;;  %v582_v12 = vmul.f32 %v3877_v23, %v3894_v28 }
 0x166   : > { %v585_v17 = vmul.f32 %v3877_v23, %v3912_v31 }
 0x167   : > { %672 = vrot.lane.b32.xlu0 %v3896_v29, %s3464_s0  ;;  %537 = vrot.lane.b32.xlu1 %v3890_v27, %s3470_s11 }
 0x16b   : > { %543 = vrot.lane.b32.xlu0 %v3896_v29, %s3470_s11  ;;  %785 = vrot.lane.b32.xlu1 %v3894_v28, %s3469_s10 }
 0x16e   : > { %v3973_v16 = vpop.f32.mrf.mxu0 }
 0x16f   : > { %791 = vrot.lane.b32.xlu0 %v3912_v31, %s3469_s10  ;;  %758 = vrot.lane.b32.xlu1 %v746_v30, %s3465_s14 }
 0x170   : > { %v3980_v20 = vpop.f32.mrf.mxu0 }
 0x173   : > { %764 = vrot.lane.b32.xlu0 %v749_v32, %s3465_s14  ;;  %712 = vrot.lane.b32.xlu1 %v700_v33, %s3466_s30 }
 0x177   : > { %718 = vrot.lane.b32.xlu0 %v703_v38, %s3466_s30  ;;  %668 = vrot.lane.b32.xlu1 %v3894_v28, %s3464_s0 }
 0x17b   : > { %v1043_v47 = vpop.permute.xlu0 %1042  ;;  %674 = vrot.lane.b32.xlu0 %v3912_v31, %s3464_s0  ;;  %641 = vrot.lane.b32.xlu1 %v629_v44, %s3467_s12 }
 0x17f   : > { %v1047_v50 = vpop.permute.xlu1 %1046  ;;  %v1041_v51 = vpop.permute.xlu0 %1040  ;;  %647 = vrot.lane.b32.xlu0 %v632_v48, %s3467_s12  ;;  %593 = vrot.lane.b32.xlu1 %v581_v45, %s3468_s3 }
 0x183   : > { %v1037_v55 = vpop.permute.xlu1 %1036  ;;  %v1007_v58 = vpop.permute.xlu0 %1006  ;;  %599 = vrot.lane.b32.xlu0 %v584_v54, %s3468_s3  ;;  %539 = vrot.lane.b32.xlu1 %v3894_v28, %s3470_s11 }
 0x187   : > { %v1011_v59 = vpop.permute.xlu1 %1010  ;;  %v1005_v62 = vpop.permute.xlu0 %1004  ;;  %545 = vrot.lane.b32.xlu0 %v3912_v31, %s3470_s11  ;;  %760 = vrot.lane.b32.xlu1 %v747_v53, %s3465_s14  ;;  %v705_v53 = vmul.f32 %v3973_v16, %v3788_v49 }
 0x18b   : > { %v1001_v0 = vpop.permute.xlu1 %1000  ;;  %v947_v3 = vpop.permute.xlu0 %946  ;;  %766 = vrot.lane.b32.xlu0 %v750_v57, %s3465_s14  ;;  %714 = vrot.lane.b32.xlu1 %v701_v63, %s3466_s30 }
 0x18f   : > { %v951_v8 = vpop.permute.xlu1 %950  ;;  %v945_v9 = vpop.permute.xlu0 %944  ;;  %720 = vrot.lane.b32.xlu0 %v704_v4, %s3466_s30  ;;  %643 = vrot.lane.b32.xlu1 %v630_v5, %s3467_s12  ;;  %v634_v4 = vmul.f32 %v3973_v16, %v3796_v52 }
 0x193   : > { %v941_v14 = vpop.permute.xlu1 %940  ;;  %v911_v15 = vpop.permute.xlu0 %910  ;;  %649 = vrot.lane.b32.xlu0 %v633_v10, %s3467_s12  ;;  %595 = vrot.lane.b32.xlu1 %v582_v12, %s3468_s3  ;;  %v586_v10 = vmul.f32 %v3973_v16, %v3806_v56  ;;  %v583_v12 = vmul.f32 %v3806_v56, %v3980_v20  ;;  %v813_v56 = vsel %vm812_vm10, %v3816_v60, %v3818_v61 }
 0x197   : > { %v915_v19 = vpop.permute.xlu1 %914  ;;  %v909_v21 = vpop.permute.xlu0 %908  ;;  %601 = vrot.lane.b32.xlu0 %v585_v17, %s3468_s3  ;;  %793 = vrot.lane.b32.xlu1 %v3973_v16, %s3469_s10  ;;  %v1087_v17 = vmul.f32 %v3816_v60, %v3758_v40 }
 0x19b   : > { %v905_v22 = vpop.permute.xlu1 %904  ;;  %v1045_v24 = vpop.permute.xlu0 %1044  ;;  %787 = vrot.lane.b32.xlu0 %v3980_v20, %s3469_s10  ;;  %676 = vrot.lane.b32.xlu1 %v3973_v16, %s3464_s0 }
 0x19c   : > { %v3987_v23 = vsel %vm770_vm6, %v1043_v47, %v1045_v24  ;;  %v3990_v25 = vsel %vm770_vm6, %v1045_v24, %v1047_v50  ;;  %v751_v47 = vmul.f32 %v3973_v16, %v3782_v46  ;;  %v821_v24 = vmul.f32 %v813_v56, %v3912_v31 }
 0x19f   : > { %v1039_v26 = vpop.permute.xlu1 %1038  ;;  %v1009_v30 = vpop.permute.xlu0 %1008  ;;  %670 = vrot.lane.b32.xlu0 %v3980_v20, %s3464_s0  ;;  %547 = vrot.lane.b32.xlu1 %v3973_v16, %s3470_s11  ;;  %s3375_s0 = sshll.u32 %s3473_s22, 4  ;;  %s3376_s0 = int_to_ptr.vmem [resolvable:$false] %s3375_s0 }
 0x1a0   : > { %v3997_v32 = vsel %vm770_vm6, %v1037_v55, %v1039_v26  ;;  %v4000_v33 = vsel %vm724_vm7, %v1007_v58, %v1009_v30  ;;  %v4003_v38 = vsel %vm770_vm6, %v1039_v26, %v1041_v51  ;;  %v4006_v44 = vsel %vm724_vm7, %v1009_v30, %v1011_v59  ;;  %p3378_p9 = scmp.lt.s32.totalorder %s5669_s26, %s3376_s0 }
 0x1a1   : > { %v748_v58 = vmul.f32 %v3782_v46, %v3980_v20 }
 0x1a3   : > { %v1003_v48 = vpop.permute.xlu1 %1002  ;;  %v949_v45 = vpop.permute.xlu0 %948  ;;  %541 = vrot.lane.b32.xlu0 %v3980_v20, %s3470_s11  ;;  %768 = vrot.lane.b32.xlu1 %v751_v47, %s3465_s14  ;;  %v820_v47 = vmul.f32 %v3816_v60, %v3896_v29 }
 0x1a4   : > { %v4014_v50 = vsel %vm724_vm7, %v1001_v0, %v1003_v48  ;;  %v4017_v51 = vsel %vm653_vm8, %v947_v3, %v949_v45  ;;  %v4020_v54 = vsel %vm724_vm7, %v1003_v48, %v1005_v62  ;;  %v4023_v55 = vsel %vm653_vm8, %v949_v45, %v951_v8  ;;  %v1121_v48 = vld [vmem:[#allocation9 + $0x8] sm:$0x1f] }
 0x1a5   : > { %v702_v3 = vmul.f32 %v3788_v49, %v3980_v20  ;;  %v631_v49 = vmul.f32 %v3796_v52, %v3980_v20  ;;  %v1089_v52 = vmul.f32 %v3818_v61, %v3745_v35  ;;  %1262 = vmatprep.mubr.f32.mxu0 %v1121_v48 }
 0x1a7   : > { %v943_v59 = vpop.permute.xlu1 %942  ;;  %v913_v57 = vpop.permute.xlu0 %912  ;;  %762 = vrot.lane.b32.xlu0 %v748_v58, %s3465_s14  ;;  %722 = vrot.lane.b32.xlu1 %v705_v53, %s3466_s30  ;;  %v818_v58 = vmul.f32 %v813_v56, %v3894_v28  ;;  %v819_v53 = vmul.f32 %v3818_v61, %v3980_v20  ;;  %s3377_s14 = scalar_lea.vmem %s3376_s0, 1024 }
 0x1a8   : > { %v4032_v63 = vsel %vm653_vm8, %v941_v14, %v943_v59  ;;  %v4035_v62 = vsel %vm605_vm9, %v911_v15, %v913_v57  ;;  %v4038_v0 = vsel %vm653_vm8, %v943_v59, %v945_v9  ;;  %v4041_v46 = vsel %vm605_vm9, %v913_v57, %v915_v19  ;;  %p3379_p8 = scmp.lt.s32.totalorder %s3377_s14, %s3371_s13 }
 0x1a9   : > { %5778 = vst [vmem:[#allocation27_spill] sm:$0xff] %v4035_v62  ;;  %v1088_v14 = vmul.f32 %v813_v56, %v3748_v36  ;;  %v1085_v15 = vmul.f32 %v813_v56, %v3755_v39  ;;  %v1084_v19 = vmul.f32 %v3816_v60, %v3765_v41 }
 0x1aa   : > { %p3380_p3 = por %p3379_p8, %p3378_p9 }
 0x1ab   : > { %v907_v5 = vpop.permute.xlu1 %906  ;;  %716 = vrot.lane.b32.xlu0 %v702_v3, %s3466_s30  ;;  %651 = vrot.lane.b32.xlu1 %v634_v4, %s3467_s12  ;;  %v817_v4 = vmul.f32 %v3816_v60, %v3890_v27 }
 0x1ac   : > { %v4050_v8 = vsel %vm605_vm9, %v905_v22, %v907_v5  ;;  %v4053_v9 = vsel %vm605_vm9, %v907_v5, %v909_v21  ;;  %v1086_v21 = vmul.f32 %v3818_v61, %v3769_v42  ;;  %v822_v22 = vmul.f32 %v3973_v16, %v3818_v61  ;;  %p3381_p5 = pnand %p3380_p3, %p3374_p6 }
 0x1ad   : > { %5779 = vst [vmem:[#allocation28_spill] sm:$0xff] %v4050_v8  ;;  %5780 = vst [vmem:[#allocation29_spill] sm:$0xff] %v4053_v9 }
 0x1af   : > { %876 = vrot.lane.b32.xlu0 %v3748_v36, %s3470_s11  ;;  %603 = vrot.lane.b32.xlu1 %v586_v10, %s3468_s3 }
 0x1b3   : > { %645 = vrot.lane.b32.xlu0 %v631_v49, %s3467_s12  ;;  %878 = vrot.lane.b32.xlu1 %v3745_v35, %s3470_s11 }
 0x1b7   : > { %597 = vrot.lane.b32.xlu0 %v583_v12, %s3468_s3  ;;  %870 = vrot.lane.b32.xlu1 %v3755_v39, %s3470_s11 }
 0x1bb   : > { %874 = vrot.lane.b32.xlu0 %v3758_v40, %s3470_s11  ;;  %868 = vrot.lane.b32.xlu1 %v3765_v41, %s3470_s11 }
 0x1bf   : > { %872 = vrot.lane.b32.xlu0 %v3769_v42, %s3470_s11  ;;  %1106 = vrot.lane.b32.xlu1 %v1089_v52, %s3471_s9 }
 0x1c3   : > { %1104 = vrot.lane.b32.xlu0 %v1088_v14, %s3471_s9  ;;  %1098 = vrot.lane.b32.xlu1 %v1085_v15, %s3471_s9 }
 0x1c7   : > { %1102 = vrot.lane.b32.xlu0 %v1087_v17, %s3471_s9  ;;  %1096 = vrot.lane.b32.xlu1 %v1084_v19, %s3471_s9 }
 0x1cb   : > { %1100 = vrot.lane.b32.xlu0 %v1086_v21, %s3471_s9  ;;  %839 = vrot.lane.b32.xlu1 %v822_v22, %s3471_s9 }
 0x1cf   : > { %837 = vrot.lane.b32.xlu0 %v821_v24, %s3471_s9  ;;  %1070 = vrot.lane.b32.xlu1 %v3745_v35, %s3469_s10 }
 0x1d1   : > { %v784_v26 = vpop.permute.xlu1 %783 }
 0x1d3   : > { %1068 = vrot.lane.b32.xlu0 %v3748_v36, %s3469_s10  ;;  %1066 = vrot.lane.b32.xlu1 %v3758_v40, %s3469_s10 }
 0x1d5   : > { %v790_v30 = vpop.permute.xlu0 %789  ;;  %v4105_v16 = vpop.permute.xlu1 %666 }
 0x1d7   : > { %835 = vrot.lane.b32.xlu0 %v820_v47, %s3471_s9  ;;  %1064 = vrot.lane.b32.xlu1 %v3769_v42, %s3469_s10 }
 0x1d9   : > { %v4112_v35 = vpop.permute.xlu0 %672  ;;  %v4114_v45 = vpop.permute.xlu1 %537 }
 0x1db   : > { %831 = vrot.lane.b32.xlu0 %v818_v58, %s3471_s9  ;;  %833 = vrot.lane.b32.xlu1 %v819_v53, %s3471_s9 }
 0x1dd   : > { %v4121_v59 = vpop.permute.xlu0 %543  ;;  %v786_v57 = vpop.permute.xlu1 %785 }
 0x1df   : > { %1062 = vrot.lane.b32.xlu0 %v3755_v39, %s3469_s10  ;;  %1060 = vrot.lane.b32.xlu1 %v3765_v41, %s3469_s10  ;;  %v796_v39 = vsel %vm795_vm11, %v784_v26, %v786_v57 }
 0x1e1   : > { %v792_v42 = vpop.permute.xlu0 %791  ;;  %v759_v3 = vpop.permute.xlu1 %758 }
 0x1e2   : > { %v798_v1 = vsel %vm795_vm11, %v790_v30, %v792_v42 }
 0x1e3   : > { %829 = vrot.lane.b32.xlu0 %v817_v4, %s3471_s9 }
 0x1e5   : > { %v765_v61 = vpop.permute.xlu0 %764  ;;  %v713_v20 = vpop.permute.xlu1 %712 }
 0x1e9   : > { %v719_v5 = vpop.permute.xlu0 %718  ;;  %v669_v10 = vpop.permute.xlu1 %668 }
 0x1ed   : > { %v675_v49 = vpop.permute.xlu0 %674  ;;  %v4130_v12 = vpop.permute.xlu1 %641 }
 0x1f1   : > { %v648_v52 = vpop.permute.xlu0 %647  ;;  %v4132_v56 = vpop.permute.xlu1 %593 }
 0x1f5   : > { %v4134_v14 = vpop.permute.xlu0 %599  ;;  %v4136_v15 = vpop.permute.xlu1 %539 }
 0x1f9   : > { %v4138_v17 = vpop.permute.xlu0 %545  ;;  %v761_v19 = vpop.permute.xlu1 %760 }
 0x1fd   : > { %v767_v60 = vpop.permute.xlu0 %766  ;;  %v715_v21 = vpop.permute.xlu1 %714 }
 0x201   : > { %v721_v22 = vpop.permute.xlu0 %720  ;;  %v644_v24 = vpop.permute.xlu1 %643 }
 0x205   : > { %v650_v47 = vpop.permute.xlu0 %649  ;;  %v4140_v48 = vpop.permute.xlu1 %595 }
 0x209   : > { %v602_v58 = vpop.permute.xlu0 %601  ;;  %v794_v53 = vpop.permute.xlu1 %793 }
 0x20a   : > { %v799_v4 = vsel %vm795_vm11, %v792_v42, %v794_v53  ;;  %v773_v53 = vsel %vm770_vm6, %v765_v61, %v767_v60 }
 0x20b   : > { %1198 = vmatprep.subr.mxu0 %v799_v4 }
 0x20c   : > { %1199 = vmatpush1.msra.mxu0 %v798_v1 }
 0x20d   : > { %v788_v6 = vpop.permute.xlu0 %787  ;;  %v677_v2 = vpop.permute.xlu1 %676 }
 0x20e   : > { %v797_v41 = vsel %vm795_vm11, %v786_v57, %v788_v6  ;;  %v771_v6 = vsel %vm770_vm6, %v759_v3, %v761_v19  ;;  %v682_v61 = vsel %vm678_vm1, %v675_v49, %v677_v2  ;;  %v681_v3 = vsel %vm678_vm1, %v4112_v35, %v675_v49 }
 0x20f   : > { %1200 = vmatprep.subr.mxu0 %v797_v41  ;;  %v727_v41 = vsel %vm724_vm7, %v719_v5, %v721_v22  ;;  %v654_v49 = vsel %vm653_vm8, %v4130_v12, %v644_v24  ;;  %v606_v12 = vsel %vm605_vm9, %v4132_v56, %v4140_v48  ;;  %v550_v56 = vsel %vm549_vm12, %v4114_v45, %v4136_v15 }
 0x210   : > { %1201 = vmatpush1.msra.mxu0 %v796_v39 }
 0x211   : > { %v671_v40 = vpop.permute.xlu0 %670  ;;  %v548_v36 = vpop.permute.xlu1 %547 }
 0x212   : > { %v680_v5 = vsel %vm678_vm1, %v669_v10, %v671_v40 }
 0x215   : > { %v542_v8 = vpop.permute.xlu0 %541  ;;  %v769_v9 = vpop.permute.xlu1 %768 }
 0x216   : > { %v774_v62 = vsel %vm770_vm6, %v767_v60, %v769_v9 }
 0x217   : > { %1202 = vmatprep.subr.mxu0 %v774_v62  ;;  %v725_v62 = vsel %vm724_vm7, %v713_v20, %v715_v21 }
 0x218   : > { %1203 = vmatpush1.msra.mxu0 %v773_v53 }
 0x219   : > { %v763_v30 = vpop.permute.xlu0 %762  ;;  %v723_v1 = vpop.permute.xlu1 %722 }
 0x21a   : > { %v772_v42 = vsel %vm770_vm6, %v761_v19, %v763_v30  ;;  %v728_v39 = vsel %vm724_vm7, %v721_v22, %v723_v1  ;;  %v679_v22 = vsel %vm678_vm1, %v4105_v16, %v669_v10  ;;  %v608_v16 = vsel %vm605_vm9, %v4134_v14, %v602_v58 }
 0x21b   : > { %1204 = vmatprep.subr.mxu0 %v772_v42  ;;  %v552_v14 = vsel %vm549_vm12, %v4121_v59, %v4138_v17  ;;  %v551_v30 = vsel %vm549_vm12, %v4136_v15, %v542_v8  ;;  %v525_v59 = vmul.f32 %v3727_v13, %v3896_v29  ;;  %v524_v1 = vmul.f32 %v3731_v18, %v3894_v28 }
 0x21c   : > { %1205 = vmatpush1.msra.mxu0 %v771_v6  ;;  %v523_v8 = vmul.f32 %v3727_v13, %v3890_v27 }
 0x21d   : > { %v717_v26 = vpop.permute.xlu0 %716  ;;  %1206 = vmatprep.subr.mxu0 %v728_v39  ;;  %v652_v57 = vpop.permute.xlu1 %651  ;;  %v5783_v39 = vld [vmem:[#allocation29_spill] sm:$0xff] }
 0x21e   : > { %1207 = vmatpush1.msra.mxu0 %v727_v41  ;;  %v726_v9 = vsel %vm724_vm7, %v715_v21, %v717_v26  ;;  %v657_v20 = vsel %vm653_vm8, %v650_v47, %v652_v57  ;;  %v656_v21 = vsel %vm653_vm8, %v648_v52, %v650_v47  ;;  %v5785_v41 = vld [vmem:[#allocation21_spill] sm:$0xff] }
 0x21f   : > { %1208 = vmatprep.subr.mxu0 %v726_v9  ;;  %v857_v26 = vmul.f32 %v3731_v18, %v5785_v41  ;;  %v5786_v9 = vld [vmem:[#allocation23_spill] sm:$0xff] }
 0x220   : > { %1209 = vmatpush1.msra.mxu0 %v725_v62  ;;  %v856_v62 = vmul.f32 %v3727_v13, %v5786_v9 }
 0x221   : > { %v4157_v19 = vpop.permute.xlu0 %876  ;;  %1210 = vmatprep.subr.mxu0 %v682_v61  ;;  %v604_v60 = vpop.permute.xlu1 %603 }
 0x222   : > { %1211 = vmatpush1.msra.mxu0 %v681_v3  ;;  %v609_v40 = vsel %vm605_vm9, %v602_v58, %v604_v60  ;;  %v5787_v3 = vld [vmem:[#allocation22_spill] sm:$0xff]  ;;  %v5788_v60 = vld [vmem:[#allocation24_spill] sm:$0xff] }
 0x223   : > { %1212 = vmatprep.subr.mxu0 %v680_v5  ;;  %v854_v5 = vmul.f32 %v3727_v13, %v5788_v60 }
 0x224   : > { %1213 = vmatpush1.msra.mxu0 %v679_v22 }
 0x225   : > { %v646_v2 = vpop.permute.xlu0 %645  ;;  %1214 = vmatprep.subr.mxu0 %v657_v20  ;;  %v4164_v4 = vpop.permute.xlu1 %878 }
 0x226   : > { %1215 = vmatpush1.msra.mxu0 %v656_v21  ;;  %v655_v35 = vsel %vm653_vm8, %v644_v24, %v646_v2  ;;  %v553_v24 = vsel %vm549_vm12, %v4138_v17, %v548_v36  ;;  %v526_v36 = vmul.f32 %v3731_v18, %v3912_v31 }
 0x227   : > { %1216 = vmatprep.subr.mxu0 %v655_v35 }
 0x228   : > { %1217 = vmatpush1.msra.mxu0 %v654_v49 }
 0x229   : > { %v598_v10 = vpop.permute.xlu0 %597  ;;  %1218 = vmatprep.subr.mxu0 %v609_v40  ;;  %v4172_v52 = vpop.permute.xlu1 %870  ;;  %v1122_v40 = vld [vmem:[#allocation9 + $0x10] sm:$0x1f] }
 0x22a   : > { %1219 = vmatpush1.msra.mxu0 %v608_v16  ;;  %v607_v47 = vsel %vm605_vm9, %v4140_v48, %v598_v10  ;;  %v1120_v10 = vld [vmem:[#allocation9] sm:$0x1f] }
 0x22b   : > { %1220 = vmatprep.subr.mxu0 %v607_v47  ;;  %v5789_v47 = vmov 0.0  }
 0x22c   : > { %1221 = vmatpush1.msra.mxu0 %v606_v12 }
 0x22d   : > { %v4184_v58 = vpop.permute.xlu0 %874  ;;  %1222 = vmatprep.subr.mxu0 %v553_v24  ;;  %v4186_v53 = vpop.permute.xlu1 %868 }
 0x22e   : > { %1223 = vmatpush1.msra.mxu0 %v552_v14  ;;  %v880_v61 = vsel %vm549_vm12, %v4186_v53, %v4172_v52 }
 0x22f   : > { %1224 = vmatprep.subr.mxu0 %v551_v30 }
 0x230   : > { %1225 = vmatpush1.msra.mxu0 %v550_v56 }
 0x231   : > { %v873_v17 = vpop.permute.xlu0 %872  ;;  %1226 = vmatprep.subr.mxu0 %v526_v36  ;;  %v1107_v48 = vpop.permute.xlu1 %1106 }
 0x232   : > { %1227 = vmatpush1.msra.mxu0 %v525_v59  ;;  %v881_v57 = vsel %vm549_vm12, %v4172_v52, %v873_v17  ;;  %v5792_v59 = vld [vmem:[#allocation19_spill] sm:$0xff] }
 0x233   : > { %1228 = vmatprep.subr.mxu0 %v524_v1  ;;  %v4271_v17 = vsub.s32 1, %v5792_v59  ;;  %v3233_v1 = vld [vmem:[#allocation12] sm:$0xff]  ;;  %v4322_v41 = vadd.s32 88, %v5792_v59  ;;  %v4332_v60 = vadd.s32 72, %v5792_v59 }
 0x234   : > { %1229 = vmatpush1.msra.mxu0 %v523_v8 }
 0x235   : > { %v1105_v45 = vpop.permute.xlu0 %1104  ;;  %1230 = vmatprep.subr.mxu0 %v3990_v25  ;;  %v1099_v31 = vpop.permute.xlu1 %1098  ;;  %5794 = vst [vmem:[#allocation21_spill] sm:$0xff] %v4332_v60 }
 0x236   : > { %1231 = vmatpush2.msra.mxu0 %v3987_v23  ;;  %v1111_v29 = vsel %vm841_vm13, %v1105_v45, %v1107_v48  ;;  %v4274_v48 = vsub.s32 0, %v5792_v59 }
 0x237   : > { %1232 = vmatprep.subr.mxu0 %v4003_v38  ;;  %1293 = vmatprep.subr.mxu1 %v1111_v29  ;;  %v4222_v38 = vsel %vm678_vm1, %v3932_v43, %v3921_v34  ;;  %v4280_v29 = vsub.s32 2, %v5792_v59 }
 0x238   : > { %1233 = vmatpush2.msra.mxu0 %v3997_v32  ;;  %v4216_v32 = vsel %vm678_vm1, %v3921_v34, %v3925_v37  ;;  %5781 = vst [vmem:[#allocation30_spill] sm:$0xff] %v4222_v38 }
 0x239   : > { %v1103_v28 = vpop.permute.xlu0 %1102  ;;  %1234 = vmatprep.subr.mxu0 %v4006_v44  ;;  %v1097_v27 = vpop.permute.xlu1 %1096 }
 0x23a   : > { %1235 = vmatpush2.msra.mxu0 %v4000_v33  ;;  %v1110_v15 = vsel %vm841_vm13, %v1103_v28, %v1105_v45  ;;  %v1108_v44 = vsel %vm841_vm13, %v1097_v27, %v1099_v31 }
 0x23b   : > { %1236 = vmatprep.subr.mxu0 %v4020_v54  ;;  %1294 = vmatpush1.msra.mxu1 %v1110_v15  ;;  %v5782_v54 = vld [vmem:[#allocation27_spill] sm:$0xff]  ;;  %v4285_v15 = vadd.s32 56, %v5792_v59 }
 0x23c   : > { %1237 = vmatpush2.msra.mxu0 %v4014_v50 }
 0x23d   : > { %v1101_v23 = vpop.permute.xlu0 %1100  ;;  %1238 = vmatprep.subr.mxu0 %v3833_v7  ;;  %v840_v25 = vpop.permute.xlu1 %839 }
 0x23e   : > { %1239 = vmatpush2.msra.mxu0 %v3842_v11  ;;  %v1109_v33 = vsel %vm841_vm13, %v1099_v31, %v1101_v23  ;;  %v4277_v31 = vsub.s32 3, %v5792_v59  ;;  %v4288_v23 = vadd.s32 48, %v5792_v59 }
 0x23f   : > { %1240 = vmatprep.subr.mxu0 %v4216_v32  ;;  %1295 = vmatprep.subr.mxu1 %v1109_v33 }
 0x240   : > { %1241 = vmatpush2.msra.mxu0 %v4222_v38  ;;  %1296 = vmatpush1.msra.mxu1 %v1108_v44  ;;  %v4291_v44 = vadd.s32 40, %v5792_v59 }
 0x241   : > { %v838_v50 = vpop.permute.xlu0 %837  ;;  %1242 = vmatprep.subr.mxu0 %v4023_v55  ;;  %v1071_v37 = vpop.permute.xlu1 %1070  ;;  %v5784_v55 = vld [vmem:[#allocation28_spill] sm:$0xff] }
 0x242   : > { %1243 = vmatpush2.msra.mxu0 %v4017_v51  ;;  %v883_v51 = vsel %vm549_vm12, %v4157_v19, %v4164_v4  ;;  %v845_v21 = vsel %vm841_vm13, %v838_v50, %v840_v25 }
 0x243   : > { %1244 = vmatprep.subr.mxu0 %v4038_v0 }
 0x244   : > { %1245 = vmatpush2.msra.mxu0 %v4032_v63  ;;  %v882_v63 = vsel %vm549_vm12, %v4184_v58, %v4157_v19  ;;  %v855_v19 = vmul.f32 %v3731_v18, %v5787_v3 }
 0x245   : > { %v1069_v34 = vpop.permute.xlu0 %1068  ;;  %1246 = vmatprep.subr.mxu0 %v4041_v46  ;;  %v1067_v43 = vpop.permute.xlu1 %1066 }
 0x246   : > { %1247 = vmatpush2.msra.mxu0 %v5782_v54  ;;  %v1075_v42 = vsel %vm795_vm11, %v1069_v34, %v1071_v37  ;;  %v1074_v6 = vsel %vm795_vm11, %v1067_v43, %v1069_v34  ;;  %v3234_v37 = vld [vmem:[#allocation12 + $0x8] sm:$0xff]  ;;  %v4301_v54 = vadd.s32 24, %v5792_v59 }
 0x247   : > { %1248 = vmatprep.subr.mxu0 %v5783_v39  ;;  %1297 = vmatprep.subr.mxu1 %v1075_v42  ;;  %v4304_v42 = vadd.s32 16, %v5792_v59 }
 0x248   : > { %1249 = vmatpush2.msra.mxu0 %v5784_v55  ;;  %1298 = vmatpush1.msra.mxu1 %v1074_v6  ;;  %v4307_v55 = vadd.s32 8, %v5792_v59 }
 0x249   : > { %v836_v0 = vpop.permute.xlu0 %835  ;;  %1250 = vmatprep.subr.mxu0 %v883_v51  ;;  %v1065_v46 = vpop.permute.xlu1 %1064  ;;  %v4310_v51 = vadd.s32 120, %v5792_v59 }
 0x24a   : > { %1251 = vmatpush2.msra.mxu0 %v882_v63  ;;  %v844_v2 = vsel %vm841_vm13, %v836_v0, %v838_v50  ;;  %v4294_v50 = vadd.s32 32, %v5792_v59  ;;  %v4313_v63 = vadd.s32 112, %v5792_v59  ;;  %v4316_v0 = vadd.s32 104, %v5792_v59 }
 0x24b   : > { %1252 = vmatprep.subr.mxu0 %v881_v57 }
 0x24c   : > { %1253 = vmatpush2.msra.mxu0 %v880_v61 }
 0x24d   : > { %v832_v22 = vpop.permute.xlu0 %831  ;;  %1254 = vmatprep.subr.mxu0 %v857_v26  ;;  %v834_v20 = vpop.permute.xlu1 %833 }
 0x24e   : > { %1255 = vmatpush2.msra.mxu0 %v856_v62  ;;  %v843_v18 = vsel %vm841_vm13, %v832_v22, %v834_v20  ;;  %v4325_v62 = vadd.s32 80, %v5792_v59 }
 0x24f   : > { %1256 = vmatprep.subr.mxu0 %v855_v19 }
 0x250   : > { %1257 = vmatpush2.msra.mxu0 %v854_v5  ;;  %5793 = vst [vmem:[#allocation28_spill] sm:$0xff] %v4325_v62 }
 0x251   : > { %v1063_v4 = vpop.permute.xlu0 %1062  ;;  %v1061_v35 = vpop.permute.xlu1 %1060  ;;  %1258 = vmatprep.subr.mxu0 %v845_v21 }
 0x252   : > { %1259 = vmatpush2.msra.mxu0 %v844_v2  ;;  %v1073_v49 = vsel %vm795_vm11, %v1063_v4, %v1065_v46  ;;  %v1072_v13 = vsel %vm795_vm11, %v1061_v35, %v1063_v4  ;;  %v4319_v46 = vadd.s32 96, %v5792_v59 }
 0x253   : > { %1260 = vmatprep.subr.mxu0 %v843_v18  ;;  %1299 = vmatprep.subr.mxu1 %v1073_v49 }
 0x254   : > { %1300 = vmatpush1.msra.mxu1 %v1072_v13 }
 0x255   : > { %v830_v16 = vpop.permute.xlu0 %829  ;;  %3071 = vmatmul.mubr.msk.f32.vlgmr.msra.gmra.mxu1 %vm741_vm2, %v1122_v40 }
 0x256   : > { %v842_v52 = vsel %vm841_vm13, %v830_v16, %v832_v22  ;;  %1811 = vmatprep.mubr.f32.mxu1 %v5789_v47  ;;  %v5739_v22 = vmov 0  }
 0x257   : > { %1261 = vmatpush2.msra.mxu0 %v842_v52 }
 0x258   : > { %1263 = vmatmul.mubr.f32.vlgmr.msra.gmra.mxu0 %v1120_v10 }
 0x315   : > { %v1335_v12 = vpop.f32.mrf.mxu1 }
 0x317   : > { %v1337_v58 = vpop.f32.mrf.mxu1 }
 0x318   : > { %v1264_v24 = vpop.f32.mrf.mxu0 }
 0x319   : > { %v4264_v14 = vadd.f32 %v1335_v12, %v1264_v24 }
 0x31a   : > { %v1266_v53 = vpop.f32.mrf.mxu0 }
 0x31b   : > { %5790 = vst [vmem:[#allocation27_spill] sm:$0xff] %v4264_v14  ;;  %v1352_v30 = vmul.f32 0.21875, %v4264_v14  ;;  %v1356_v56 = vmul.f32 0.46875, %v4264_v14  ;;  %v4268_v36 = vadd.f32 %v1337_v58, %v1266_v53 }
 0x31d   : > { %5791 = vst [vmem:[#allocation29_spill] sm:$0xff] %v4268_v36  ;;  %v1354_v8 = vadd.f32 %v3233_v1, %v1352_v30  ;;  %v1358_v45 = vadd.f32 %v3233_v1, %v1356_v56  ;;  %v1353_v28 = vmul.f32 0.21875, %v4268_v36  ;;  %v1357_v27 = vmul.f32 0.46875, %v4268_v36 }
 0x31f   : > { %v1360_v25 = vfloor.f32 %v1354_v8  ;;  %v1824_v33 = vfloor.f32 %v1358_v45  ;;  %v4296_v34 = vadd.f32 %v3234_v37, %v1353_v28  ;;  %v4298_v43 = vadd.f32 %v3234_v37, %v1357_v27 }
 0x321   : > { %v3115_v6 = vtrunc.f32 %v1360_v25  ;;  %v1364_v39 = vsub.f32 %v1354_v8, %v1360_v25  ;;  %v3119_v9 = vtrunc.f32 %v1824_v33  ;;  %v4327_v61 = vsub.f32 %v1358_v45, %v1824_v33 }
 0x322   : > { %v1361_v3 = vfloor.f32 %v4296_v34 }
 0x323   : > { %v3116_v26 = vcvt.f32.s32 %v3115_v6  ;;  %v1397_v57 = vsub.f32 1.0, %v1364_v39  ;;  %v1597_v5 = vrot.slane %v1364_v39, 1  ;;  %v4340_v16 = vcvt.f32.s32 %v3119_v9 }
 0x324   : > { %v4361_v56 = vsub.f32 1.0, %v4327_v61  ;;  %v2364_v27 = vrot.slane %v4327_v61, 1  ;;  %v4376_v37 = vtrunc.f32 %v1361_v3  ;;  %v4436_v58 = vsub.f32 %v4296_v34, %v1361_v3 }
 0x325   : > { %vm1375_vm14 = vcmp.ge.s32.totalorder %v3116_v26, 0  ;;  %vm1377_vm15 = vcmp.lt.s32.totalorder %v3116_v26, 8  ;;  %vm1409_vm1 = vcmp.gt.s32.totalorder %v3116_v26, 0  ;;  %v1487_v4 = vadd.s32 1, %v3116_v26 }
 0x326   : > { %v1381_v20 = vsel %vm1375_vm14, 1, %v5739_v22  ;;  %v1389_v21 = vsel %vm1377_vm15, 1, %v5739_v22  ;;  %v1410_v2 = vsel %vm1409_vm1, %v3116_v26, 0  ;;  %v1401_v49 = vrot.slane %v1397_v57, 1  ;;  %vm4336_vm3 = vmand %vm1375_vm14, %vm1377_vm15 }
 0x327   : > { %v1383_v35 = vrot.slane %v1381_v20, 1  ;;  %v1391_v18 = vrot.slane %v1389_v21, 1  ;;  %vm1413_vm2 = vcmp.lt.s32.totalorder %v1410_v2, 7  ;;  %vm1489_vm4 = vcmp.ge.s32.totalorder %v1487_v4, 0 }
 0x328   : > { %v1414_v40 = vsel %vm1413_vm2, %v1410_v2, 7  ;;  %vm1491_vm5 = vcmp.lt.s32.totalorder %v1487_v4, 8  ;;  %vm1503_vm10 = vcmp.gt.s32.totalorder %v1487_v4, 0  ;;  %v1579_v53 = vsel %vm1489_vm4, 1, %v5739_v22 }
 0x329   : > { %vm4342_vm6 = vcmp.ne.s32.totalorder %v1383_v35, 0  ;;  %vm4346_vm7 = vcmp.ne.s32.totalorder %v1391_v18, 0  ;;  %v1417_v12 = vmul.u32 8, %v1414_v40  ;;  %v1419_v24 = vrot.slane %v1414_v40, 7  ;;  %vm4350_vm8 = vmand %vm1489_vm4, %vm1491_vm5 }
 0x32a   : > { %vm1387_vm9 = vmand %vm4336_vm3, %vm4342_vm6  ;;  %v1587_v30 = vsel %vm1491_vm5, 1, %v5739_v22  ;;  %v1405_v8 = vmul.f32 %v1401_v49, %v1397_v57  ;;  %v1504_v45 = vsel %vm1503_vm10, %v1487_v4, 0  ;;  %v1581_v28 = vrot.slane %v1579_v53, 1 }
 0x32b   : > { %vm4365_vm11 = vmand %vm1387_vm9, %vm4346_vm7  ;;  %v1499_v25 = vmul.f32 %v1401_v49, %v1364_v39  ;;  %vm1507_vm13 = vcmp.lt.s32.totalorder %v1504_v45, 7  ;;  %v1589_v33 = vrot.slane %v1587_v30, 1  ;;  %v1421_v26 = vadd.s32 %v1419_v24, %v1417_v12 }
 0x32c   : > { %vm1495_vm12 = vmand %vm4350_vm8, %vm4342_vm6  ;;  %v1407_v6 = vsel %vm4365_vm11, %v1405_v8, 0.0  ;;  %v1508_v20 = vsel %vm1507_vm13, %v1504_v45, 7  ;;  %v1601_v21 = vmul.f32 %v1597_v5, %v1397_v57  ;;  %vm4386_vm15 = vcmp.ne.s32.totalorder %v1581_v28, 0 }
 0x32d   : > { %vm4382_vm14 = vmand %vm1495_vm12, %vm4346_vm7  ;;  %v1511_v2 = vrot.slane %v1508_v20, 7  ;;  %vm4390_vm1 = vcmp.ne.s32.totalorder %v1589_v33, 0  ;;  %v1677_v18 = vmul.f32 %v1597_v5, %v1364_v39  ;;  %v1605_v40 = vmul.u32 8, %v1508_v20 }
 0x32e   : > { %v1501_v49 = vsel %vm4382_vm14, %v1499_v25, 0.0  ;;  %vm1585_vm2 = vmand %vm4336_vm3, %vm4386_vm15  ;;  %vm1854_vm4 = vcmp.ge.s32.totalorder %v4340_v16, 0  ;;  %vm1856_vm5 = vcmp.lt.s32.totalorder %v4340_v16, 16  ;;  %v1880_v13 = vrot.slane %v4361_v56, 1 }
 0x32f   : > { %v1513_v57 = vadd.s32 %v1511_v2, %v1417_v12  ;;  %vm4404_vm6 = vmand %vm1585_vm2, %vm4390_vm1  ;;  %v1860_v39 = vsel %vm1854_vm4, 1, %v5739_v22  ;;  %v1868_v5 = vsel %vm1856_vm5, 1, %v5739_v22  ;;  %v1607_v12 = vadd.s32 %v1605_v40, %v1419_v24 }
 0x330   : > { %v1603_v52 = vsel %vm4404_vm6, %v1601_v21, 0.0  ;;  %vm1673_vm3 = vmand %vm4350_vm8, %vm4386_vm15  ;;  %v1681_v53 = vadd.s32 %v1605_v40, %v1511_v2  ;;  %v1862_v30 = vrot.slane %v1860_v39, 1  ;;  %v4422_v1 = vrot.slane %v1421_v26, %v4271_v17 }
 0x331   : > { %v4425_v8 = vrot.slane %v1407_v6, %v4274_v48  ;;  %vm4429_vm7 = vmand %vm1673_vm3, %vm4390_vm1  ;;  %v1870_v24 = vrot.slane %v1868_v5, 1  ;;  %v4439_v28 = vrot.slane %v1513_v57, %v4271_v17  ;;  %v4442_v25 = vrot.slane %v1501_v49, %v4274_v48 }
 0x332   : > { %v1679_v33 = vsel %vm4429_vm7, %v1677_v18, 0.0  ;;  %vm4450_vm8 = vmand %vm1854_vm4, %vm1856_vm5  ;;  %vm4454_vm9 = vcmp.ne.s32.totalorder %v1862_v30, 0  ;;  %v4459_v3 = vrot.slane %v1603_v52, %v4274_v48  ;;  %vm1888_vm12 = vcmp.gt.s32.totalorder %v4340_v16, 0 }
 0x333   : > { %vm1866_vm10 = vmand %vm4450_vm8, %vm4454_vm9  ;;  %vm4465_vm11 = vcmp.ne.s32.totalorder %v1870_v24, 0  ;;  %v2110_v9 = vadd.s32 1, %v4340_v16  ;;  %v4472_v20 = vrot.slane %v1607_v12, %v4271_v17  ;;  %v4475_v21 = vrot.slane %v1681_v53, %v4271_v17 }
 0x334   : > { %v1884_v2 = vmul.f32 %v1880_v13, %v4361_v56  ;;  %v1889_v4 = vsel %vm1888_vm12, %v4340_v16, 0  ;;  %v4480_v35 = vrot.slane %v1679_v33, %v4274_v48  ;;  %vm4484_vm13 = vmand %vm1866_vm10, %vm4465_vm11  ;;  %v2122_v57 = vmul.f32 %v1880_v13, %v4327_v61 }
 0x335   : > { %vm1892_vm14 = vcmp.lt.s32.totalorder %v1889_v4, 15  ;;  %vm2112_vm15 = vcmp.ge.s32.totalorder %v2110_v9, 0  ;;  %vm2114_vm1 = vcmp.lt.s32.totalorder %v2110_v9, 16  ;;  %vm2126_vm4 = vcmp.gt.s32.totalorder %v2110_v9, 0 }
 0x336   : > { %v1893_v49 = vsel %vm1892_vm14, %v1889_v4, 15  ;;  %vm4488_vm2 = vmand %vm2112_vm15, %vm2114_vm1  ;;  %v2346_v16 = vsel %vm2112_vm15, 1, %v5739_v22  ;;  %v2127_v5 = vsel %vm2126_vm4, %v2110_v9, 0  ;;  %v1886_v12 = vsel %vm4484_vm13, %v1884_v2, 0.0 }
 0x337   : > { %v1896_v10 = vmul.u32 16, %v1893_v49  ;;  %v1898_v39 = vrot.slane %v1893_v49, 7  ;;  %vm2118_vm5 = vmand %vm4488_vm2, %vm4454_vm9  ;;  %v2348_v52 = vrot.slane %v2346_v16, 1  ;;  %vm2130_vm3 = vcmp.lt.s32.totalorder %v2127_v5, 15 }
 0x338   : > { %vm4502_vm6 = vmand %vm2118_vm5, %vm4465_vm11  ;;  %v2354_v13 = vsel %vm2114_vm1, 1, %v5739_v22  ;;  %v3118_v30 = vcvt.f32.s32 %v4376_v37  ;;  %v2131_v45 = vsel %vm2130_vm3, %v2127_v5, 15  ;;  %v2368_v33 = vmul.f32 %v2364_v27, %v4361_v56 }
 0x339   : > { %vm4508_vm7 = vcmp.ne.s32.totalorder %v2348_v52, 0  ;;  %v2588_v34 = vmul.f32 %v2364_v27, %v4327_v61  ;;  %v1900_v26 = vadd.s32 %v1898_v39, %v1896_v10  ;;  %v2134_v9 = vrot.slane %v2131_v45, 7 }
 0x33a   : > { %vm2352_vm9 = vmand %vm4450_vm8, %vm4508_vm7  ;;  %v2356_v37 = vrot.slane %v2354_v13, 1  ;;  %v2372_v2 = vmul.u32 16, %v2131_v45  ;;  %v4523_v4 = vrot.slane %v1886_v12, %v4280_v29  ;;  %v2124_v18 = vsel %vm4502_vm6, %v2122_v57, 0.0 }
 0x33b   : > { %vm2584_vm10 = vmand %vm4488_vm2, %vm4508_vm7  ;;  %vm1376_vm11 = vcmp.ge.s32.totalorder %v3118_v30, 0  ;;  %vm1378_vm12 = vcmp.lt.s32.totalorder %v3118_v30, 8  ;;  %v2136_v61 = vadd.s32 %v2134_v9, %v1896_v10  ;;  %v1398_v57 = vsub.f32 1.0, %v4436_v58 }
 0x33c   : > { %vm2358_vm13 = vcmp.ne.s32.totalorder %v2356_v37, 0  ;;  %v2374_v56 = vadd.s32 %v2372_v2, %v1898_v39  ;;  %v2592_v27 = vadd.s32 %v2372_v2, %v2134_v9  ;;  %v1382_v6 = vsel %vm1376_vm11, 1, %v5739_v22  ;;  %vm4567_vm1 = vmand %vm1376_vm11, %vm1378_vm12 }
 0x33d   : > { %vm2360_vm8 = vmand %vm2352_vm9, %vm2358_vm13  ;;  %v1390_v49 = vsel %vm1378_vm12, 1, %v5739_v22  ;;  %vm1411_vm14 = vcmp.gt.s32.totalorder %v3118_v30, 0  ;;  %v4537_v16 = vrot.slane %v1900_v26, %v4277_v31  ;;  %v4540_v5 = vrot.slane %v2136_v61, %v4277_v31 }
 0x33e   : > { %v4543_v10 = vrot.slane %v2124_v18, %v4280_v29  ;;  %v2370_v39 = vsel %vm2360_vm8, %v2368_v33, 0.0  ;;  %vm4550_vm15 = vmand %vm2584_vm10, %vm2358_vm13  ;;  %v4555_v12 = vrot.slane %v2374_v56, %v4277_v31  ;;  %v4558_v53 = vrot.slane %v2592_v27, %v4277_v31 }
 0x33f   : > { %v1384_v13 = vrot.slane %v1382_v6, 1  ;;  %v1392_v45 = vrot.slane %v1390_v49, 1  ;;  %v4561_v26 = vrot.slane %v2370_v39, %v4280_v29  ;;  %v1402_v33 = vrot.slane %v1398_v57, 1 }
 0x340   : > { %v1412_v40 = vsel %vm1411_vm14, %v3118_v30, 0  ;;  %v1488_v9 = vadd.s32 1, %v3118_v30  ;;  %v2590_v24 = vsel %vm4550_vm15, %v2588_v34, 0.0  ;;  %v1598_v6 = vrot.slane %v4436_v58, 1 }
 0x341   : > { %vm4571_vm2 = vcmp.ne.s32.totalorder %v1384_v13, 0  ;;  %vm4575_vm4 = vcmp.ne.s32.totalorder %v1392_v45, 0  ;;  %vm1415_vm5 = vcmp.lt.s32.totalorder %v1412_v40, 7  ;;  %v1406_v34 = vmul.f32 %v1402_v33, %v1398_v57 }
 0x342   : > { %vm1388_vm6 = vmand %vm4567_vm1, %vm4571_vm2  ;;  %v1416_v30 = vsel %vm1415_vm5, %v1412_v40, 7  ;;  %vm1490_vm3 = vcmp.ge.s32.totalorder %v1488_v9, 0  ;;  %vm1492_vm7 = vcmp.lt.s32.totalorder %v1488_v9, 8  ;;  %vm1505_vm10 = vcmp.gt.s32.totalorder %v1488_v9, 0 }
 0x343   : > { %vm4585_vm9 = vmand %vm1388_vm6, %vm4575_vm4  ;;  %v1418_v56 = vmul.u32 8, %v1416_v30  ;;  %v1420_v27 = vrot.slane %v1416_v30, 7  ;;  %v1506_v52 = vsel %vm1505_vm10, %v1488_v9, 0  ;;  %v1580_v13 = vsel %vm1490_vm3, 1, %v5739_v22 }
 0x344   : > { %v1408_v49 = vsel %vm4585_vm9, %v1406_v34, 0.0  ;;  %vm4592_vm11 = vmand %vm1490_vm3, %vm1492_vm7  ;;  %v1588_v45 = vsel %vm1492_vm7, 1, %v5739_v22  ;;  %v1500_v30 = vmul.f32 %v1402_v33, %v4436_v58  ;;  %vm1509_vm13 = vcmp.lt.s32.totalorder %v1506_v52, 7 }
 0x345   : > { %v1422_v40 = vadd.s32 %v1420_v27, %v1418_v56  ;;  %vm1496_vm12 = vmand %vm4592_vm11, %vm4571_vm2  ;;  %v1582_v61 = vrot.slane %v1580_v13, 1  ;;  %v4604_v34 = vrot.slane %v2590_v24, %v4280_v29  ;;  %v4607_v19 = vrot.slane %v1408_v49, %v4274_v48 }
 0x346   : > { %vm1498_vm8 = vmand %vm1496_vm12, %vm4575_vm4  ;;  %v1510_v9 = vsel %vm1509_vm13, %v1506_v52, 7  ;;  %v1590_v22 = vrot.slane %v1588_v45, 1  ;;  %v1602_v18 = vmul.f32 %v1598_v6, %v1398_v57  ;;  %v5845_v52 = vfloor.f32 %v4298_v43 }
 0x347   : > { %v4612_v2 = vrot.slane %v1422_v40, %v4271_v17  ;;  %v1502_v36 = vsel %vm1498_vm8, %v1500_v30, 0.0  ;;  %v1512_v14 = vrot.slane %v1510_v9, 7  ;;  %vm4614_vm14 = vcmp.ne.s32.totalorder %v1582_v61, 0 }
 0x348   : > { %vm1586_vm15 = vmand %vm4567_vm1, %vm4614_vm14  ;;  %vm4622_vm2 = vcmp.ne.s32.totalorder %v1590_v22, 0  ;;  %v1606_v49 = vmul.u32 8, %v1510_v9  ;;  %v3121_v13 = vtrunc.f32 %v5845_v52  ;;  %v4629_v40 = vrot.slane %v1502_v36, %v4274_v48 }
 0x349   : > { %v1514_v45 = vadd.s32 %v1512_v14, %v1418_v56  ;;  %vm1594_vm4 = vmand %vm1586_vm15, %vm4622_vm2  ;;  %v1678_v30 = vmul.f32 %v1598_v6, %v4436_v58  ;;  %v5846_v37 = vmov %v5845_v52  ;;  %vm1446_vm6 = vcmp.eq.s32.totalorder %v4285_v15, %v4612_v2 }
 0x34a   : > { %v1829_v22 = vsub.f32 %v4298_v43, %v5846_v37  ;;  %v1604_v61 = vsel %vm1594_vm4, %v1602_v18, 0.0  ;;  %v1608_v11 = vadd.s32 %v1606_v49, %v1420_v27  ;;  %vm1674_vm1 = vmand %vm4592_vm11, %vm4614_vm14  ;;  %v1682_v57 = vadd.s32 %v1606_v49, %v1512_v14 }
 0x34b   : > { %v3122_v56 = vcvt.f32.s32 %v3121_v13  ;;  %v4642_v36 = vrot.slane %v1514_v45, %v4271_v17  ;;  %v4645_v9 = vrot.slane %v1604_v61, %v4274_v48  ;;  %vm1676_vm5 = vmand %vm1674_vm1, %vm4622_vm2  ;;  %v5847_v33 = vmov 0  }
 0x34c   : > { %v1877_v58 = vsub.f32 1.0, %v1829_v22  ;;  %v2365_v43 = vrot.slane %v1829_v22, 1  ;;  %v4652_v27 = vrot.slane %v1608_v11, %v4271_v17  ;;  %v1680_v6 = vsel %vm1676_vm5, %v1678_v30, 0.0 }
 0x34d   : > { %v4655_v14 = vrot.slane %v1682_v57, %v4271_v17  ;;  %vm1855_vm3 = vcmp.ge.s32.totalorder %v3122_v56, 0  ;;  %v4658_v39 = vrot.slane %v1680_v6, %v4274_v48  ;;  %vm1857_vm7 = vcmp.lt.s32.totalorder %v3122_v56, 16 }
 0x34e   : > { %v1861_v24 = vsel %vm1855_vm3, 1, %v5847_v33  ;;  %v1881_v18 = vrot.slane %v1877_v58, 1  ;;  %v1869_v52 = vsel %vm1857_vm7, 1, %v5847_v33  ;;  %vm1890_vm9 = vcmp.gt.s32.totalorder %v3122_v56, 0  ;;  %vm4662_vm10 = vmand %vm1855_vm3, %vm1857_vm7 }
 0x34f   : > { %v1863_v49 = vrot.slane %v1861_v24, 1  ;;  %v2111_v13 = vadd.s32 1, %v3122_v56  ;;  %v1871_v45 = vrot.slane %v1869_v52, 1  ;;  %v1891_v37 = vsel %vm1890_vm9, %v3122_v56, 0 }
 0x350   : > { %v1885_v11 = vmul.f32 %v1881_v18, %v1877_v58  ;;  %v2123_v30 = vmul.f32 %v1881_v18, %v1829_v22  ;;  %vm1894_vm12 = vcmp.lt.s32.totalorder %v1891_v37, 15  ;;  %vm1445_vm14 = vcmp.eq.s32.totalorder %v4285_v15, %v4422_v1 }
 0x351   : > { %vm4666_vm11 = vcmp.ne.s32.totalorder %v1863_v49, 0  ;;  %vm2113_vm13 = vcmp.ge.s32.totalorder %v2111_v13, 0  ;;  %vm2115_vm8 = vcmp.lt.s32.totalorder %v2111_v13, 16  ;;  %vm4676_vm2 = vcmp.ne.s32.totalorder %v1871_v45, 0 }
 0x352   : > { %vm1867_vm15 = vmand %vm4662_vm10, %vm4666_vm11  ;;  %v1895_v57 = vsel %vm1894_vm12, %v1891_v37, 15  ;;  %vm2128_vm4 = vcmp.gt.s32.totalorder %v2111_v13, 0  ;;  %v2347_v56 = vsel %vm2113_vm13, 1, %v5847_v33  ;;  %v2355_v45 = vsel %vm2115_vm8, 1, %v5847_v33 }
 0x353   : > { %vm1875_vm1 = vmand %vm1867_vm15, %vm4676_vm2  ;;  %v1897_v6 = vmul.u32 16, %v1895_v57  ;;  %v1899_v24 = vrot.slane %v1895_v57, 7  ;;  %v2129_v18 = vsel %vm2128_vm4, %v2111_v13, 0  ;;  %v2349_v49 = vrot.slane %v2347_v56, 1 }
 0x354   : > { %v1887_v52 = vsel %vm1875_vm1, %v1885_v11, 0.0  ;;  %vm4683_vm5 = vmand %vm2113_vm13, %vm2115_vm8  ;;  %vm2132_vm3 = vcmp.lt.s32.totalorder %v2129_v18, 15  ;;  %v2369_v38 = vmul.f32 %v2365_v43, %v1877_v58  ;;  %v2357_v33 = vrot.slane %v2355_v45, 1 }
 0x355   : > { %v1901_v37 = vadd.s32 %v1899_v24, %v1897_v6  ;;  %v4689_v60 = vrot.slane %v1887_v52, %v4280_v29  ;;  %vm2119_vm7 = vmand %vm4683_vm5, %vm4666_vm11  ;;  %v2133_v13 = vsel %vm2132_vm3, %v2129_v18, 15  ;;  %vm4695_vm9 = vcmp.ne.s32.totalorder %v2349_v49, 0 }
 0x356   : > { %vm2121_vm12 = vmand %vm2119_vm7, %vm4676_vm2  ;;  %v2135_v57 = vrot.slane %v2133_v13, 7  ;;  %v2373_v58 = vmul.u32 16, %v2133_v13  ;;  %v2589_v56 = vmul.f32 %v2365_v43, %v1829_v22  ;;  %v1470_v48 = vsel %vm1446_vm6, %v4607_v19, 0.0 }
 0x357   : > { %v4702_v52 = vrot.slane %v1901_v37, %v4277_v31  ;;  %v2125_v62 = vsel %vm2121_vm12, %v2123_v30, 0.0  ;;  %vm2353_vm11 = vmand %vm4662_vm10, %vm4695_vm9  ;;  %vm1538_vm13 = vcmp.eq.s32.totalorder %v4285_v15, %v4642_v36  ;;  %vm2359_vm8 = vcmp.ne.s32.totalorder %v2357_v33, 0 }
 0x358   : > { %v2137_v61 = vadd.s32 %v2135_v57, %v1897_v6  ;;  %v4715_v22 = vrot.slane %v2125_v62, %v4280_v29  ;;  %v2375_v43 = vadd.s32 %v2373_v58, %v1899_v24  ;;  %vm2585_vm15 = vmand %vm4683_vm5, %vm4695_vm9  ;;  %v2593_v30 = vadd.s32 %v2373_v58, %v2135_v57 }
 0x359   : > { %vm2361_vm10 = vmand %vm2353_vm11, %vm2359_vm8  ;;  %v1562_v17 = vsel %vm1538_vm13, %v4629_v40, 0.0  ;;  %vm1632_vm6 = vcmp.eq.s32.totalorder %v4285_v15, %v4652_v27  ;;  %vm1706_vm2 = vcmp.eq.s32.totalorder %v4285_v15, %v4655_v14  ;;  %v1469_v57 = vsel %vm1445_vm14, %v4425_v8, 0.0 }
 0x35a   : > { %v4727_v62 = vrot.slane %v2137_v61, %v4277_v31  ;;  %v2371_v6 = vsel %vm2361_vm10, %v2369_v38, 0.0  ;;  %v4730_v24 = vrot.slane %v2375_v43, %v4277_v31  ;;  %vm2587_vm4 = vmand %vm2585_vm15, %vm2359_vm8  ;;  %v1578_v7 = vadd.f32 %v1562_v17, %v1470_v48 }
 0x35b   : > { %v4733_v18 = vrot.slane %v2371_v6, %v4280_v29  ;;  %v2591_v49 = vsel %vm2587_vm4, %v2589_v56, 0.0  ;;  %v4736_v45 = vrot.slane %v2593_v30, %v4277_v31  ;;  %v1656_v37 = vsel %vm1632_vm6, %v4645_v9, 0.0 }
 0x35c   : > { %v4740_v13 = vrot.slane %v2591_v49, %v4280_v29  ;;  %v1672_v11 = vadd.f32 %v1656_v37, %v1578_v7  ;;  %v1730_v38 = vsel %vm1706_vm2, %v4658_v39, 0.0  ;;  %vm1537_vm1 = vcmp.eq.s32.totalorder %v4285_v15, %v4439_v28 }
 0x35d   : > { %vm1631_vm5 = vcmp.eq.s32.totalorder %v4285_v15, %v4472_v20  ;;  %vm1705_vm3 = vcmp.eq.s32.totalorder %v4285_v15, %v4475_v21  ;;  %vm1444_vm7 = vcmp.eq.s32.totalorder %v4288_v23, %v4612_v2  ;;  %v1561_v29 = vsel %vm1537_vm1, %v4442_v25, 0.0 }
 0x35e   : > { %v1746_v31 = vadd.f32 %v1730_v38, %v1672_v11  ;;  %v1655_v33 = vsel %vm1631_vm5, %v4459_v3, 0.0  ;;  %v1729_v58 = vsel %vm1705_vm3, %v4480_v35, 0.0  ;;  %v1577_v56 = vadd.f32 %v1561_v29, %v1469_v57 }
 0x35f   : > { %v1468_v48 = vsel %vm1444_vm7, %v4607_v19, 0.0  ;;  %vm1536_vm14 = vcmp.eq.s32.totalorder %v4288_v23, %v4642_v36  ;;  %vm1630_vm9 = vcmp.eq.s32.totalorder %v4288_v23, %v4652_v27  ;;  %vm1704_vm12 = vcmp.eq.s32.totalorder %v4288_v23, %v4655_v14 }
 0x360   : > { %1763 = vmatprep.subr.mxu1 %v1746_v31  ;;  %v1560_v61 = vsel %vm1536_vm14, %v4629_v40, 0.0  ;;  %v1654_v43 = vsel %vm1630_vm9, %v4645_v9, 0.0  ;;  %vm1443_vm11 = vcmp.eq.s32.totalorder %v4288_v23, %v4422_v1  ;;  %v1671_v30 = vadd.f32 %v1655_v33, %v1577_v56 }
 0x361   : > { %v1576_v17 = vadd.f32 %v1560_v61, %v1468_v48  ;;  %v1728_v6 = vsel %vm1704_vm12, %v4658_v39, 0.0  ;;  %v1467_v7 = vsel %vm1443_vm11, %v4425_v8, 0.0  ;;  %vm1535_vm13 = vcmp.eq.s32.totalorder %v4288_v23, %v4439_v28 }
 0x362   : > { %vm1629_vm8 = vcmp.eq.s32.totalorder %v4288_v23, %v4472_v20  ;;  %vm1703_vm15 = vcmp.eq.s32.totalorder %v4288_v23, %v4475_v21  ;;  %vm1442_vm10 = vcmp.eq.s32.totalorder %v4291_v44, %v4612_v2  ;;  %v1745_v49 = vadd.f32 %v1729_v58, %v1671_v30 }
 0x363   : > { %v1670_v37 = vadd.f32 %v1654_v43, %v1576_v17  ;;  %v1559_v11 = vsel %vm1535_vm13, %v4442_v25, 0.0  ;;  %v1653_v38 = vsel %vm1629_vm8, %v4459_v3, 0.0  ;;  %v1727_v31 = vsel %vm1703_vm15, %v4480_v35, 0.0 }
 0x364   : > { %v1575_v57 = vadd.f32 %v1559_v11, %v1467_v7  ;;  %v1466_v29 = vsel %vm1442_vm10, %v4607_v19, 0.0  ;;  %vm1534_vm6 = vcmp.eq.s32.totalorder %v4291_v44, %v4642_v36  ;;  %1764 = vmatpush1.msra.mxu1 %v1745_v49  ;;  %vm1628_vm2 = vcmp.eq.s32.totalorder %v4291_v44, %v4652_v27 }
 0x365   : > { %v1744_v33 = vadd.f32 %v1728_v6, %v1670_v37  ;;  %v1558_v56 = vsel %vm1534_vm6, %v4629_v40, 0.0  ;;  %vm1702_vm4 = vcmp.eq.s32.totalorder %v4291_v44, %v4655_v14  ;;  %v1652_v61 = vsel %vm1628_vm2, %v4645_v9, 0.0 }
 0x366   : > { %v1669_v58 = vadd.f32 %v1653_v38, %v1575_v57  ;;  %v1574_v48 = vadd.f32 %v1558_v56, %v1466_v29  ;;  %v1726_v43 = vsel %vm1702_vm4, %v4658_v39, 0.0  ;;  %vm1441_vm1 = vcmp.eq.s32.totalorder %v4291_v44, %v4422_v1 }
 0x367   : > { %1765 = vmatprep.subr.mxu1 %v1744_v33  ;;  %vm1533_vm5 = vcmp.eq.s32.totalorder %v4291_v44, %v4439_v28  ;;  %vm1627_vm3 = vcmp.eq.s32.totalorder %v4291_v44, %v4472_v20  ;;  %vm1701_vm7 = vcmp.eq.s32.totalorder %v4291_v44, %v4475_v21  ;;  %v1465_v6 = vsel %vm1441_vm1, %v4425_v8, 0.0 }
 0x368   : > { %v1743_v30 = vadd.f32 %v1727_v31, %v1669_v58  ;;  %v1668_v17 = vadd.f32 %v1652_v61, %v1574_v48  ;;  %v1557_v7 = vsel %vm1533_vm5, %v4442_v25, 0.0  ;;  %v1651_v37 = vsel %vm1627_vm3, %v4459_v3, 0.0 }
 0x369   : > { %v1573_v49 = vadd.f32 %v1557_v7, %v1465_v6  ;;  %v1725_v11 = vsel %vm1701_vm7, %v4480_v35, 0.0  ;;  %vm1440_vm14 = vcmp.eq.s32.totalorder %v4294_v50, %v4612_v2  ;;  %vm1532_vm9 = vcmp.eq.s32.totalorder %v4294_v50, %v4642_v36 }
 0x36a   : > { %1766 = vmatpush1.msra.mxu1 %v1743_v30  ;;  %v1742_v38 = vadd.f32 %v1726_v43, %v1668_v17  ;;  %v1464_v57 = vsel %vm1440_vm14, %v4607_v19, 0.0  ;;  %vm1626_vm12 = vcmp.eq.s32.totalorder %v4294_v50, %v4652_v27  ;;  %v1556_v29 = vsel %vm1532_vm9, %v4629_v40, 0.0 }
 0x36b   : > { %v1667_v31 = vadd.f32 %v1651_v37, %v1573_v49  ;;  %v1650_v33 = vsel %vm1626_vm12, %v4645_v9, 0.0  ;;  %vm1700_vm11 = vcmp.eq.s32.totalorder %v4294_v50, %v4655_v14  ;;  %v1572_v56 = vadd.f32 %v1556_v29, %v1464_v57 }
 0x36c   : > { %1767 = vmatprep.subr.mxu1 %v1742_v38  ;;  %v1724_v58 = vsel %vm1700_vm11, %v4658_v39, 0.0  ;;  %vm1439_vm13 = vcmp.eq.s32.totalorder %v4294_v50, %v4422_v1  ;;  %vm1531_vm8 = vcmp.eq.s32.totalorder %v4294_v50, %v4439_v28  ;;  %vm1625_vm15 = vcmp.eq.s32.totalorder %v4294_v50, %v4472_v20 }
 0x36d   : > { %v1741_v48 = vadd.f32 %v1725_v11, %v1667_v31  ;;  %v1463_v61 = vsel %vm1439_vm13, %v4425_v8, 0.0  ;;  %v1555_v43 = vsel %vm1531_vm8, %v4442_v25, 0.0  ;;  %v1666_v30 = vadd.f32 %v1650_v33, %v1572_v56 }
 0x36e   : > { %v1571_v17 = vadd.f32 %v1555_v43, %v1463_v61  ;;  %v1649_v6 = vsel %vm1625_vm15, %v4459_v3, 0.0  ;;  %vm1699_vm10 = vcmp.eq.s32.totalorder %v4294_v50, %v4475_v21  ;;  %vm1438_vm6 = vcmp.eq.s32.totalorder %v4301_v54, %v4612_v2 }
 0x36f   : > { %1768 = vmatpush1.msra.mxu1 %v1741_v48  ;;  %v1723_v7 = vsel %vm1699_vm10, %v4480_v35, 0.0  ;;  %vm1530_vm2 = vcmp.eq.s32.totalorder %v4301_v54, %v4642_v36  ;;  %vm1624_vm4 = vcmp.eq.s32.totalorder %v4301_v54, %v4652_v27  ;;  %v1740_v49 = vadd.f32 %v1724_v58, %v1666_v30 }
 0x370   : > { %v1665_v37 = vadd.f32 %v1649_v6, %v1571_v17  ;;  %v1462_v11 = vsel %vm1438_vm6, %v4607_v19, 0.0  ;;  %v1554_v38 = vsel %vm1530_vm2, %v4629_v40, 0.0  ;;  %v1648_v31 = vsel %vm1624_vm4, %v4645_v9, 0.0 }
 0x371   : > { %v1570_v57 = vadd.f32 %v1554_v38, %v1462_v11  ;;  %vm1698_vm1 = vcmp.eq.s32.totalorder %v4301_v54, %v4655_v14  ;;  %vm1437_vm5 = vcmp.eq.s32.totalorder %v4301_v54, %v4422_v1  ;;  %1769 = vmatprep.subr.mxu1 %v1740_v49  ;;  %vm1529_vm3 = vcmp.eq.s32.totalorder %v4301_v54, %v4439_v28 }
 0x372   : > { %v1739_v29 = vadd.f32 %v1723_v7, %v1665_v37  ;;  %v1722_v33 = vsel %vm1698_vm1, %v4658_v39, 0.0  ;;  %v1461_v56 = vsel %vm1437_vm5, %v4425_v8, 0.0  ;;  %v1553_v48 = vsel %vm1529_vm3, %v4442_v25, 0.0 }
 0x373   : > { %v1664_v58 = vadd.f32 %v1648_v31, %v1570_v57  ;;  %vm1623_vm7 = vcmp.eq.s32.totalorder %v4301_v54, %v4472_v20  ;;  %vm1697_vm14 = vcmp.eq.s32.totalorder %v4301_v54, %v4475_v21  ;;  %v1569_v61 = vadd.f32 %v1553_v48, %v1461_v56 }
 0x374   : > { %1770 = vmatpush1.msra.mxu1 %v1739_v29  ;;  %v1647_v43 = vsel %vm1623_vm7, %v4459_v3, 0.0  ;;  %v1721_v30 = vsel %vm1697_vm14, %v4480_v35, 0.0  ;;  %vm1436_vm9 = vcmp.eq.s32.totalorder %v4304_v42, %v4612_v2  ;;  %vm1528_vm12 = vcmp.eq.s32.totalorder %v4304_v42, %v4642_v36 }
 0x375   : > { %v1738_v17 = vadd.f32 %v1722_v33, %v1664_v58  ;;  %v1460_v6 = vsel %vm1436_vm9, %v4607_v19, 0.0  ;;  %vm1622_vm11 = vcmp.eq.s32.totalorder %v4304_v42, %v4652_v27  ;;  %v1663_v7 = vadd.f32 %v1647_v43, %v1569_v61 }
 0x376   : > { %v1552_v49 = vsel %vm1528_vm12, %v4629_v40, 0.0  ;;  %v1646_v37 = vsel %vm1622_vm11, %v4645_v9, 0.0  ;;  %vm1696_vm13 = vcmp.eq.s32.totalorder %v4304_v42, %v4655_v14  ;;  %vm1435_vm8 = vcmp.eq.s32.totalorder %v4304_v42, %v4422_v1 }
 0x377   : > { %1771 = vmatprep.subr.mxu1 %v1738_v17  ;;  %v1568_v11 = vadd.f32 %v1552_v49, %v1460_v6  ;;  %v1720_v38 = vsel %vm1696_vm13, %v4658_v39, 0.0  ;;  %vm1527_vm15 = vcmp.eq.s32.totalorder %v4304_v42, %v4439_v28  ;;  %v1737_v57 = vadd.f32 %v1721_v30, %v1663_v7 }
 0x378   : > { %v1459_v31 = vsel %vm1435_vm8, %v4425_v8, 0.0  ;;  %v1551_v29 = vsel %vm1527_vm15, %v4442_v25, 0.0  ;;  %vm1621_vm10 = vcmp.eq.s32.totalorder %v4304_v42, %v4472_v20  ;;  %vm1695_vm6 = vcmp.eq.s32.totalorder %v4304_v42, %v4475_v21 }
 0x379   : > { %v1662_v33 = vadd.f32 %v1646_v37, %v1568_v11  ;;  %v1567_v56 = vadd.f32 %v1551_v29, %v1459_v31  ;;  %v1645_v58 = vsel %vm1621_vm10, %v4459_v3, 0.0  ;;  %1772 = vmatpush1.msra.mxu1 %v1737_v57  ;;  %v1719_v48 = vsel %vm1695_vm6, %v4480_v35, 0.0 }
 0x37a   : > { %vm1434_vm2 = vcmp.eq.s32.totalorder %v4307_v55, %v4612_v2  ;;  %vm1526_vm4 = vcmp.eq.s32.totalorder %v4307_v55, %v4642_v36  ;;  %vm1620_vm1 = vcmp.eq.s32.totalorder %v4307_v55, %v4652_v27  ;;  %vm1694_vm5 = vcmp.eq.s32.totalorder %v4307_v55, %v4655_v14 }
 0x37b   : > { %v1736_v61 = vadd.f32 %v1720_v38, %v1662_v33  ;;  %v1661_v43 = vadd.f32 %v1645_v58, %v1567_v56  ;;  %v1458_v30 = vsel %vm1434_vm2, %v4607_v19, 0.0  ;;  %v1550_v17 = vsel %vm1526_vm4, %v4629_v40, 0.0 }
 0x37c   : > { %v1566_v6 = vadd.f32 %v1550_v17, %v1458_v30  ;;  %v1644_v7 = vsel %vm1620_vm1, %v4645_v9, 0.0  ;;  %vm1433_vm3 = vcmp.eq.s32.totalorder %v4307_v55, %v4422_v1  ;;  %v1718_v37 = vsel %vm1694_vm5, %v4658_v39, 0.0 }
 0x37d   : > { %1773 = vmatprep.subr.mxu1 %v1736_v61  ;;  %v1735_v49 = vadd.f32 %v1719_v48, %v1661_v43  ;;  %v1457_v11 = vsel %vm1433_vm3, %v4425_v8, 0.0  ;;  %vm1525_vm7 = vcmp.eq.s32.totalorder %v4307_v55, %v4439_v28  ;;  %vm1619_vm14 = vcmp.eq.s32.totalorder %v4307_v55, %v4472_v20 }
 0x37e   : > { %v1660_v38 = vadd.f32 %v1644_v7, %v1566_v6  ;;  %v1549_v57 = vsel %vm1525_vm7, %v4442_v25, 0.0  ;;  %vm1693_vm9 = vcmp.eq.s32.totalorder %v4307_v55, %v4475_v21  ;;  %v1643_v29 = vsel %vm1619_vm14, %v4459_v3, 0.0 }
 0x37f   : > { %1774 = vmatpush1.msra.mxu1 %v1735_v49  ;;  %v1565_v31 = vadd.f32 %v1549_v57, %v1457_v11  ;;  %v1717_v33 = vsel %vm1693_vm9, %v4480_v35, 0.0  ;;  %vm1432_vm12 = vcmp.eq.s32.totalorder %v5792_v59, %v4612_v2  ;;  %vm1524_vm11 = vcmp.eq.s32.totalorder %v5792_v59, %v4642_v36 }
 0x380   : > { %v1734_v56 = vadd.f32 %v1718_v37, %v1660_v38  ;;  %v1456_v58 = vsel %vm1432_vm12, %v4607_v19, 0.0  ;;  %vm1618_vm13 = vcmp.eq.s32.totalorder %v5792_v59, %v4652_v27  ;;  %v1548_v61 = vsel %vm1524_vm11, %v4629_v40, 0.0  ;;  %v3235_v38 = vld [vmem:[%s3704_s17] sm:$0xff] }
 0x381   : > { %v1659_v48 = vadd.f32 %v1643_v29, %v1565_v31  ;;  %v1642_v43 = vsel %vm1618_vm13, %v4645_v9, 0.0  ;;  %vm1692_vm8 = vcmp.eq.s32.totalorder %v5792_v59, %v4655_v14  ;;  %v1564_v30 = vadd.f32 %v1548_v61, %v1456_v58 }
 0x382   : > { %1775 = vmatprep.subr.mxu1 %v1734_v56  ;;  %v1716_v2 = vsel %vm1692_vm8, %v4658_v39, 0.0  ;;  %vm1431_vm15 = vcmp.eq.s32.totalorder %v5792_v59, %v4422_v1  ;;  %vm1523_vm10 = vcmp.eq.s32.totalorder %v5792_v59, %v4439_v28  ;;  %vm1617_vm6 = vcmp.eq.s32.totalorder %v5792_v59, %v4472_v20 }
 0x383   : > { %v1733_v19 = vadd.f32 %v1717_v33, %v1659_v48  ;;  %v1455_v36 = vsel %vm1431_vm15, %v4425_v8, 0.0  ;;  %v1547_v40 = vsel %vm1523_vm10, %v4442_v25, 0.0  ;;  %v1658_v9 = vadd.f32 %v1642_v43, %v1564_v30 }
 0x384   : > { %v1563_v27 = vadd.f32 %v1547_v40, %v1455_v36  ;;  %v1641_v14 = vsel %vm1617_vm6, %v4459_v3, 0.0  ;;  %vm1691_vm2 = vcmp.eq.s32.totalorder %v5792_v59, %v4475_v21  ;;  %vm1941_vm4 = vcmp.eq.s32.totalorder %v4310_v51, %v4702_v52 }
 0x385   : > { %1776 = vmatpush1.msra.mxu1 %v1733_v19  ;;  %v1715_v1 = vsel %vm1691_vm2, %v4480_v35, 0.0  ;;  %vm2177_vm1 = vcmp.eq.s32.totalorder %v4310_v51, %v4727_v62  ;;  %vm2415_vm5 = vcmp.eq.s32.totalorder %v4310_v51, %v4730_v24  ;;  %v1732_v8 = vadd.f32 %v1716_v2, %v1658_v9  ;;  %v3236_v19 = vld [vmem:[%s3704_s17 + $0x8] sm:$0xff] }
 0x386   : > { %v1657_v28 = vadd.f32 %v1641_v14, %v1563_v27  ;;  %v2013_v25 = vsel %vm1941_vm4, %v4689_v60, 0.0  ;;  %v2249_v3 = vsel %vm2177_vm1, %v4715_v22, 0.0  ;;  %v2487_v21 = vsel %vm2415_vm5, %v4733_v18, 0.0 }
 0x387   : > { %v2313_v20 = vadd.f32 %v2249_v3, %v2013_v25  ;;  %vm2633_vm3 = vcmp.eq.s32.totalorder %v4310_v51, %v4736_v45  ;;  %vm1940_vm7 = vcmp.eq.s32.totalorder %v4310_v51, %v4537_v16  ;;  %1777 = vmatprep.subr.mxu1 %v1732_v8  ;;  %vm2176_vm14 = vcmp.eq.s32.totalorder %v4310_v51, %v4540_v5 }
 0x388   : > { %v1731_v35 = vadd.f32 %v1715_v1, %v1657_v28  ;;  %v2705_v39 = vsel %vm2633_vm3, %v4740_v13, 0.0  ;;  %v2012_v17 = vsel %vm1940_vm7, %v4523_v4, 0.0  ;;  %v2248_v7 = vsel %vm2176_vm14, %v4543_v10, 0.0 }
 0x389   : > { %v2551_v6 = vadd.f32 %v2487_v21, %v2313_v20  ;;  %vm2414_vm9 = vcmp.eq.s32.totalorder %v4310_v51, %v4555_v12  ;;  %vm2632_vm12 = vcmp.eq.s32.totalorder %v4310_v51, %v4558_v53  ;;  %v2312_v49 = vadd.f32 %v2248_v7, %v2012_v17 }
 0x38a   : > { %1778 = vmatpush1.msra.mxu1 %v1731_v35  ;;  %v2486_v37 = vsel %vm2414_vm9, %v4561_v26, 0.0  ;;  %v2704_v11 = vsel %vm2632_vm12, %v4604_v34, 0.0  ;;  %vm1939_vm11 = vcmp.eq.s32.totalorder %v4313_v63, %v4702_v52  ;;  %vm2175_vm13 = vcmp.eq.s32.totalorder %v4313_v63, %v4727_v62 }
 0x38b   : > { %3074 = vmatmul.mubr.msk.f32.vlgmr.msra.gmra.mxu1 %vm356_vm0, %v3235_v38  ;;  %v2769_v57 = vadd.f32 %v2705_v39, %v2551_v6  ;;  %v2011_v31 = vsel %vm1939_vm11, %v4689_v60, 0.0  ;;  %vm2413_vm8 = vcmp.eq.s32.totalorder %v4313_v63, %v4730_v24  ;;  %v2550_v51 = vadd.f32 %v2486_v37, %v2312_v49 }
 0x38c   : > { %v2247_v29 = vsel %vm2175_vm13, %v4715_v22, 0.0  ;;  %v2485_v33 = vsel %vm2413_vm8, %v4733_v18, 0.0  ;;  %vm2631_vm15 = vcmp.eq.s32.totalorder %v4313_v63, %v4736_v45  ;;  %1817 = vmatprep.mubr.f32.mxu1 %v5789_v47  ;;  %vm1938_vm10 = vcmp.eq.s32.totalorder %v4313_v63, %v4537_v16 }
 0x38d   : > { %2802 = vmatprep.subr.mxu1 %v2769_v57  ;;  %v2311_v56 = vadd.f32 %v2247_v29, %v2011_v31  ;;  %v2703_v58 = vsel %vm2631_vm15, %v4740_v13, 0.0  ;;  %vm2174_vm6 = vcmp.eq.s32.totalorder %v4313_v63, %v4540_v5  ;;  %v2768_v48 = vadd.f32 %v2704_v11, %v2550_v51 }
 0x38e   : > { %v2010_v61 = vsel %vm1938_vm10, %v4523_v4, 0.0  ;;  %v2246_v43 = vsel %vm2174_vm6, %v4543_v10, 0.0  ;;  %vm2412_vm2 = vcmp.eq.s32.totalorder %v4313_v63, %v4555_v12  ;;  %vm2630_vm4 = vcmp.eq.s32.totalorder %v4313_v63, %v4558_v53 }
 0x38f   : > { %v2549_v30 = vadd.f32 %v2485_v33, %v2311_v56  ;;  %v2310_v47 = vadd.f32 %v2246_v43, %v2010_v61  ;;  %v2484_v2 = vsel %vm2412_vm2, %v4561_v26, 0.0  ;;  %3075 = vmatmul.mubr.msk.f32.gmra.mxu1 %vm356_vm0, %v3236_v19  ;;  %v2702_v36 = vsel %vm2630_vm4, %v4604_v34, 0.0 }
 0x390   : > { %2803 = vmatpush1.msra.mxu1 %v2768_v48  ;;  %vm1937_vm1 = vcmp.eq.s32.totalorder %v4316_v0, %v4702_v52  ;;  %vm2173_vm5 = vcmp.eq.s32.totalorder %v4316_v0, %v4727_v62  ;;  %vm2411_vm3 = vcmp.eq.s32.totalorder %v4316_v0, %v4730_v24  ;;  %2866 = vmatprep.mubr.f32.mxu1 %v4216_v32 }
 0x391   : > { %v2767_v40 = vadd.f32 %v2703_v58, %v2549_v30  ;;  %v2548_v9 = vadd.f32 %v2484_v2, %v2310_v47  ;;  %v2009_v63 = vsel %vm1937_vm1, %v4689_v60, 0.0  ;;  %v2245_v27 = vsel %vm2173_vm5, %v4715_v22, 0.0 }
 0x392   : > { %v2309_v14 = vadd.f32 %v2245_v27, %v2009_v63  ;;  %v2483_v1 = vsel %vm2411_vm3, %v4733_v18, 0.0  ;;  %vm2629_vm0 = vcmp.eq.s32.totalorder %v4316_v0, %v4736_v45  ;;  %vm1936_vm7 = vcmp.eq.s32.totalorder %v4316_v0, %v4537_v16  ;;  %v5858_v27 = vld [vmem:[#allocation28_spill] sm:$0xff] }
 0x393   : > { %2804 = vmatprep.subr.mxu1 %v2767_v40  ;;  %v2766_v8 = vadd.f32 %v2702_v36, %v2548_v9  ;;  %v2701_v28 = vsel %vm2629_vm0, %v4740_v13, 0.0  ;;  %v2008_v32 = vsel %vm1936_vm7, %v4523_v4, 0.0  ;;  %vm2172_vm14 = vcmp.eq.s32.totalorder %v4316_v0, %v4540_v5 }
 0x394   : > { %v2547_v25 = vadd.f32 %v2483_v1, %v2309_v14  ;;  %v2244_v3 = vsel %vm2172_vm14, %v4543_v10, 0.0  ;;  %vm2410_vm9 = vcmp.eq.s32.totalorder %v4316_v0, %v4555_v12  ;;  %vm2628_vm12 = vcmp.eq.s32.totalorder %v4316_v0, %v4558_v53 }
 0x395   : > { %2805 = vmatpush1.msra.mxu1 %v2766_v8  ;;  %v2308_v20 = vadd.f32 %v2244_v3, %v2008_v32  ;;  %v2482_v21 = vsel %vm2410_vm9, %v4561_v26, 0.0  ;;  %v2700_v35 = vsel %vm2628_vm12, %v4604_v34, 0.0  ;;  %vm1935_vm11 = vcmp.eq.s32.totalorder %v4319_v46, %v4702_v52 }
 0x396   : > { %v2765_v39 = vadd.f32 %v2701_v28, %v2547_v25  ;;  %v2007_v17 = vsel %vm1935_vm11, %v4689_v60, 0.0  ;;  %vm2171_vm13 = vcmp.eq.s32.totalorder %v4319_v46, %v4727_v62  ;;  %vm2409_vm8 = vcmp.eq.s32.totalorder %v4319_v46, %v4730_v24 }
 0x397   : > { %v2546_v6 = vadd.f32 %v2482_v21, %v2308_v20  ;;  %v2243_v0 = vsel %vm2171_vm13, %v4715_v22, 0.0  ;;  %v2481_v7 = vsel %vm2409_vm8, %v4733_v18, 0.0  ;;  %vm2627_vm15 = vcmp.eq.s32.totalorder %v4319_v46, %v4736_v45 }
 0x398   : > { %2806 = vmatprep.subr.mxu1 %v2765_v39  ;;  %v2307_v49 = vadd.f32 %v2243_v0, %v2007_v17  ;;  %v2699_v37 = vsel %vm2627_vm15, %v4740_v13, 0.0  ;;  %vm1934_vm10 = vcmp.eq.s32.totalorder %v4319_v46, %v4537_v16  ;;  %vm2170_vm6 = vcmp.eq.s32.totalorder %v4319_v46, %v4540_v5  ;;  %v5859_v0 = vld [vmem:[#allocation21_spill] sm:$0xff] }
 0x399   : > { %v2764_v11 = vadd.f32 %v2700_v35, %v2546_v6  ;;  %v2006_v38 = vsel %vm1934_vm10, %v4523_v4, 0.0  ;;  %v2242_v57 = vsel %vm2170_vm6, %v4543_v10, 0.0  ;;  %vm2408_vm2 = vcmp.eq.s32.totalorder %v4319_v46, %v4555_v12 }
 0x39a   : > { %v2545_v31 = vadd.f32 %v2481_v7, %v2307_v49  ;;  %v2306_v51 = vadd.f32 %v2242_v57, %v2006_v38  ;;  %v2480_v29 = vsel %vm2408_vm2, %v4561_v26, 0.0  ;;  %vm2626_vm4 = vcmp.eq.s32.totalorder %v4319_v46, %v4558_v53 }
 0x39b   : > { %2807 = vmatpush1.msra.mxu1 %v2764_v11  ;;  %v2698_v33 = vsel %vm2626_vm4, %v4604_v34, 0.0  ;;  %vm1933_vm1 = vcmp.eq.s32.totalorder %v4322_v41, %v4702_v52  ;;  %vm2169_vm5 = vcmp.eq.s32.totalorder %v4322_v41, %v4727_v62  ;;  %vm2407_vm3 = vcmp.eq.s32.totalorder %v4322_v41, %v4730_v24 }
 0x39c   : > { %v2763_v56 = vadd.f32 %v2699_v37, %v2545_v31  ;;  %v2544_v58 = vadd.f32 %v2480_v29, %v2306_v51  ;;  %v2005_v48 = vsel %vm1933_vm1, %v4689_v60, 0.0  ;;  %v2241_v61 = vsel %vm2169_vm5, %v4715_v22, 0.0 }
 0x39d   : > { %v2305_v43 = vadd.f32 %v2241_v61, %v2005_v48  ;;  %v2479_v46 = vsel %vm2407_vm3, %v4733_v18, 0.0  ;;  %vm2625_vm0 = vcmp.eq.s32.totalorder %v4322_v41, %v4736_v45  ;;  %vm1932_vm7 = vcmp.eq.s32.totalorder %v4322_v41, %v4537_v16 }
 0x39e   : > { %2808 = vmatprep.subr.mxu1 %v2763_v56  ;;  %v2762_v30 = vadd.f32 %v2698_v33, %v2544_v58  ;;  %v2697_v47 = vsel %vm2625_vm0, %v4740_v13, 0.0  ;;  %v2004_v2 = vsel %vm1932_vm7, %v4523_v4, 0.0  ;;  %vm2168_vm14 = vcmp.eq.s32.totalorder %v4322_v41, %v4540_v5 }
 0x39f   : > { %v2543_v19 = vadd.f32 %v2479_v46, %v2305_v43  ;;  %v2240_v36 = vsel %vm2168_vm14, %v4543_v10, 0.0  ;;  %vm2406_vm9 = vcmp.eq.s32.totalorder %v4322_v41, %v4555_v12  ;;  %vm2624_vm12 = vcmp.eq.s32.totalorder %v4322_v41, %v4558_v53 }
 0x3a0   : > { %2809 = vmatpush1.msra.mxu1 %v2762_v30  ;;  %v2304_v40 = vadd.f32 %v2240_v36, %v2004_v2  ;;  %v2478_v9 = vsel %vm2406_vm9, %v4561_v26, 0.0  ;;  %v2696_v63 = vsel %vm2624_vm12, %v4604_v34, 0.0  ;;  %vm1931_vm11 = vcmp.eq.s32.totalorder %v5858_v27, %v4702_v52 }
 0x3a1   : > { %v2761_v14 = vadd.f32 %v2697_v47, %v2543_v19  ;;  %v2003_v1 = vsel %vm1931_vm11, %v4689_v60, 0.0  ;;  %vm2167_vm13 = vcmp.eq.s32.totalorder %v5858_v27, %v4727_v62  ;;  %vm2405_vm8 = vcmp.eq.s32.totalorder %v5858_v27, %v4730_v24 }
 0x3a2   : > { %v2542_v8 = vadd.f32 %v2478_v9, %v2304_v40  ;;  %v2239_v41 = vsel %vm2167_vm13, %v4715_v22, 0.0  ;;  %v2477_v28 = vsel %vm2405_vm8, %v4733_v18, 0.0  ;;  %vm2623_vm15 = vcmp.eq.s32.totalorder %v5858_v27, %v4736_v45 }
 0x3a3   : > { %2810 = vmatprep.subr.mxu1 %v2761_v14  ;;  %v2303_v32 = vadd.f32 %v2239_v41, %v2003_v1  ;;  %v2695_v25 = vsel %vm2623_vm15, %v4740_v13, 0.0  ;;  %vm1930_vm10 = vcmp.eq.s32.totalorder %v5858_v27, %v4537_v16  ;;  %vm2166_vm6 = vcmp.eq.s32.totalorder %v5858_v27, %v4540_v5 }
 0x3a4   : > { %v2760_v3 = vadd.f32 %v2696_v63, %v2542_v8  ;;  %v2002_v20 = vsel %vm1930_vm10, %v4523_v4, 0.0  ;;  %v2238_v21 = vsel %vm2166_vm6, %v4543_v10, 0.0  ;;  %vm2404_vm2 = vcmp.eq.s32.totalorder %v5858_v27, %v4555_v12 }
 0x3a5   : > { %v2541_v35 = vadd.f32 %v2477_v28, %v2303_v32  ;;  %v2302_v39 = vadd.f32 %v2238_v21, %v2002_v20  ;;  %v2476_v17 = vsel %vm2404_vm2, %v4561_v26, 0.0  ;;  %vm2622_vm4 = vcmp.eq.s32.totalorder %v5858_v27, %v4558_v53 }
 0x3a6   : > { %2811 = vmatpush1.msra.mxu1 %v2760_v3  ;;  %v2694_v6 = vsel %vm2622_vm4, %v4604_v34, 0.0  ;;  %vm1929_vm1 = vcmp.eq.s32.totalorder %v5859_v0, %v4702_v52  ;;  %vm2165_vm5 = vcmp.eq.s32.totalorder %v5859_v0, %v4727_v62  ;;  %vm2403_vm3 = vcmp.eq.s32.totalorder %v5859_v0, %v4730_v24 }
 0x3a7   : > { %v2759_v7 = vadd.f32 %v2695_v25, %v2541_v35  ;;  %v2540_v49 = vadd.f32 %v2476_v17, %v2302_v39  ;;  %v2001_v37 = vsel %vm1929_vm1, %v4689_v60, 0.0  ;;  %v2237_v11 = vsel %vm2165_vm5, %v4715_v22, 0.0 }
 0x3a8   : > { %v2301_v38 = vadd.f32 %v2237_v11, %v2001_v37  ;;  %v2475_v57 = vsel %vm2403_vm3, %v4733_v18, 0.0  ;;  %vm2621_vm0 = vcmp.eq.s32.totalorder %v5859_v0, %v4736_v45  ;;  %vm1928_vm7 = vcmp.eq.s32.totalorder %v5859_v0, %v4537_v16 }
 0x3a9   : > { %2812 = vmatprep.subr.mxu1 %v2759_v7  ;;  %v2758_v31 = vadd.f32 %v2694_v6, %v2540_v49  ;;  %v2693_v51 = vsel %vm2621_vm0, %v4740_v13, 0.0  ;;  %v2000_v29 = vsel %vm1928_vm7, %v4523_v4, 0.0  ;;  %vm2164_vm14 = vcmp.eq.s32.totalorder %v5859_v0, %v4540_v5 }
 0x3aa   : > { %v2539_v33 = vadd.f32 %v2475_v57, %v2301_v38  ;;  %v2236_v56 = vsel %vm2164_vm14, %v4543_v10, 0.0  ;;  %vm2402_vm9 = vcmp.eq.s32.totalorder %v5859_v0, %v4555_v12  ;;  %vm2620_vm12 = vcmp.eq.s32.totalorder %v5859_v0, %v4558_v53 }
 0x3ab   : > { %2813 = vmatpush1.msra.mxu1 %v2758_v31  ;;  %v2300_v58 = vadd.f32 %v2236_v56, %v2000_v29  ;;  %v2474_v48 = vsel %vm2402_vm9, %v4561_v26, 0.0  ;;  %v2692_v61 = vsel %vm2620_vm12, %v4604_v34, 0.0  ;;  %v1830_v43 = vadd.s32 64, %v5792_v59 }
 0x3ac   : > { %v2757_v46 = vadd.f32 %v2693_v51, %v2539_v33  ;;  %vm1925_vm11 = vcmp.eq.s32.totalorder %v4285_v15, %v4702_v52  ;;  %vm2161_vm13 = vcmp.eq.s32.totalorder %v4285_v15, %v4727_v62  ;;  %vm2399_vm8 = vcmp.eq.s32.totalorder %v4285_v15, %v4730_v24 }
 0x3ad   : > { %v2538_v30 = vadd.f32 %v2474_v48, %v2300_v58  ;;  %vm1927_vm15 = vcmp.eq.s32.totalorder %v1830_v43, %v4702_v52  ;;  %vm2163_vm10 = vcmp.eq.s32.totalorder %v1830_v43, %v4727_v62  ;;  %vm2401_vm6 = vcmp.eq.s32.totalorder %v1830_v43, %v4730_v24 }
 0x3ae   : > { %2814 = vmatprep.subr.mxu1 %v2757_v46  ;;  %v1999_v47 = vsel %vm1927_vm15, %v4689_v60, 0.0  ;;  %v2235_v2 = vsel %vm2163_vm10, %v4715_v22, 0.0  ;;  %v2473_v19 = vsel %vm2401_vm6, %v4733_v18, 0.0  ;;  %vm2619_vm2 = vcmp.eq.s32.totalorder %v1830_v43, %v4736_v45 }
 0x3af   : > { %v2756_v36 = vadd.f32 %v2692_v61, %v2538_v30  ;;  %v2299_v40 = vadd.f32 %v2235_v2, %v1999_v47  ;;  %v2691_v9 = vsel %vm2619_vm2, %v4740_v13, 0.0  ;;  %vm1926_vm4 = vcmp.eq.s32.totalorder %v1830_v43, %v4537_v16 }
 0x3b0   : > { %v1998_v63 = vsel %vm1926_vm4, %v4523_v4, 0.0  ;;  %vm2162_vm1 = vcmp.eq.s32.totalorder %v1830_v43, %v4540_v5  ;;  %vm2400_vm5 = vcmp.eq.s32.totalorder %v1830_v43, %v4555_v12  ;;  %vm2618_vm3 = vcmp.eq.s32.totalorder %v1830_v43, %v4558_v53 }
 0x3b1   : > { %2815 = vmatpush1.msra.mxu1 %v2756_v36  ;;  %v2537_v27 = vadd.f32 %v2473_v19, %v2299_v40  ;;  %v2234_v14 = vsel %vm2162_vm1, %v4543_v10, 0.0  ;;  %v2472_v1 = vsel %vm2400_vm5, %v4561_v26, 0.0  ;;  %v2690_v8 = vsel %vm2618_vm3, %v4604_v34, 0.0 }
 0x3b2   : > { %v2298_v41 = vadd.f32 %v2234_v14, %v1998_v63  ;;  %v1997_v28 = vsel %vm1925_vm11, %v4689_v60, 0.0  ;;  %v2233_v32 = vsel %vm2161_vm13, %v4715_v22, 0.0  ;;  %v2471_v25 = vsel %vm2399_vm8, %v4733_v18, 0.0 }
 0x3b3   : > { %v2755_v3 = vadd.f32 %v2691_v9, %v2537_v27  ;;  %v2297_v20 = vadd.f32 %v2233_v32, %v1997_v28  ;;  %vm2617_vm0 = vcmp.eq.s32.totalorder %v4285_v15, %v4736_v45  ;;  %vm1924_vm7 = vcmp.eq.s32.totalorder %v4285_v15, %v4537_v16 }
 0x3b4   : > { %v2536_v21 = vadd.f32 %v2472_v1, %v2298_v41  ;;  %v2689_v35 = vsel %vm2617_vm0, %v4740_v13, 0.0  ;;  %v1996_v39 = vsel %vm1924_vm7, %v4523_v4, 0.0  ;;  %vm2160_vm14 = vcmp.eq.s32.totalorder %v4285_v15, %v4540_v5 }
 0x3b5   : > { %2816 = vmatprep.subr.mxu1 %v2755_v3  ;;  %v2535_v17 = vadd.f32 %v2471_v25, %v2297_v20  ;;  %v2232_v6 = vsel %vm2160_vm14, %v4543_v10, 0.0  ;;  %vm2398_vm9 = vcmp.eq.s32.totalorder %v4285_v15, %v4555_v12  ;;  %vm2616_vm12 = vcmp.eq.s32.totalorder %v4285_v15, %v4558_v53 }
 0x3b6   : > { %v2754_v0 = vadd.f32 %v2690_v8, %v2536_v21  ;;  %v2296_v7 = vadd.f32 %v2232_v6, %v1996_v39  ;;  %v2470_v49 = vsel %vm2398_vm9, %v4561_v26, 0.0  ;;  %v2688_v37 = vsel %vm2616_vm12, %v4604_v34, 0.0 }
 0x3b7   : > { %v2753_v11 = vadd.f32 %v2689_v35, %v2535_v17  ;;  %vm1923_vm11 = vcmp.eq.s32.totalorder %v4288_v23, %v4702_v52  ;;  %vm2159_vm13 = vcmp.eq.s32.totalorder %v4288_v23, %v4727_v62  ;;  %vm2397_vm8 = vcmp.eq.s32.totalorder %v4288_v23, %v4730_v24 }
 0x3b8   : > { %2817 = vmatpush1.msra.mxu1 %v2754_v0  ;;  %v2534_v38 = vadd.f32 %v2470_v49, %v2296_v7  ;;  %v1995_v15 = vsel %vm1923_vm11, %v4689_v60, 0.0  ;;  %v2231_v57 = vsel %vm2159_vm13, %v4715_v22, 0.0  ;;  %v2469_v31 = vsel %vm2397_vm8, %v4733_v18, 0.0 }
 0x3b9   : > { %2818 = vmatprep.subr.mxu1 %v2753_v11  ;;  %v2295_v51 = vadd.f32 %v2231_v57, %v1995_v15  ;;  %vm2615_vm15 = vcmp.eq.s32.totalorder %v4288_v23, %v4736_v45  ;;  %vm1922_vm10 = vcmp.eq.s32.totalorder %v4288_v23, %v4537_v16  ;;  %vm2158_vm6 = vcmp.eq.s32.totalorder %v4288_v23, %v4540_v5 }
 0x3ba   : > { %v2752_v29 = vadd.f32 %v2688_v37, %v2534_v38  ;;  %v2687_v33 = vsel %vm2615_vm15, %v4740_v13, 0.0  ;;  %v1994_v56 = vsel %vm1922_vm10, %v4523_v4, 0.0  ;;  %v2230_v58 = vsel %vm2158_vm6, %v4543_v10, 0.0 }
 0x3bb   : > { %v2533_v48 = vadd.f32 %v2469_v31, %v2295_v51  ;;  %v2294_v61 = vadd.f32 %v2230_v58, %v1994_v56  ;;  %vm2396_vm2 = vcmp.eq.s32.totalorder %v4288_v23, %v4555_v12  ;;  %vm2614_vm4 = vcmp.eq.s32.totalorder %v4288_v23, %v4558_v53 }
 0x3bc   : > { %2819 = vmatpush1.msra.mxu1 %v2752_v29  ;;  %v2468_v43 = vsel %vm2396_vm2, %v4561_v26, 0.0  ;;  %v2686_v46 = vsel %vm2614_vm4, %v4604_v34, 0.0  ;;  %vm1921_vm1 = vcmp.eq.s32.totalorder %v4291_v44, %v4702_v52  ;;  %vm2157_vm5 = vcmp.eq.s32.totalorder %v4291_v44, %v4727_v62 }
 0x3bd   : > { %v2751_v30 = vadd.f32 %v2687_v33, %v2533_v48  ;;  %v2532_v47 = vadd.f32 %v2468_v43, %v2294_v61  ;;  %v1993_v2 = vsel %vm1921_vm1, %v4689_v60, 0.0  ;;  %v2229_v19 = vsel %vm2157_vm5, %v4715_v22, 0.0 }
 0x3be   : > { %v2293_v36 = vadd.f32 %v2229_v19, %v1993_v2  ;;  %vm2395_vm3 = vcmp.eq.s32.totalorder %v4291_v44, %v4730_v24  ;;  %vm2613_vm0 = vcmp.eq.s32.totalorder %v4291_v44, %v4736_v45  ;;  %vm1920_vm7 = vcmp.eq.s32.totalorder %v4291_v44, %v4537_v16 }
 0x3bf   : > { %2820 = vmatprep.subr.mxu1 %v2751_v30  ;;  %v2750_v23 = vadd.f32 %v2686_v46, %v2532_v47  ;;  %v2467_v40 = vsel %vm2395_vm3, %v4733_v18, 0.0  ;;  %v2685_v9 = vsel %vm2613_vm0, %v4740_v13, 0.0  ;;  %v1992_v63 = vsel %vm1920_vm7, %v4523_v4, 0.0 }
 0x3c0   : > { %v2531_v27 = vadd.f32 %v2467_v40, %v2293_v36  ;;  %vm2156_vm14 = vcmp.eq.s32.totalorder %v4291_v44, %v4540_v5  ;;  %vm2394_vm9 = vcmp.eq.s32.totalorder %v4291_v44, %v4555_v12  ;;  %vm2612_vm12 = vcmp.eq.s32.totalorder %v4291_v44, %v4558_v53 }
 0x3c1   : > { %2821 = vmatpush1.msra.mxu1 %v2750_v23  ;;  %v2228_v14 = vsel %vm2156_vm14, %v4543_v10, 0.0  ;;  %v2466_v1 = vsel %vm2394_vm9, %v4561_v26, 0.0  ;;  %v2684_v8 = vsel %vm2612_vm12, %v4604_v34, 0.0  ;;  %vm1919_vm11 = vcmp.eq.s32.totalorder %v4294_v50, %v4702_v52 }
 0x3c2   : > { %v2749_v41 = vadd.f32 %v2685_v9, %v2531_v27  ;;  %v2292_v28 = vadd.f32 %v2228_v14, %v1992_v63  ;;  %v1991_v32 = vsel %vm1919_vm11, %v4689_v60, 0.0  ;;  %vm2155_vm13 = vcmp.eq.s32.totalorder %v4294_v50, %v4727_v62 }
 0x3c3   : > { %v2227_v25 = vsel %vm2155_vm13, %v4715_v22, 0.0  ;;  %vm2393_vm8 = vcmp.eq.s32.totalorder %v4294_v50, %v4730_v24  ;;  %vm2611_vm15 = vcmp.eq.s32.totalorder %v4294_v50, %v4736_v45  ;;  %vm1918_vm10 = vcmp.eq.s32.totalorder %v4294_v50, %v4537_v16 }
 0x3c4   : > { %2822 = vmatprep.subr.mxu1 %v2749_v41  ;;  %v2530_v44 = vadd.f32 %v2466_v1, %v2292_v28  ;;  %v2291_v3 = vadd.f32 %v2227_v25, %v1991_v32  ;;  %v2465_v20 = vsel %vm2393_vm8, %v4733_v18, 0.0  ;;  %v2683_v21 = vsel %vm2611_vm15, %v4740_v13, 0.0 }
 0x3c5   : > { %v1990_v35 = vsel %vm1918_vm10, %v4523_v4, 0.0  ;;  %vm2154_vm6 = vcmp.eq.s32.totalorder %v4294_v50, %v4540_v5  ;;  %vm2392_vm2 = vcmp.eq.s32.totalorder %v4294_v50, %v4555_v12  ;;  %vm2610_vm4 = vcmp.eq.s32.totalorder %v4294_v50, %v4558_v53 }
 0x3c6   : > { %v2748_v39 = vadd.f32 %v2684_v8, %v2530_v44  ;;  %v2529_v17 = vadd.f32 %v2465_v20, %v2291_v3  ;;  %v2226_v6 = vsel %vm2154_vm6, %v4543_v10, 0.0  ;;  %v2464_v0 = vsel %vm2392_vm2, %v4561_v26, 0.0 }
 0x3c7   : > { %v2290_v7 = vadd.f32 %v2226_v6, %v1990_v35  ;;  %v2682_v49 = vsel %vm2610_vm4, %v4604_v34, 0.0  ;;  %vm1917_vm1 = vcmp.eq.s32.totalorder %v4301_v54, %v4702_v52  ;;  %vm2153_vm5 = vcmp.eq.s32.totalorder %v4301_v54, %v4727_v62 }
 0x3c8   : > { %2823 = vmatpush1.msra.mxu1 %v2748_v39  ;;  %v2747_v37 = vadd.f32 %v2683_v21, %v2529_v17  ;;  %v1989_v11 = vsel %vm1917_vm1, %v4689_v60, 0.0  ;;  %v2225_v50 = vsel %vm2153_vm5, %v4715_v22, 0.0  ;;  %vm2391_vm3 = vcmp.eq.s32.totalorder %v4301_v54, %v4730_v24 }
 0x3c9   : > { %v2528_v38 = vadd.f32 %v2464_v0, %v2290_v7  ;;  %v2289_v15 = vadd.f32 %v2225_v50, %v1989_v11  ;;  %v2463_v57 = vsel %vm2391_vm3, %v4733_v18, 0.0  ;;  %vm2609_vm0 = vcmp.eq.s32.totalorder %v4301_v54, %v4736_v45 }
 0x3ca   : > { %2824 = vmatprep.subr.mxu1 %v2747_v37  ;;  %v2681_v31 = vsel %vm2609_vm0, %v4740_v13, 0.0  ;;  %vm1916_vm7 = vcmp.eq.s32.totalorder %v4301_v54, %v4537_v16  ;;  %vm2152_vm14 = vcmp.eq.s32.totalorder %v4301_v54, %v4540_v5  ;;  %vm2390_vm9 = vcmp.eq.s32.totalorder %v4301_v54, %v4555_v12 }
 0x3cb   : > { %v2746_v51 = vadd.f32 %v2682_v49, %v2528_v38  ;;  %v2527_v29 = vadd.f32 %v2463_v57, %v2289_v15  ;;  %v1988_v33 = vsel %vm1916_vm7, %v4523_v4, 0.0  ;;  %v2224_v56 = vsel %vm2152_vm14, %v4543_v10, 0.0 }
 0x3cc   : > { %v2288_v58 = vadd.f32 %v2224_v56, %v1988_v33  ;;  %v2462_v48 = vsel %vm2390_vm9, %v4561_v26, 0.0  ;;  %vm2608_vm12 = vcmp.eq.s32.totalorder %v4301_v54, %v4558_v53  ;;  %vm1915_vm11 = vcmp.eq.s32.totalorder %v4304_v42, %v4702_v52 }
 0x3cd   : > { %2825 = vmatpush1.msra.mxu1 %v2746_v51  ;;  %v2745_v61 = vadd.f32 %v2681_v31, %v2527_v29  ;;  %v2680_v43 = vsel %vm2608_vm12, %v4604_v34, 0.0  ;;  %v1987_v46 = vsel %vm1915_vm11, %v4689_v60, 0.0  ;;  %vm2151_vm13 = vcmp.eq.s32.totalorder %v4304_v42, %v4727_v62 }
 0x3ce   : > { %v2526_v30 = vadd.f32 %v2462_v48, %v2288_v58  ;;  %v2223_v47 = vsel %vm2151_vm13, %v4715_v22, 0.0  ;;  %vm2389_vm8 = vcmp.eq.s32.totalorder %v4304_v42, %v4730_v24  ;;  %vm2607_vm15 = vcmp.eq.s32.totalorder %v4304_v42, %v4736_v45 }
 0x3cf   : > { %2826 = vmatprep.subr.mxu1 %v2745_v61  ;;  %v2287_v54 = vadd.f32 %v2223_v47, %v1987_v46  ;;  %v2461_v2 = vsel %vm2389_vm8, %v4733_v18, 0.0  ;;  %v2679_v19 = vsel %vm2607_vm15, %v4740_v13, 0.0  ;;  %vm1914_vm10 = vcmp.eq.s32.totalorder %v4304_v42, %v4537_v16 }
 0x3d0   : > { %v2744_v36 = vadd.f32 %v2680_v43, %v2526_v30  ;;  %v1986_v23 = vsel %vm1914_vm10, %v4523_v4, 0.0  ;;  %vm2150_vm6 = vcmp.eq.s32.totalorder %v4304_v42, %v4540_v5  ;;  %vm2388_vm2 = vcmp.eq.s32.totalorder %v4304_v42, %v4555_v12 }
 0x3d1   : > { %v2525_v40 = vadd.f32 %v2461_v2, %v2287_v54  ;;  %v2222_v9 = vsel %vm2150_vm6, %v4543_v10, 0.0  ;;  %v2460_v63 = vsel %vm2388_vm2, %v4561_v26, 0.0  ;;  %vm2606_vm4 = vcmp.eq.s32.totalorder %v4304_v42, %v4558_v53 }
 0x3d2   : > { %2827 = vmatpush1.msra.mxu1 %v2744_v36  ;;  %v2286_v27 = vadd.f32 %v2222_v9, %v1986_v23  ;;  %v2678_v14 = vsel %vm2606_vm4, %v4604_v34, 0.0  ;;  %vm1913_vm1 = vcmp.eq.s32.totalorder %v4307_v55, %v4702_v52  ;;  %vm2149_vm5 = vcmp.eq.s32.totalorder %v4307_v55, %v4727_v62 }
 0x3d3   : > { %v2743_v1 = vadd.f32 %v2679_v19, %v2525_v40  ;;  %v1985_v8 = vsel %vm1913_vm1, %v4689_v60, 0.0  ;;  %v2221_v41 = vsel %vm2149_vm5, %v4715_v22, 0.0  ;;  %vm2387_vm3 = vcmp.eq.s32.totalorder %v4307_v55, %v4730_v24 }
 0x3d4   : > { %v2524_v28 = vadd.f32 %v2460_v63, %v2286_v27  ;;  %v2285_v42 = vadd.f32 %v2221_v41, %v1985_v8  ;;  %v2459_v32 = vsel %vm2387_vm3, %v4733_v18, 0.0  ;;  %vm2605_vm0 = vcmp.eq.s32.totalorder %v4307_v55, %v4736_v45 }
 0x3d5   : > { %2828 = vmatprep.subr.mxu1 %v2743_v1  ;;  %v2677_v25 = vsel %vm2605_vm0, %v4740_v13, 0.0  ;;  %vm1912_vm7 = vcmp.eq.s32.totalorder %v4307_v55, %v4537_v16  ;;  %vm2148_vm14 = vcmp.eq.s32.totalorder %v4307_v55, %v4540_v5  ;;  %vm2386_vm9 = vcmp.eq.s32.totalorder %v4307_v55, %v4555_v12 }
 0x3d6   : > { %v2742_v44 = vadd.f32 %v2678_v14, %v2524_v28  ;;  %v2523_v3 = vadd.f32 %v2459_v32, %v2285_v42  ;;  %v1984_v20 = vsel %vm1912_vm7, %v4523_v4, 0.0  ;;  %v2220_v21 = vsel %vm2148_vm14, %v4543_v10, 0.0 }
 0x3d7   : > { %v2284_v35 = vadd.f32 %v2220_v21, %v1984_v20  ;;  %v2458_v39 = vsel %vm2386_vm9, %v4561_v26, 0.0  ;;  %vm2604_vm12 = vcmp.eq.s32.totalorder %v4307_v55, %v4558_v53  ;;  %vm1911_vm11 = vcmp.eq.s32.totalorder %v5792_v59, %v4702_v52 }
 0x3d8   : > { %2829 = vmatpush1.msra.mxu1 %v2742_v44  ;;  %v2741_v17 = vadd.f32 %v2677_v25, %v2523_v3  ;;  %v2676_v6 = vsel %vm2604_vm12, %v4604_v34, 0.0  ;;  %v1983_v0 = vsel %vm1911_vm11, %v4689_v60, 0.0  ;;  %vm2147_vm13 = vcmp.eq.s32.totalorder %v5792_v59, %v4727_v62 }
 0x3d9   : > { %v2522_v7 = vadd.f32 %v2458_v39, %v2284_v35  ;;  %v2219_v49 = vsel %vm2147_vm13, %v4715_v22, 0.0  ;;  %vm2385_vm8 = vcmp.eq.s32.totalorder %v5792_v59, %v4730_v24  ;;  %vm2603_vm15 = vcmp.eq.s32.totalorder %v5792_v59, %v4736_v45 }
 0x3da   : > { %2830 = vmatprep.subr.mxu1 %v2741_v17  ;;  %v2283_v55 = vadd.f32 %v2219_v49, %v1983_v0  ;;  %v2457_v37 = vsel %vm2385_vm8, %v4733_v18, 0.0  ;;  %v2675_v11 = vsel %vm2603_vm15, %v4740_v13, 0.0  ;;  %vm1910_vm10 = vcmp.eq.s32.totalorder %v5792_v59, %v4537_v16 }
 0x3db   : > { %v2740_v50 = vadd.f32 %v2676_v6, %v2522_v7  ;;  %v1982_v38 = vsel %vm1910_vm10, %v4523_v4, 0.0  ;;  %vm2146_vm6 = vcmp.eq.s32.totalorder %v5792_v59, %v4540_v5  ;;  %vm2384_vm2 = vcmp.eq.s32.totalorder %v5792_v59, %v4555_v12 }
 0x3dc   : > { %v2521_v15 = vadd.f32 %v2457_v37, %v2283_v55  ;;  %v2218_v57 = vsel %vm2146_vm6, %v4543_v10, 0.0  ;;  %v2456_v31 = vsel %vm2384_vm2, %v4561_v26, 0.0  ;;  %vm2602_vm4 = vcmp.eq.s32.totalorder %v5792_v59, %v4558_v53 }
 0x3dd   : > { %2831 = vmatpush1.msra.mxu1 %v2740_v50  ;;  %v2282_v51 = vadd.f32 %v2218_v57, %v1982_v38  ;;  %v2674_v29 = vsel %vm2602_vm4, %v4604_v34, 0.0  ;;  %v1853_v33 = vadd.s32 248, %v5792_v59  ;;  %v1852_v56 = vadd.s32 240, %v5792_v59 }
 0x3de   : > { %v2739_v58 = vadd.f32 %v2675_v11, %v2521_v15  ;;  %v5319_v48 = vadd.s32 232, %v5792_v59  ;;  %v5322_v61 = vadd.s32 224, %v5792_v59  ;;  %v5325_v43 = vadd.s32 216, %v5792_v59 }
 0x3df   : > { %v2520_v46 = vadd.f32 %v2456_v31, %v2282_v51  ;;  %vm1973_vm1 = vcmp.eq.s32.totalorder %v1853_v33, %v4702_v52  ;;  %vm2209_vm5 = vcmp.eq.s32.totalorder %v1853_v33, %v4727_v62  ;;  %vm2447_vm3 = vcmp.eq.s32.totalorder %v1853_v33, %v4730_v24 }
 0x3e0   : > { %2832 = vmatprep.subr.mxu1 %v2739_v58  ;;  %v2045_v30 = vsel %vm1973_vm1, %v4689_v60, 0.0  ;;  %v2281_v47 = vsel %vm2209_vm5, %v4715_v22, 0.0  ;;  %v2519_v54 = vsel %vm2447_vm3, %v4733_v18, 0.0  ;;  %vm2665_vm0 = vcmp.eq.s32.totalorder %v1853_v33, %v4736_v45 }
 0x3e1   : > { %v2738_v2 = vadd.f32 %v2674_v29, %v2520_v46  ;;  %v2345_v19 = vadd.f32 %v2281_v47, %v2045_v30  ;;  %v2737_v36 = vsel %vm2665_vm0, %v4740_v13, 0.0  ;;  %vm1972_vm7 = vcmp.eq.s32.totalorder %v1853_v33, %v4537_v16 }
 0x3e2   : > { %v2044_v23 = vsel %vm1972_vm7, %v4523_v4, 0.0  ;;  %vm2208_vm14 = vcmp.eq.s32.totalorder %v1853_v33, %v4540_v5  ;;  %vm2446_vm9 = vcmp.eq.s32.totalorder %v1853_v33, %v4555_v12  ;;  %vm2664_vm12 = vcmp.eq.s32.totalorder %v1853_v33, %v4558_v53 }
 0x3e3   : > { %2833 = vmatpush1.msra.mxu1 %v2738_v2  ;;  %v2583_v40 = vadd.f32 %v2519_v54, %v2345_v19  ;;  %v2280_v9 = vsel %vm2208_vm14, %v4543_v10, 0.0  ;;  %v2518_v63 = vsel %vm2446_vm9, %v4561_v26, 0.0  ;;  %v2736_v27 = vsel %vm2664_vm12, %v4604_v34, 0.0 }
 0x3e4   : > { %v2344_v14 = vadd.f32 %v2280_v9, %v2044_v23  ;;  %vm1971_vm11 = vcmp.eq.s32.totalorder %v1852_v56, %v4702_v52  ;;  %vm2207_vm13 = vcmp.eq.s32.totalorder %v1852_v56, %v4727_v62  ;;  %vm2445_vm8 = vcmp.eq.s32.totalorder %v1852_v56, %v4730_v24 }
 0x3e5   : > { %v2801_v1 = vadd.f32 %v2737_v36, %v2583_v40  ;;  %v2043_v8 = vsel %vm1971_vm11, %v4689_v60, 0.0  ;;  %v2279_v41 = vsel %vm2207_vm13, %v4715_v22, 0.0  ;;  %v2517_v28 = vsel %vm2445_vm8, %v4733_v18, 0.0 }
 0x3e6   : > { %v2582_v42 = vadd.f32 %v2518_v63, %v2344_v14  ;;  %v2343_v32 = vadd.f32 %v2279_v41, %v2043_v8  ;;  %vm2663_vm15 = vcmp.eq.s32.totalorder %v1852_v56, %v4736_v45  ;;  %vm1970_vm10 = vcmp.eq.s32.totalorder %v1852_v56, %v4537_v16 }
 0x3e7   : > { %2834 = vmatprep.subr.mxu1 %v2801_v1  ;;  %v2735_v25 = vsel %vm2663_vm15, %v4740_v13, 0.0  ;;  %v2042_v44 = vsel %vm1970_vm10, %v4523_v4, 0.0  ;;  %vm2206_vm6 = vcmp.eq.s32.totalorder %v1852_v56, %v4540_v5  ;;  %vm2444_vm2 = vcmp.eq.s32.totalorder %v1852_v56, %v4555_v12 }
 0x3e8   : > { %v2800_v3 = vadd.f32 %v2736_v27, %v2582_v42  ;;  %v2581_v20 = vadd.f32 %v2517_v28, %v2343_v32  ;;  %v2278_v21 = vsel %vm2206_vm6, %v4543_v10, 0.0  ;;  %v2516_v35 = vsel %vm2444_vm2, %v4561_v26, 0.0 }
 0x3e9   : > { %v2342_v39 = vadd.f32 %v2278_v21, %v2042_v44  ;;  %vm2662_vm4 = vcmp.eq.s32.totalorder %v1852_v56, %v4558_v53  ;;  %vm1969_vm1 = vcmp.eq.s32.totalorder %v5319_v48, %v4702_v52  ;;  %vm2205_vm5 = vcmp.eq.s32.totalorder %v5319_v48, %v4727_v62 }
 0x3ea   : > { %2835 = vmatpush2.msra.mxu1 %v2800_v3  ;;  %v2799_v17 = vadd.f32 %v2735_v25, %v2581_v20  ;;  %v2734_v6 = vsel %vm2662_vm4, %v4604_v34, 0.0  ;;  %v2041_v0 = vsel %vm1969_vm1, %v4689_v60, 0.0  ;;  %v2277_v7 = vsel %vm2205_vm5, %v4715_v22, 0.0 }
 0x3eb   : > { %v2580_v49 = vadd.f32 %v2516_v35, %v2342_v39  ;;  %v2341_v55 = vadd.f32 %v2277_v7, %v2041_v0  ;;  %vm2443_vm3 = vcmp.eq.s32.totalorder %v5319_v48, %v4730_v24  ;;  %vm2661_vm0 = vcmp.eq.s32.totalorder %v5319_v48, %v4736_v45 }
 0x3ec   : > { %2836 = vmatprep.subr.mxu1 %v2799_v17  ;;  %v2515_v37 = vsel %vm2443_vm3, %v4733_v18, 0.0  ;;  %v2733_v11 = vsel %vm2661_vm0, %v4740_v13, 0.0  ;;  %vm1968_vm7 = vcmp.eq.s32.totalorder %v5319_v48, %v4537_v16  ;;  %vm2204_vm14 = vcmp.eq.s32.totalorder %v5319_v48, %v4540_v5 }
 0x3ed   : > { %v2798_v50 = vadd.f32 %v2734_v6, %v2580_v49  ;;  %v2579_v38 = vadd.f32 %v2515_v37, %v2341_v55  ;;  %v2040_v15 = vsel %vm1968_vm7, %v4523_v4, 0.0  ;;  %v2276_v57 = vsel %vm2204_vm14, %v4543_v10, 0.0 }
 0x3ee   : > { %v2340_v31 = vadd.f32 %v2276_v57, %v2040_v15  ;;  %vm2442_vm9 = vcmp.eq.s32.totalorder %v5319_v48, %v4555_v12  ;;  %vm2660_vm12 = vcmp.eq.s32.totalorder %v5319_v48, %v4558_v53  ;;  %vm1967_vm11 = vcmp.eq.s32.totalorder %v5322_v61, %v4702_v52 }
 0x3ef   : > { %2837 = vmatpush2.msra.mxu1 %v2798_v50  ;;  %v2797_v51 = vadd.f32 %v2733_v11, %v2579_v38  ;;  %v2514_v29 = vsel %vm2442_vm9, %v4561_v26, 0.0  ;;  %v2732_v33 = vsel %vm2660_vm12, %v4604_v34, 0.0  ;;  %v2039_v56 = vsel %vm1967_vm11, %v4689_v60, 0.0 }
 0x3f0   : > { %v2578_v58 = vadd.f32 %v2514_v29, %v2340_v31  ;;  %vm2203_vm13 = vcmp.eq.s32.totalorder %v5322_v61, %v4727_v62  ;;  %vm2441_vm8 = vcmp.eq.s32.totalorder %v5322_v61, %v4730_v24  ;;  %vm2659_vm15 = vcmp.eq.s32.totalorder %v5322_v61, %v4736_v45 }
 0x3f1   : > { %2838 = vmatprep.subr.mxu1 %v2797_v51  ;;  %v2275_v48 = vsel %vm2203_vm13, %v4715_v22, 0.0  ;;  %v2513_v46 = vsel %vm2441_vm8, %v4733_v18, 0.0  ;;  %v2731_v30 = vsel %vm2659_vm15, %v4740_v13, 0.0  ;;  %vm1966_vm10 = vcmp.eq.s32.totalorder %v5322_v61, %v4537_v16 }
 0x3f2   : > { %v2796_v47 = vadd.f32 %v2732_v33, %v2578_v58  ;;  %v2339_v54 = vadd.f32 %v2275_v48, %v2039_v56  ;;  %v2038_v2 = vsel %vm1966_vm10, %v4523_v4, 0.0  ;;  %vm2202_vm6 = vcmp.eq.s32.totalorder %v5322_v61, %v4540_v5 }
 0x3f3   : > { %v2274_v19 = vsel %vm2202_vm6, %v4543_v10, 0.0  ;;  %vm2440_vm2 = vcmp.eq.s32.totalorder %v5322_v61, %v4555_v12  ;;  %vm2658_vm4 = vcmp.eq.s32.totalorder %v5322_v61, %v4558_v53  ;;  %vm1965_vm1 = vcmp.eq.s32.totalorder %v5325_v43, %v4702_v52 }
 0x3f4   : > { %2839 = vmatpush2.msra.mxu1 %v2796_v47  ;;  %v2577_v36 = vadd.f32 %v2513_v46, %v2339_v54  ;;  %v2338_v23 = vadd.f32 %v2274_v19, %v2038_v2  ;;  %v2512_v40 = vsel %vm2440_vm2, %v4561_v26, 0.0  ;;  %v2730_v9 = vsel %vm2658_vm4, %v4604_v34, 0.0 }
 0x3f5   : > { %v2037_v63 = vsel %vm1965_vm1, %v4689_v60, 0.0  ;;  %vm2201_vm5 = vcmp.eq.s32.totalorder %v5325_v43, %v4727_v62  ;;  %vm2439_vm3 = vcmp.eq.s32.totalorder %v5325_v43, %v4730_v24  ;;  %vm2657_vm0 = vcmp.eq.s32.totalorder %v5325_v43, %v4736_v45 }
 0x3f6   : > { %v2795_v61 = vadd.f32 %v2731_v30, %v2577_v36  ;;  %v2576_v27 = vadd.f32 %v2512_v40, %v2338_v23  ;;  %v2273_v14 = vsel %vm2201_vm5, %v4715_v22, 0.0  ;;  %v2511_v1 = vsel %vm2439_vm3, %v4733_v18, 0.0 }
 0x3f7   : > { %v2337_v8 = vadd.f32 %v2273_v14, %v2037_v63  ;;  %v2729_v41 = vsel %vm2657_vm0, %v4740_v13, 0.0  ;;  %vm1964_vm7 = vcmp.eq.s32.totalorder %v5325_v43, %v4537_v16  ;;  %vm2200_vm14 = vcmp.eq.s32.totalorder %v5325_v43, %v4540_v5 }
 0x3f8   : > { %2840 = vmatprep.subr.mxu1 %v2795_v61  ;;  %v2794_v28 = vadd.f32 %v2730_v9, %v2576_v27  ;;  %v2036_v42 = vsel %vm1964_vm7, %v4523_v4, 0.0  ;;  %v2272_v32 = vsel %vm2200_vm14, %v4543_v10, 0.0  ;;  %vm2438_vm9 = vcmp.eq.s32.totalorder %v5325_v43, %v4555_v12 }
 0x3f9   : > { %v2575_v25 = vadd.f32 %v2511_v1, %v2337_v8  ;;  %v2336_v44 = vadd.f32 %v2272_v32, %v2036_v42  ;;  %v2510_v3 = vsel %vm2438_vm9, %v4561_v26, 0.0  ;;  %vm2656_vm12 = vcmp.eq.s32.totalorder %v5325_v43, %v4558_v53 }
 0x3fa   : > { %2841 = vmatpush2.msra.mxu1 %v2794_v28  ;;  %v2728_v20 = vsel %vm2656_vm12, %v4604_v34, 0.0  ;;  %v1848_v21 = vadd.s32 208, %v5792_v59  ;;  %v1847_v35 = vadd.s32 200, %v5792_v59  ;;  %v5434_v39 = vadd.s32 192, %v5792_v59 }
 0x3fb   : > { %v2793_v17 = vadd.f32 %v2729_v41, %v2575_v25  ;;  %v2574_v6 = vadd.f32 %v2510_v3, %v2336_v44  ;;  %v5437_v0 = vadd.s32 184, %v5792_v59  ;;  %v5440_v7 = vadd.s32 176, %v5792_v59 }
 0x3fc   : > { %vm1963_vm11 = vcmp.eq.s32.totalorder %v1848_v21, %v4702_v52  ;;  %vm2199_vm13 = vcmp.eq.s32.totalorder %v1848_v21, %v4727_v62  ;;  %vm2437_vm8 = vcmp.eq.s32.totalorder %v1848_v21, %v4730_v24  ;;  %vm2655_vm15 = vcmp.eq.s32.totalorder %v1848_v21, %v4736_v45 }
 0x3fd   : > { %2842 = vmatprep.subr.mxu1 %v2793_v17  ;;  %v2792_v43 = vadd.f32 %v2728_v20, %v2574_v6  ;;  %v2035_v49 = vsel %vm1963_vm11, %v4689_v60, 0.0  ;;  %v2271_v55 = vsel %vm2199_vm13, %v4715_v22, 0.0  ;;  %v2509_v37 = vsel %vm2437_vm8, %v4733_v18, 0.0 }
 0x3fe   : > { %v2335_v11 = vadd.f32 %v2271_v55, %v2035_v49  ;;  %v2727_v50 = vsel %vm2655_vm15, %v4740_v13, 0.0  ;;  %vm1962_vm10 = vcmp.eq.s32.totalorder %v1848_v21, %v4537_v16  ;;  %vm2198_vm6 = vcmp.eq.s32.totalorder %v1848_v21, %v4540_v5 }
 0x3ff   : > { %2843 = vmatpush2.msra.mxu1 %v2792_v43  ;;  %v2034_v38 = vsel %vm1962_vm10, %v4523_v4, 0.0  ;;  %v2270_v15 = vsel %vm2198_vm6, %v4543_v10, 0.0  ;;  %vm2436_vm2 = vcmp.eq.s32.totalorder %v1848_v21, %v4555_v12  ;;  %vm2654_vm4 = vcmp.eq.s32.totalorder %v1848_v21, %v4558_v53 }
 0x400   : > { %v2573_v57 = vadd.f32 %v2509_v37, %v2335_v11  ;;  %v2334_v31 = vadd.f32 %v2270_v15, %v2034_v38  ;;  %v2508_v51 = vsel %vm2436_vm2, %v4561_v26, 0.0  ;;  %v2726_v29 = vsel %vm2654_vm4, %v4604_v34, 0.0 }
 0x401   : > { %vm1961_vm1 = vcmp.eq.s32.totalorder %v1847_v35, %v4702_v52  ;;  %vm2197_vm5 = vcmp.eq.s32.totalorder %v1847_v35, %v4727_v62  ;;  %vm2435_vm3 = vcmp.eq.s32.totalorder %v1847_v35, %v4730_v24  ;;  %vm2653_vm0 = vcmp.eq.s32.totalorder %v1847_v35, %v4736_v45 }
 0x402   : > { %v2791_v33 = vadd.f32 %v2727_v50, %v2573_v57  ;;  %v2572_v56 = vadd.f32 %v2508_v51, %v2334_v31  ;;  %v2033_v58 = vsel %vm1961_vm1, %v4689_v60, 0.0  ;;  %v2269_v48 = vsel %vm2197_vm5, %v4715_v22, 0.0 }
 0x403   : > { %v2333_v46 = vadd.f32 %v2269_v48, %v2033_v58  ;;  %v2507_v30 = vsel %vm2435_vm3, %v4733_v18, 0.0  ;;  %v2725_v47 = vsel %vm2653_vm0, %v4740_v13, 0.0  ;;  %vm1960_vm7 = vcmp.eq.s32.totalorder %v1847_v35, %v4537_v16 }
 0x404   : > { %2844 = vmatprep.subr.mxu1 %v2791_v33  ;;  %v2790_v54 = vadd.f32 %v2726_v29, %v2572_v56  ;;  %v2032_v2 = vsel %vm1960_vm7, %v4523_v4, 0.0  ;;  %vm2196_vm14 = vcmp.eq.s32.totalorder %v1847_v35, %v4540_v5  ;;  %vm2434_vm9 = vcmp.eq.s32.totalorder %v1847_v35, %v4555_v12 }
 0x405   : > { %v2571_v19 = vadd.f32 %v2507_v30, %v2333_v46  ;;  %v2268_v36 = vsel %vm2196_vm14, %v4543_v10, 0.0  ;;  %v2506_v23 = vsel %vm2434_vm9, %v4561_v26, 0.0  ;;  %vm2652_vm12 = vcmp.eq.s32.totalorder %v1847_v35, %v4558_v53 }
 0x406   : > { %2845 = vmatpush2.msra.mxu1 %v2790_v54  ;;  %v2332_v40 = vadd.f32 %v2268_v36, %v2032_v2  ;;  %v2724_v9 = vsel %vm2652_vm12, %v4604_v34, 0.0  ;;  %vm1959_vm11 = vcmp.eq.s32.totalorder %v5434_v39, %v4702_v52  ;;  %vm2195_vm13 = vcmp.eq.s32.totalorder %v5434_v39, %v4727_v62 }
 0x407   : > { %v2789_v63 = vadd.f32 %v2725_v47, %v2571_v19  ;;  %v2031_v61 = vsel %vm1959_vm11, %v4689_v60, 0.0  ;;  %v2267_v27 = vsel %vm2195_vm13, %v4715_v22, 0.0  ;;  %vm2433_vm8 = vcmp.eq.s32.totalorder %v5434_v39, %v4730_v24 }
 0x408   : > { %v2570_v14 = vadd.f32 %v2506_v23, %v2332_v40  ;;  %v2331_v1 = vadd.f32 %v2267_v27, %v2031_v61  ;;  %v2505_v8 = vsel %vm2433_vm8, %v4733_v18, 0.0  ;;  %vm2651_vm15 = vcmp.eq.s32.totalorder %v5434_v39, %v4736_v45 }
 0x409   : > { %2846 = vmatprep.subr.mxu1 %v2789_v63  ;;  %v2723_v41 = vsel %vm2651_vm15, %v4740_v13, 0.0  ;;  %vm1958_vm10 = vcmp.eq.s32.totalorder %v5434_v39, %v4537_v16  ;;  %vm2194_vm6 = vcmp.eq.s32.totalorder %v5434_v39, %v4540_v5  ;;  %vm2432_vm2 = vcmp.eq.s32.totalorder %v5434_v39, %v4555_v12 }
 0x40a   : > { %v2788_v28 = vadd.f32 %v2724_v9, %v2570_v14  ;;  %v2569_v42 = vadd.f32 %v2505_v8, %v2331_v1  ;;  %v2030_v32 = vsel %vm1958_vm10, %v4523_v4, 0.0  ;;  %v2266_v25 = vsel %vm2194_vm6, %v4543_v10, 0.0 }
 0x40b   : > { %v2330_v44 = vadd.f32 %v2266_v25, %v2030_v32  ;;  %v2504_v3 = vsel %vm2432_vm2, %v4561_v26, 0.0  ;;  %vm2650_vm4 = vcmp.eq.s32.totalorder %v5434_v39, %v4558_v53  ;;  %vm1957_vm1 = vcmp.eq.s32.totalorder %v5437_v0, %v4702_v52 }
 0x40c   : > { %2847 = vmatpush2.msra.mxu1 %v2788_v28  ;;  %v2787_v20 = vadd.f32 %v2723_v41, %v2569_v42  ;;  %v2722_v21 = vsel %vm2650_vm4, %v4604_v34, 0.0  ;;  %v2029_v35 = vsel %vm1957_vm1, %v4689_v60, 0.0  ;;  %vm2193_vm5 = vcmp.eq.s32.totalorder %v5437_v0, %v4727_v62 }
 0x40d   : > { %v2568_v17 = vadd.f32 %v2504_v3, %v2330_v44  ;;  %v2265_v6 = vsel %vm2193_vm5, %v4715_v22, 0.0  ;;  %vm2431_vm3 = vcmp.eq.s32.totalorder %v5437_v0, %v4730_v24  ;;  %vm2649_vm0 = vcmp.eq.s32.totalorder %v5437_v0, %v4736_v45 }
 0x40e   : > { %2848 = vmatprep.subr.mxu1 %v2787_v20  ;;  %v2329_v39 = vadd.f32 %v2265_v6, %v2029_v35  ;;  %v2503_v43 = vsel %vm2431_vm3, %v4733_v18, 0.0  ;;  %v2721_v49 = vsel %vm2649_vm0, %v4740_v13, 0.0  ;;  %vm1956_vm7 = vcmp.eq.s32.totalorder %v5437_v0, %v4537_v16 }
 0x40f   : > { %v2786_v55 = vadd.f32 %v2722_v21, %v2568_v17  ;;  %v2028_v37 = vsel %vm1956_vm7, %v4523_v4, 0.0  ;;  %vm2192_vm14 = vcmp.eq.s32.totalorder %v5437_v0, %v4540_v5  ;;  %vm2430_vm9 = vcmp.eq.s32.totalorder %v5437_v0, %v4555_v12 }
 0x410   : > { %v2567_v11 = vadd.f32 %v2503_v43, %v2329_v39  ;;  %v2264_v50 = vsel %vm2192_vm14, %v4543_v10, 0.0  ;;  %v2502_v38 = vsel %vm2430_vm9, %v4561_v26, 0.0  ;;  %vm2648_vm12 = vcmp.eq.s32.totalorder %v5437_v0, %v4558_v53 }
 0x411   : > { %2849 = vmatpush2.msra.mxu1 %v2786_v55  ;;  %v2328_v15 = vadd.f32 %v2264_v50, %v2028_v37  ;;  %v2720_v57 = vsel %vm2648_vm12, %v4604_v34, 0.0  ;;  %vm1955_vm11 = vcmp.eq.s32.totalorder %v5440_v7, %v4702_v52  ;;  %vm2191_vm13 = vcmp.eq.s32.totalorder %v5440_v7, %v4727_v62 }
 0x412   : > { %v2785_v31 = vadd.f32 %v2721_v49, %v2567_v11  ;;  %v2027_v51 = vsel %vm1955_vm11, %v4689_v60, 0.0  ;;  %v2263_v29 = vsel %vm2191_vm13, %v4715_v22, 0.0  ;;  %vm2429_vm8 = vcmp.eq.s32.totalorder %v5440_v7, %v4730_v24 }
 0x413   : > { %v2566_v33 = vadd.f32 %v2502_v38, %v2328_v15  ;;  %v2327_v0 = vadd.f32 %v2263_v29, %v2027_v51  ;;  %v2501_v56 = vsel %vm2429_vm8, %v4733_v18, 0.0  ;;  %vm2647_vm15 = vcmp.eq.s32.totalorder %v5440_v7, %v4736_v45 }
 0x414   : > { %2850 = vmatprep.subr.mxu1 %v2785_v31  ;;  %v2719_v58 = vsel %vm2647_vm15, %v4740_v13, 0.0  ;;  %vm1954_vm10 = vcmp.eq.s32.totalorder %v5440_v7, %v4537_v16  ;;  %vm2190_vm6 = vcmp.eq.s32.totalorder %v5440_v7, %v4540_v5  ;;  %vm2428_vm2 = vcmp.eq.s32.totalorder %v5440_v7, %v4555_v12 }
 0x415   : > { %v2784_v48 = vadd.f32 %v2720_v57, %v2566_v33  ;;  %v2565_v46 = vadd.f32 %v2501_v56, %v2327_v0  ;;  %v2026_v30 = vsel %vm1954_vm10, %v4523_v4, 0.0  ;;  %v2262_v47 = vsel %vm2190_vm6, %v4543_v10, 0.0 }
 0x416   : > { %v2326_v54 = vadd.f32 %v2262_v47, %v2026_v30  ;;  %v2500_v2 = vsel %vm2428_vm2, %v4561_v26, 0.0  ;;  %vm2646_vm4 = vcmp.eq.s32.totalorder %v5440_v7, %v4558_v53  ;;  %v1843_v19 = vadd.s32 168, %v5792_v59 }
 0x417   : > { %2851 = vmatpush2.msra.mxu1 %v2784_v48  ;;  %v2783_v36 = vadd.f32 %v2719_v58, %v2565_v46  ;;  %v2718_v23 = vsel %vm2646_vm4, %v4604_v34, 0.0  ;;  %v1842_v40 = vadd.s32 160, %v5792_v59  ;;  %v5549_v9 = vadd.s32 152, %v5792_v59 }
 0x418   : > { %v2564_v63 = vadd.f32 %v2500_v2, %v2326_v54  ;;  %vm1953_vm1 = vcmp.eq.s32.totalorder %v1843_v19, %v4702_v52  ;;  %vm2189_vm5 = vcmp.eq.s32.totalorder %v1843_v19, %v4727_v62  ;;  %vm2427_vm3 = vcmp.eq.s32.totalorder %v1843_v19, %v4730_v24 }
 0x419   : > { %2852 = vmatprep.subr.mxu1 %v2783_v36  ;;  %v2025_v7 = vsel %vm1953_vm1, %v4689_v60, 0.0  ;;  %v2261_v61 = vsel %vm2189_vm5, %v4715_v22, 0.0  ;;  %v2499_v27 = vsel %vm2427_vm3, %v4733_v18, 0.0  ;;  %vm2645_vm0 = vcmp.eq.s32.totalorder %v1843_v19, %v4736_v45 }
 0x41a   : > { %v2782_v14 = vadd.f32 %v2718_v23, %v2564_v63  ;;  %v2325_v1 = vadd.f32 %v2261_v61, %v2025_v7  ;;  %v2717_v8 = vsel %vm2645_vm0, %v4740_v13, 0.0  ;;  %vm1952_vm7 = vcmp.eq.s32.totalorder %v1843_v19, %v4537_v16 }
 0x41b   : > { %v2024_v41 = vsel %vm1952_vm7, %v4523_v4, 0.0  ;;  %vm2188_vm14 = vcmp.eq.s32.totalorder %v1843_v19, %v4540_v5  ;;  %vm2426_vm9 = vcmp.eq.s32.totalorder %v1843_v19, %v4555_v12  ;;  %vm2644_vm12 = vcmp.eq.s32.totalorder %v1843_v19, %v4558_v53 }
 0x41c   : > { %2853 = vmatpush2.msra.mxu1 %v2782_v14  ;;  %v2563_v28 = vadd.f32 %v2499_v27, %v2325_v1  ;;  %v2260_v42 = vsel %vm2188_vm14, %v4543_v10, 0.0  ;;  %v2498_v32 = vsel %vm2426_vm9, %v4561_v26, 0.0  ;;  %v2716_v25 = vsel %vm2644_vm12, %v4604_v34, 0.0 }
 0x41d   : > { %v2324_v44 = vadd.f32 %v2260_v42, %v2024_v41  ;;  %vm1951_vm11 = vcmp.eq.s32.totalorder %v1842_v40, %v4702_v52  ;;  %vm2187_vm13 = vcmp.eq.s32.totalorder %v1842_v40, %v4727_v62  ;;  %vm2425_vm8 = vcmp.eq.s32.totalorder %v1842_v40, %v4730_v24 }
 0x41e   : > { %v2781_v3 = vadd.f32 %v2717_v8, %v2563_v28  ;;  %v2023_v20 = vsel %vm1951_vm11, %v4689_v60, 0.0  ;;  %v2259_v21 = vsel %vm2187_vm13, %v4715_v22, 0.0  ;;  %v2497_v35 = vsel %vm2425_vm8, %v4733_v18, 0.0 }
 0x41f   : > { %v2562_v17 = vadd.f32 %v2498_v32, %v2324_v44  ;;  %v2323_v6 = vadd.f32 %v2259_v21, %v2023_v20  ;;  %vm2643_vm15 = vcmp.eq.s32.totalorder %v1842_v40, %v4736_v45  ;;  %vm1950_vm10 = vcmp.eq.s32.totalorder %v1842_v40, %v4537_v16 }
 0x420   : > { %2854 = vmatprep.subr.mxu1 %v2781_v3  ;;  %v2715_v39 = vsel %vm2643_vm15, %v4740_v13, 0.0  ;;  %v2022_v43 = vsel %vm1950_vm10, %v4523_v4, 0.0  ;;  %vm2186_vm6 = vcmp.eq.s32.totalorder %v1842_v40, %v4540_v5  ;;  %vm2424_vm2 = vcmp.eq.s32.totalorder %v1842_v40, %v4555_v12 }
 0x421   : > { %v2780_v49 = vadd.f32 %v2716_v25, %v2562_v17  ;;  %v2561_v55 = vadd.f32 %v2497_v35, %v2323_v6  ;;  %v2258_v37 = vsel %vm2186_vm6, %v4543_v10, 0.0  ;;  %v2496_v11 = vsel %vm2424_vm2, %v4561_v26, 0.0 }
 0x422   : > { %v2322_v50 = vadd.f32 %v2258_v37, %v2022_v43  ;;  %vm2642_vm4 = vcmp.eq.s32.totalorder %v1842_v40, %v4558_v53  ;;  %vm1949_vm1 = vcmp.eq.s32.totalorder %v5549_v9, %v4702_v52  ;;  %vm2185_vm5 = vcmp.eq.s32.totalorder %v5549_v9, %v4727_v62 }
 0x423   : > { %2855 = vmatpush2.msra.mxu1 %v2780_v49  ;;  %v2779_v38 = vadd.f32 %v2715_v39, %v2561_v55  ;;  %v2714_v15 = vsel %vm2642_vm4, %v4604_v34, 0.0  ;;  %v2021_v57 = vsel %vm1949_vm1, %v4689_v60, 0.0  ;;  %v2257_v31 = vsel %vm2185_vm5, %v4715_v22, 0.0 }
 0x424   : > { %v2560_v51 = vadd.f32 %v2496_v11, %v2322_v50  ;;  %v2321_v29 = vadd.f32 %v2257_v31, %v2021_v57  ;;  %vm2423_vm3 = vcmp.eq.s32.totalorder %v5549_v9, %v4730_v24  ;;  %vm2641_vm0 = vcmp.eq.s32.totalorder %v5549_v9, %v4736_v45 }
 0x425   : > { %2856 = vmatprep.subr.mxu1 %v2779_v38  ;;  %v2495_v33 = vsel %vm2423_vm3, %v4733_v18, 0.0  ;;  %v2713_v0 = vsel %vm2641_vm0, %v4740_v13, 0.0  ;;  %vm1948_vm7 = vcmp.eq.s32.totalorder %v5549_v9, %v4537_v16  ;;  %vm2184_vm14 = vcmp.eq.s32.totalorder %v5549_v9, %v4540_v5 }
 0x426   : > { %v2778_v56 = vadd.f32 %v2714_v15, %v2560_v51  ;;  %v2559_v58 = vadd.f32 %v2495_v33, %v2321_v29  ;;  %v2020_v48 = vsel %vm1948_vm7, %v4523_v4, 0.0  ;;  %v2256_v46 = vsel %vm2184_vm14, %v4543_v10, 0.0  ;;  %v5861_v33 = vld [vmem:[#allocation25_spill] sm:$0xff] }
 0x427   : > { %v2320_v30 = vadd.f32 %v2256_v46, %v2020_v48  ;;  %vm2422_vm9 = vcmp.eq.s32.totalorder %v5549_v9, %v4555_v12  ;;  %vm2640_vm12 = vcmp.eq.s32.totalorder %v5549_v9, %v4558_v53  ;;  %v1840_v47 = vadd.s32 144, %v5792_v59 }
 0x428   : > { %2857 = vmatpush2.msra.mxu1 %v2778_v56  ;;  %v2777_v54 = vadd.f32 %v2713_v0, %v2559_v58  ;;  %v2494_v2 = vsel %vm2422_vm9, %v4561_v26, 0.0  ;;  %v2712_v36 = vsel %vm2640_vm12, %v4604_v34, 0.0  ;;  %v1839_v7 = vadd.s32 136, %v5792_v59  ;;  %v5864_v0 = vld [vmem:[#allocation29_spill] sm:$0xff] }
 0x429   : > { %v2558_v19 = vadd.f32 %v2494_v2, %v2320_v30  ;;  %vm1947_vm11 = vcmp.eq.s32.totalorder %v1840_v47, %v4702_v52  ;;  %vm2183_vm13 = vcmp.eq.s32.totalorder %v1840_v47, %v4727_v62  ;;  %vm2421_vm8 = vcmp.eq.s32.totalorder %v1840_v47, %v4730_v24 }
 0x42a   : > { %2858 = vmatprep.subr.mxu1 %v2777_v54  ;;  %v2019_v23 = vsel %vm1947_vm11, %v4689_v60, 0.0  ;;  %v2255_v40 = vsel %vm2183_vm13, %v4715_v22, 0.0  ;;  %vm2639_vm15 = vcmp.eq.s32.totalorder %v1840_v47, %v4736_v45  ;;  %vm1946_vm10 = vcmp.eq.s32.totalorder %v1840_v47, %v4537_v16 }
 0x42b   : > { %v2776_v9 = vadd.f32 %v2712_v36, %v2558_v19  ;;  %v2319_v63 = vadd.f32 %v2255_v40, %v2019_v23  ;;  %v2493_v61 = vsel %vm2421_vm8, %v4733_v18, 0.0  ;;  %v2711_v27 = vsel %vm2639_vm15, %v4740_v13, 0.0  ;;  %v5865_v23 = vld [vmem:[#allocation20_spill] sm:$0xff] }
 0x42c   : > { %vm2182_vm6 = vcmp.eq.s32.totalorder %v1840_v47, %v4540_v5  ;;  %vm2420_vm2 = vcmp.eq.s32.totalorder %v1840_v47, %v4555_v12  ;;  %v2018_v1 = vsel %vm1946_vm10, %v4523_v4, 0.0  ;;  %vm2638_vm4 = vcmp.eq.s32.totalorder %v1840_v47, %v4558_v53 }
 0x42d   : > { %2859 = vmatpush2.msra.mxu1 %v2776_v9  ;;  %v2557_v14 = vadd.f32 %v2493_v61, %v2319_v63  ;;  %v2254_v8 = vsel %vm2182_vm6, %v4543_v10, 0.0  ;;  %vm1945_vm1 = vcmp.eq.s32.totalorder %v1839_v7, %v4702_v52  ;;  %vm2181_vm5 = vcmp.eq.s32.totalorder %v1839_v7, %v4727_v62 }
 0x42e   : > { %v2318_v41 = vadd.f32 %v2254_v8, %v2018_v1  ;;  %vm2419_vm3 = vcmp.eq.s32.totalorder %v1839_v7, %v4730_v24  ;;  %v2492_v42 = vsel %vm2420_vm2, %v4561_v26, 0.0  ;;  %v2017_v32 = vsel %vm1945_vm1, %v4689_v60, 0.0 }
 0x42f   : > { %v2775_v28 = vadd.f32 %v2711_v27, %v2557_v14  ;;  %v2253_v25 = vsel %vm2181_vm5, %v4715_v22, 0.0  ;;  %vm2637_vm0 = vcmp.eq.s32.totalorder %v1839_v7, %v4736_v45  ;;  %vm1944_vm7 = vcmp.eq.s32.totalorder %v1839_v7, %v4537_v16 }
 0x430   : > { %v2556_v44 = vadd.f32 %v2492_v42, %v2318_v41  ;;  %v2317_v3 = vadd.f32 %v2253_v25, %v2017_v32  ;;  %v2710_v20 = vsel %vm2638_vm4, %v4604_v34, 0.0  ;;  %v2491_v21 = vsel %vm2419_vm3, %v4733_v18, 0.0 }
 0x431   : > { %2860 = vmatprep.subr.mxu1 %v2775_v28  ;;  %vm2180_vm14 = vcmp.eq.s32.totalorder %v1839_v7, %v4540_v5  ;;  %vm2418_vm9 = vcmp.eq.s32.totalorder %v1839_v7, %v4555_v12  ;;  %v2016_v6 = vsel %vm1944_vm7, %v4523_v4, 0.0  ;;  %v2709_v43 = vsel %vm2637_vm0, %v4740_v13, 0.0 }
 0x432   : > { %v2774_v35 = vadd.f32 %v2710_v20, %v2556_v44  ;;  %v2555_v17 = vadd.f32 %v2491_v21, %v2317_v3  ;;  %v2252_v39 = vsel %vm2180_vm14, %v4543_v10, 0.0  ;;  %vm2636_vm12 = vcmp.eq.s32.totalorder %v1839_v7, %v4558_v53 }
 0x433   : > { %v2316_v49 = vadd.f32 %v2252_v39, %v2016_v6  ;;  %v1838_v55 = vadd.s32 128, %v5792_v59  ;;  %v2490_v11 = vsel %vm2418_vm9, %v4561_v26, 0.0  ;;  %v2708_v38 = vsel %vm2636_vm12, %v4604_v34, 0.0 }
 0x434   : > { %2861 = vmatpush2.msra.mxu1 %v2774_v35  ;;  %v2773_v37 = vadd.f32 %v2709_v43, %v2555_v17  ;;  %v3073_v56 = vmul.f32 -1.442695, %v5864_v0 }
 0x435   : > { %v2554_v50 = vadd.f32 %v2490_v11, %v2316_v49  ;;  %vm1943_vm11 = vcmp.eq.s32.totalorder %v1838_v55, %v4702_v52  ;;  %vm2179_vm13 = vcmp.eq.s32.totalorder %v1838_v55, %v4727_v62  ;;  %vm2417_vm8 = vcmp.eq.s32.totalorder %v1838_v55, %v4730_v24 }
 0x436   : > { %2862 = vmatprep.subr.mxu1 %v2773_v37  ;;  %v2015_v15 = vsel %vm1943_vm11, %v4689_v60, 0.0  ;;  %v2251_v57 = vsel %vm2179_vm13, %v4715_v22, 0.0  ;;  %vm2635_vm15 = vcmp.eq.s32.totalorder %v1838_v55, %v4736_v45  ;;  %vm1942_vm10 = vcmp.eq.s32.totalorder %v1838_v55, %v4537_v16 }
 0x437   : > { %v2772_v31 = vadd.f32 %v2708_v38, %v2554_v50  ;;  %v2315_v59 = vadd.f32 %v2251_v57, %v2015_v15  ;;  %v2489_v51 = vsel %vm2417_vm8, %v4733_v18, 0.0  ;;  %vm2178_vm6 = vcmp.eq.s32.totalorder %v1838_v55, %v4540_v5 }
 0x438   : > { %vm2416_vm2 = vcmp.eq.s32.totalorder %v1838_v55, %v4555_v12  ;;  %v2014_v62 = vsel %vm1942_vm10, %v4523_v4, 0.0  ;;  %v2250_v60 = vsel %vm2178_vm6, %v4543_v10, 0.0  ;;  %v2707_v22 = vsel %vm2635_vm15, %v4740_v13, 0.0  ;;  %v5860_v12 = vld [vmem:[#allocation30_spill] sm:$0xff]  ;;  %v5863_v10 = vld [vmem:[#allocation27_spill] sm:$0xff] }
 0x439   : > { %2863 = vmatpush2.msra.mxu1 %v2772_v31  ;;  %v2553_v52 = vadd.f32 %v2489_v51, %v2315_v59  ;;  %v2314_v24 = vadd.f32 %v2250_v60, %v2014_v62  ;;  %vm2634_vm4 = vcmp.eq.s32.totalorder %v1838_v55, %v4558_v53  ;;  %v2488_v16 = vsel %vm2416_vm2, %v4561_v26, 0.0  ;;  %v5862_v4 = vld [vmem:[#allocation26_spill] sm:$0xff] }
 0x43a   : > { %v2706_v5 = vsel %vm2634_vm4, %v4604_v34, 0.0  ;;  %v3072_v13 = vmul.f32 -1.442695, %v5863_v10 }
 0x43b   : > { %v2771_v45 = vadd.f32 %v2707_v22, %v2553_v52  ;;  %v2552_v29 = vadd.f32 %v2488_v16, %v2314_v24 }
 0x43c   : > { %3225 = vpow2.f32 %v3072_v13 }
 0x43d   : > { %2864 = vmatprep.subr.mxu1 %v2771_v45  ;;  %v2770_v18 = vadd.f32 %v2706_v5, %v2552_v29  ;;  %3227 = vpow2.f32 %v3073_v56 }
 0x43f   : > { %2865 = vmatpush2.msra.mxu1 %v2770_v18 }
 0x440   : > { %2867 = vmatmul.mubr.f32.vlgmr.msra.gmra.mxu1 %v5860_v12 }
 0x441   : > { %2872 = vmatprep.mubr.f32.mxu1 %v5861_v33 }
 0x444   : > { %2873 = vmatmul.mubr.f32.gmra.mxu1 %v5862_v4 }
 0x449   : > { %v3226_v53 = vpop.eup %3225 }
 0x44a   : > { %v3228_v26 = vpop.eup %3227  ;;  %v1346_v58 = vadd.f32 1.0, %v3226_v53 }
 0x44b   : > { %v1347_v48 = vadd.f32 1.0, %v3228_v26  ;;  %v1813_v34 = vpop.f32.mrf.mxu1 }
 0x44c   : > { %3229 = vrcp.f32 %v1346_v58 }
 0x44d   : > { %3231 = vrcp.f32 %v1347_v48  ;;  %v1815_v46 = vpop.f32.mrf.mxu1 }
 0x44f   : > { %v1819_v54 = vpop.f32.mrf.mxu1 }
 0x451   : > { %v1821_v36 = vpop.f32.mrf.mxu1 }
 0x459   : > { %v3230_v30 = vpop.eup %3229 }
 0x45a   : > { %v3232_v47 = vpop.eup %3231  ;;  %v2891_v2 = vsub.f32 1.0, %v3230_v30  ;;  %v2882_v40 = vrot.slane %v3230_v30, %v5865_v23 }
 0x45b   : > { %v2892_v19 = vsub.f32 1.0, %v3232_v47  ;;  %v2886_v61 = vrot.slane %v3232_v47, %v5865_v23 }
 0x45c   : > { %v2896_v9 = vrot.slane %v2891_v2, %v5865_v23  ;;  %v2887_v7 = vmul.f32 %v2882_v40, %v1813_v34  ;;  %v2889_v32 = vmul.f32 %v2882_v40, %v1819_v54 }
 0x45d   : > { %v2900_v14 = vrot.slane %v2892_v19, %v5865_v23  ;;  %v2888_v8 = vmul.f32 %v2886_v61, %v1815_v46  ;;  %v2890_v20 = vmul.f32 %v2886_v61, %v1821_v36 }
 0x500   : > { %v2868_v63 = vpop.f32.mrf.mxu1 }
 0x501   : > { %v2901_v27 = vmul.f32 %v2896_v9, %v2868_v63 }
 0x502   : > { %v2870_v1 = vpop.f32.mrf.mxu1 }
 0x503   : > { %v2905_v41 = vadd.f32 %v2901_v27, %v2887_v7  ;;  %v2902_v28 = vmul.f32 %v2900_v14, %v2870_v1 }
 0x504   : > { %v2874_v42 = vpop.f32.mrf.mxu1 }
 0x505   : > { %2909 = vst [vmem:[%s321_s2] sm:$0xff] %v2905_v41  ;;  %v2906_v25 = vadd.f32 %v2902_v28, %v2888_v8  ;;  %v2903_v44 = vmul.f32 %v2896_v9, %v2874_v42 }
 0x506   : > { %v2876_v3 = vpop.f32.mrf.mxu1 }
 0x507   : > { %2910 = vst [vmem:[%s321_s2 + $0x8] sm:$0xff] %v2906_v25  ;;  %v2907_v21 = vadd.f32 %v2903_v44, %v2889_v32  ;;  %v2904_v35 = vmul.f32 %v2900_v14, %v2876_v3 }
 0x509   : > { %2911 = vst [vmem:[%s321_s2 + $0x10] sm:$0xff] %v2907_v21  ;;  %v2908_v17 = vadd.f32 %v2904_v35, %v2890_v20 }
 0x50b   : > { %2912 = vst [vmem:[%s321_s2 + $0x18] sm:$0xff] %v2908_v17 }
 0x50c   : > { %3384 = shalt.err (!%p3381_p5)
}
 0x50d   : > { %s3385_s30 = scalar_lea.hbm %s5674_s8, 512  ;;  %s3389_s10 = scalar_lea.hbm %s5723_s5, 1024 }
 0x50e   : > { %p3386_p4 = scmp.ne.s32.totalorder %s5674_s8, %s3385_s30  ;;  %p3390_p7 = scmp.lt.s32.totalorder %s5674_s8, %s5723_s5 }
 0x50f   : > { %p3391_p10 = scmp.lt.s32.totalorder %s3389_s10, %s3385_s30 }
 0x510   : > { %p3387_p12 = pnand %p3386_p4, %p3602_p1 }
 0x511   : > { %p3392_p13 = por %p3391_p10, %p3390_p7 }
 0x512   : > { %p3388_p11 = pneg %p3387_p12 }
 0x514   : > { %p3393_p0 = pnand %p3392_p13, %p3388_p11 }
 0x516   : > { %3396 = shalt.err (!%p3393_p0)
}
 0x517   : > { %s3474_s15 = smov 256  }
 0x518   : > { %3139 = dma.vmem_to_hbm [thread:$0]  (%p3602_p1), %s5669_s26, 512, %s5674_s8, %s2914_s29, %s3474_s15, %s3474_s15, %s3461_s27  }
 0x519 PF: > { %s2942_s2 = sand.u32 1, %s3435_s18   ;;  %p5866_p2 = scmp.ne.s32.totalorder %s5752_s25, 0 }
 0x51a   : > { %p5867_p6 = scmp.ge.s32.totalorder %s3447_s21, 2  ;;  %s2943_s16 = scalar_lea.sflag [#allocation6], %s2942_s2 }
 0x51c   : > { %p3159_p9 = pnand %p5867_p6, %p5866_p2 }
 0x51e   : > { %p3160_p8 = pneg %p3159_p9 }
 0x520   : > { %3430 = dma.done.wait (%p3160_p8), %s2943_s16, 512  }
 0x521   : > { %3432 = vsyncadd (%p3160_p8), %s2943_s16, 4294966784  ;;  %p22_p3 = scmp.ge.s32.totalorder %s3588_s28, 4   ;;  %s5868_s18 = smov %s3439_s19 }
 0x522   : > { %s5869_s19 = smov %s3443_s20  ;;  %s5870_s20 = smov %s3598_s6 }
 0x523   : > { %s5871_s21 = smov %s3588_s28  ;;  %24 = sbr.rel (!%p22_p3) target bundleno = 12 (0xc), region = 110 }
 0x528   :  { %2948 = vsyncpa [#allocation5], 1 }
 0x529   :  { %2950 = vsyncpa [#allocation5 + $0x1], 1 }
 0x52a   :  { %2951 = vsyncpa [#allocation8], 1 }
 0x52b   :  { %2953 = vsyncpa [#allocation8 + $0x1], 1 }
 0x52c   :  { %2954 = vsyncpa [#allocation11], 1 }
 0x52d   :  { %2955 = vsyncpa [#allocation6], 1 }
 0x52e   :  { %2957 = vsyncpa [#allocation6 + $0x1], 1 }

</bundles_post_ra>
